<compile_context>
chip_gen: v5e
topology: v5e:2x2
jax: 0.10.0
libtpu: 0.0.40
codegen_flags: <defaults>
</compile_context>

<pallas_src>
import jax
import jax.numpy as jnp
from jax.experimental import pallas as pl
from jax.experimental.pallas import tpu as pltpu

VMEM = pltpu.MemorySpace.VMEM


# ----------------------------- fused Pallas kernel -----------------------------

def _lenet_fused_kernel(x_ref, l1_ref, l2_ref, rs1_ref, cs1_ref, rs2_ref, cs2_ref,
                        b1_ref, b2_ref, w3s_ref, b3_ref, w4_ref, b4_ref, w5_ref,
                        b5_ref, o_ref):
    f32 = jnp.float32
    batch = x_ref.shape[0]

    def pool_bias_relu(s, rsel, csel, bias_col):
        # 2x2 / stride-2 max pool over row-stacked planes, fused with bias + ReLU.
        # pool(relu(s + b)) == relu(b + pool(s)) since ReLU is monotone and the
        # bias is constant within each plane.
        t = jnp.maximum(s[:, :-1], s[:, 1:])       # horizontal neighbour max (VPU)
        m = jnp.maximum(t[:-1, :], t[1:, :])       # vertical neighbour max (VPU)
        p = jnp.dot(jnp.dot(rsel, m, preferred_element_type=f32), csel,
                    preferred_element_type=f32)    # stride-2 row/col compaction (MXU)
        return jnp.maximum(p + bias_col, 0.0)

    for b in range(batch):                         # static unroll, B is tiny
        # ---- conv1 (1 -> 6, k=5) + ReLU + pool -------------------------------
        # s1[oc*24 + oh, ow] = sum_{kh,kw} w1[oc,0,kh,kw] * x[oh+kh, ow+kw]
        s1 = jnp.dot(l1_ref[0], x_ref[b, 0, :, 0:24], preferred_element_type=f32)
        for kw in range(1, 5):
            s1 = s1 + jnp.dot(l1_ref[kw], x_ref[b, 0, :, kw:kw + 24],
                              preferred_element_type=f32)           # (144, 24)
        p1 = pool_bias_relu(s1, rs1_ref[...], cs1_ref[...], b1_ref[...])  # (72, 12)

        # ---- conv2 (6 -> 16, k=5) + ReLU + pool ------------------------------
        # s2[oc*8 + oh, ow] = sum_{ci,kh,kw} w2[oc,ci,kh,kw] * p1[ci*12 + oh+kh, ow+kw]
        s2 = jnp.dot(l2_ref[0], p1[:, 0:8], preferred_element_type=f32)
        for kw in range(1, 5):
            s2 = s2 + jnp.dot(l2_ref[kw], p1[:, kw:kw + 8],
                              preferred_element_type=f32)            # (128, 8)
        p2 = pool_bias_relu(s2, rs2_ref[...], cs2_ref[...], b2_ref[...])  # (64, 4)

        # ---- fused FC stack (no flatten materialized) ------------------------
        # p2[r, j] is feature[4*r + j] of the NCHW flatten, so
        #   h1 = relu(b3 + sum_j p2[:, j]^T @ W3[j::4, :])
        h1 = b3_ref[...]                                             # (1, 120)
        for j in range(4):
            h1 = h1 + jnp.sum(p2[:, j:j + 1] * w3s_ref[j], axis=0, keepdims=True)
        h1 = jnp.maximum(h1, 0.0)
        h2 = jnp.maximum(
            jnp.dot(h1, w4_ref[...], preferred_element_type=f32) + b4_ref[...],
            0.0)                                                     # (1, 84)
        logits = (jnp.dot(h2, w5_ref[...], preferred_element_type=f32)
                  + b5_ref[...])                                     # (1, 10)
        o_ref[pl.ds(b, 1), :] = logits


# ------------------------- one-time weight packing (init) ----------------------

def prepare_params(params):
    f32 = jnp.float32
    hi = jax.lax.Precision.HIGHEST

    w1 = params["w1"].astype(f32)        # (6, 1, 5, 5)
    w2 = params["w2"].astype(f32)        # (16, 6, 5, 5)

    def shift_band(k, out_sz, in_sz):
        # band[kh, oh, row] = 1.0 where row == oh + kh
        kh = jnp.arange(k)[:, None, None]
        oh = jnp.arange(out_sz)[None, :, None]
        row = jnp.arange(in_sz)[None, None, :]
        return (row == oh + kh).astype(f32)

    # conv1: L1[kw, oc*24+oh, row] = w1[oc, 0, row-oh, kw]  (0 <= row-oh < 5)
    band1 = shift_band(5, 24, 28)                                   # (5, 24, 28)
    L1 = jnp.einsum("chw,hor->wcor", w1[:, 0], band1, precision=hi)  # (5,6,24,28)
    L1 = L1.reshape(5, 6 * 24, 28)

    # conv2: L2[kw, oc*8+oh, ci*12+row] = w2[oc, ci, row-oh, kw]
    band2 = shift_band(5, 8, 12)                                    # (5, 8, 12)
    L2 = jnp.einsum("ochw,hpr->wopcr", w2, band2, precision=hi)     # (5,16,8,6,12)
    L2 = L2.reshape(5, 16 * 8, 6 * 12)

    def pool_row_sel(n_planes, in_rows, out_rows):
        # selects row (plane*in_rows + 2*i) -> output row (plane*out_rows + i)
        r = jnp.arange(n_planes * out_rows)
        src = (r // out_rows) * in_rows + (r % out_rows) * 2
        c = jnp.arange(n_planes * in_rows - 1)
        return (c[None, :] == src[:, None]).astype(f32)

    def pool_col_sel(in_cols, out_cols):
        return (jnp.arange(in_cols - 1)[:, None]
                == 2 * jnp.arange(out_cols)[None, :]).astype(f32)

    return {
        "L1": L1,                                    # (5, 144, 28)
        "L2": L2,                                    # (5, 128, 72)
        "rsel1": pool_row_sel(6, 24, 12),            # (72, 143)
        "csel1": pool_col_sel(24, 12),               # (23, 12)
        "rsel2": pool_row_sel(16, 8, 4),             # (64, 127)
        "csel2": pool_col_sel(8, 4),                 # (7, 4)
        "b1col": jnp.repeat(params["b1"], 12)[:, None].astype(f32),   # (72, 1)
        "b2col": jnp.repeat(params["b2"], 4)[:, None].astype(f32),    # (64, 1)
        "w3s": jnp.stack([params["w3"][j::4, :] for j in range(4)], 0).astype(f32),
        "b3": params["b3"].reshape(1, -1).astype(f32),
        "w4": params["w4"].astype(f32),
        "b4": params["b4"].reshape(1, -1).astype(f32),
        "w5": params["w5"].astype(f32),
        "b5": params["b5"].reshape(1, -1).astype(f32),
    }


# --------------------------------- forward -------------------------------------

def lenet_forward(X, p):
    B = X.shape[0]
    # Single fused, VMEM-resident kernel; no grid needed at this size.
    # For large batches, add a grid over B with dimension_semantics=("parallel",)
    # so v7x's two TensorCores split the work.
    out = pl.pallas_call(
        _lenet_fused_kernel,
        out_shape=jax.ShapeDtypeStruct((B, 10), jnp.float32),
        in_specs=[pl.BlockSpec(memory_space=VMEM)] * 15,
        out_specs=pl.BlockSpec(memory_space=VMEM),
    )(X, p["L1"], p["L2"], p["rsel1"], p["csel1"], p["rsel2"], p["csel2"],
      p["b1col"], p["b2col"], p["w3s"], p["b3"], p["w4"], p["b4"], p["w5"], p["b5"])
    return out, X


# ------------------------------ params / reference ------------------------------

def init_params(key):
    ks = jax.random.split(key, 10)
    s = 0.1
    return {
        "w1": s * jax.random.normal(ks[0], (6, 1, 5, 5), jnp.float32),
        "b1": s * jax.random.normal(ks[1], (6,), jnp.float32),
        "w2": s * jax.random.normal(ks[2], (16, 6, 5, 5), jnp.float32),
        "b2": s * jax.random.normal(ks[3], (16,), jnp.float32),
        "w3": s * jax.random.normal(ks[4], (256, 120), jnp.float32),
        "b3": s * jax.random.normal(ks[5], (120,), jnp.float32),
        "w4": s * jax.random.normal(ks[6], (120, 84), jnp.float32),
        "b4": s * jax.random.normal(ks[7], (84,), jnp.float32),
        "w5": s * jax.random.normal(ks[8], (84, 10), jnp.float32),
        "b5": s * jax.random.normal(ks[9], (10,), jnp.float32),
    }


def lenet_reference(X, params):
    # Plain-XLA reference of the same module (for a numerical sanity check).
    hi = jax.lax.Precision.HIGHEST

    def pool2x2(y):
        B, C, H, W = y.shape
        return y.reshape(B, C, H // 2, 2, W // 2, 2).max(axis=(3, 5))

    y = jax.lax.conv_general_dilated(
        X, params["w1"], (1, 1), "VALID",
        dimension_numbers=("NCHW", "OIHW", "NCHW"), precision=hi)
    y = pool2x2(jax.nn.relu(y + params["b1"][None, :, None, None]))
    y = jax.lax.conv_general_dilated(
        y, params["w2"], (1, 1), "VALID",
        dimension_numbers=("NCHW", "OIHW", "NCHW"), precision=hi)
    y = pool2x2(jax.nn.relu(y + params["b2"][None, :, None, None]))
    feat = y.reshape(X.shape[0], -1)
    h = jax.nn.relu(jnp.dot(feat, params["w3"], precision=hi) + params["b3"])
    h = jax.nn.relu(jnp.dot(h, params["w4"], precision=hi) + params["b4"])
    return jnp.dot(h, params["w5"], precision=hi) + params["b5"]


if __name__ == "__main__":
    key = jax.random.PRNGKey(0)
    k_x, k_p = jax.random.split(key)
    # 28x28 spatial size is forced by the module (16*4*4 FC input). Small batch=2.
    X = jax.random.normal(k_x, (2, 1, 28, 28), jnp.float32)
    params = init_params(k_p)

    prepped = prepare_params(params)       # one-time packing, outside per-step path
    fwd = jax.jit(lenet_forward)

    out, x_back = fwd(X, prepped)
    jax.block_until_ready((out, x_back))
    assert out.shape == (2, 10) and x_back.shape == (2, 1, 28, 28)

    ref = lenet_reference(X, params)
    max_err = float(jnp.max(jnp.abs(out - ref)))
    assert max_err < 5e-2, f"kernel/reference mismatch: max abs err = {max_err}"
    print("KERNEL_OK")
</pallas_src>

<mosaic_0001>
module attributes {stable_mosaic.version = 11 : i64} {
  func.func @_lenet_fused_kernel(%arg0: memref<2x1x28x28xf32, #tpu.memory_space<vmem>>, %arg1: memref<5x144x28xf32, #tpu.memory_space<vmem>>, %arg2: memref<5x128x72xf32, #tpu.memory_space<vmem>>, %arg3: memref<72x143xf32, #tpu.memory_space<vmem>>, %arg4: memref<23x12xf32, #tpu.memory_space<vmem>>, %arg5: memref<64x127xf32, #tpu.memory_space<vmem>>, %arg6: memref<7x4xf32, #tpu.memory_space<vmem>>, %arg7: memref<72x1xf32, #tpu.memory_space<vmem>>, %arg8: memref<64x1xf32, #tpu.memory_space<vmem>>, %arg9: memref<4x64x120xf32, #tpu.memory_space<vmem>>, %arg10: memref<1x120xf32, #tpu.memory_space<vmem>>, %arg11: memref<120x84xf32, #tpu.memory_space<vmem>>, %arg12: memref<1x84xf32, #tpu.memory_space<vmem>>, %arg13: memref<84x10xf32, #tpu.memory_space<vmem>>, %arg14: memref<1x10xf32, #tpu.memory_space<vmem>>, %arg15: memref<2x10xf32, #tpu.memory_space<vmem>>) attributes {dimension_semantics = [], scalar_prefetch = 0 : i64, scratch_operands = 0 : i64, tpu.core_type = #tpu.core_type<tc>} {
    %c0 = arith.constant 0 : index
    %c0_0 = arith.constant 0 : index
    %c0_1 = arith.constant 0 : index
    %0 = vector.load %arg1[%c0, %c0_0, %c0_1] : memref<5x144x28xf32, #tpu.memory_space<vmem>>, vector<1x144x28xf32>
    %1 = vector.shape_cast %0 : vector<1x144x28xf32> to vector<144x28xf32>
    %c0_2 = arith.constant 0 : index
    %c0_3 = arith.constant 0 : index
    %c0_4 = arith.constant 0 : index
    %c0_5 = arith.constant 0 : index
    %2 = vector.load %arg0[%c0_2, %c0_3, %c0_4, %c0_5] : memref<2x1x28x28xf32, #tpu.memory_space<vmem>>, vector<1x1x28x24xf32>
    %3 = vector.shape_cast %2 : vector<1x1x28x24xf32> to vector<28x24xf32>
    %cst = arith.constant dense<0.000000e+00> : vector<144x24xf32>
    %4 = tpu.matmul %1, %3, %cst {dimension_numbers = #tpu.dot_dimension_numbers<[1], [0], [0], [1], [0, 0, 1, 1], [], []>} : vector<144x28xf32>, vector<28x24xf32>, vector<144x24xf32> -> vector<144x24xf32>
    %c1 = arith.constant 1 : index
    %c0_6 = arith.constant 0 : index
    %c0_7 = arith.constant 0 : index
    %5 = vector.load %arg1[%c1, %c0_6, %c0_7] : memref<5x144x28xf32, #tpu.memory_space<vmem>>, vector<1x144x28xf32>
    %6 = vector.shape_cast %5 : vector<1x144x28xf32> to vector<144x28xf32>
    %c0_8 = arith.constant 0 : index
    %c0_9 = arith.constant 0 : index
    %c0_10 = arith.constant 0 : index
    %c1_11 = arith.constant 1 : index
    %7 = vector.load %arg0[%c0_8, %c0_9, %c0_10, %c1_11] : memref<2x1x28x28xf32, #tpu.memory_space<vmem>>, vector<1x1x28x24xf32>
    %8 = vector.shape_cast %7 : vector<1x1x28x24xf32> to vector<28x24xf32>
    %cst_12 = arith.constant dense<0.000000e+00> : vector<144x24xf32>
    %9 = tpu.matmul %6, %8, %cst_12 {dimension_numbers = #tpu.dot_dimension_numbers<[1], [0], [0], [1], [0, 0, 1, 1], [], []>} : vector<144x28xf32>, vector<28x24xf32>, vector<144x24xf32> -> vector<144x24xf32>
    %10 = arith.addf %4, %9 : vector<144x24xf32>
    %c2 = arith.constant 2 : index
    %c0_13 = arith.constant 0 : index
    %c0_14 = arith.constant 0 : index
    %11 = vector.load %arg1[%c2, %c0_13, %c0_14] : memref<5x144x28xf32, #tpu.memory_space<vmem>>, vector<1x144x28xf32>
    %12 = vector.shape_cast %11 : vector<1x144x28xf32> to vector<144x28xf32>
    %c0_15 = arith.constant 0 : index
    %c0_16 = arith.constant 0 : index
    %c0_17 = arith.constant 0 : index
    %c2_18 = arith.constant 2 : index
    %13 = vector.load %arg0[%c0_15, %c0_16, %c0_17, %c2_18] : memref<2x1x28x28xf32, #tpu.memory_space<vmem>>, vector<1x1x28x24xf32>
    %14 = vector.shape_cast %13 : vector<1x1x28x24xf32> to vector<28x24xf32>
    %cst_19 = arith.constant dense<0.000000e+00> : vector<144x24xf32>
    %15 = tpu.matmul %12, %14, %cst_19 {dimension_numbers = #tpu.dot_dimension_numbers<[1], [0], [0], [1], [0, 0, 1, 1], [], []>} : vector<144x28xf32>, vector<28x24xf32>, vector<144x24xf32> -> vector<144x24xf32>
    %16 = arith.addf %10, %15 : vector<144x24xf32>
    %c3 = arith.constant 3 : index
    %c0_20 = arith.constant 0 : index
    %c0_21 = arith.constant 0 : index
    %17 = vector.load %arg1[%c3, %c0_20, %c0_21] : memref<5x144x28xf32, #tpu.memory_space<vmem>>, vector<1x144x28xf32>
    %18 = vector.shape_cast %17 : vector<1x144x28xf32> to vector<144x28xf32>
    %c0_22 = arith.constant 0 : index
    %c0_23 = arith.constant 0 : index
    %c0_24 = arith.constant 0 : index
    %c3_25 = arith.constant 3 : index
    %19 = vector.load %arg0[%c0_22, %c0_23, %c0_24, %c3_25] : memref<2x1x28x28xf32, #tpu.memory_space<vmem>>, vector<1x1x28x24xf32>
    %20 = vector.shape_cast %19 : vector<1x1x28x24xf32> to vector<28x24xf32>
    %cst_26 = arith.constant dense<0.000000e+00> : vector<144x24xf32>
    %21 = tpu.matmul %18, %20, %cst_26 {dimension_numbers = #tpu.dot_dimension_numbers<[1], [0], [0], [1], [0, 0, 1, 1], [], []>} : vector<144x28xf32>, vector<28x24xf32>, vector<144x24xf32> -> vector<144x24xf32>
    %22 = arith.addf %16, %21 : vector<144x24xf32>
    %c4 = arith.constant 4 : index
    %c0_27 = arith.constant 0 : index
    %c0_28 = arith.constant 0 : index
    %23 = vector.load %arg1[%c4, %c0_27, %c0_28] : memref<5x144x28xf32, #tpu.memory_space<vmem>>, vector<1x144x28xf32>
    %24 = vector.shape_cast %23 : vector<1x144x28xf32> to vector<144x28xf32>
    %c0_29 = arith.constant 0 : index
    %c0_30 = arith.constant 0 : index
    %c0_31 = arith.constant 0 : index
    %c4_32 = arith.constant 4 : index
    %25 = vector.load %arg0[%c0_29, %c0_30, %c0_31, %c4_32] : memref<2x1x28x28xf32, #tpu.memory_space<vmem>>, vector<1x1x28x24xf32>
    %26 = vector.shape_cast %25 : vector<1x1x28x24xf32> to vector<28x24xf32>
    %cst_33 = arith.constant dense<0.000000e+00> : vector<144x24xf32>
    %27 = tpu.matmul %24, %26, %cst_33 {dimension_numbers = #tpu.dot_dimension_numbers<[1], [0], [0], [1], [0, 0, 1, 1], [], []>} : vector<144x28xf32>, vector<28x24xf32>, vector<144x24xf32> -> vector<144x24xf32>
    %28 = arith.addf %22, %27 : vector<144x24xf32>
    %c0_34 = arith.constant 0 : index
    %c0_35 = arith.constant 0 : index
    %29 = vector.load %arg3[%c0_34, %c0_35] : memref<72x143xf32, #tpu.memory_space<vmem>>, vector<72x143xf32>
    %c0_36 = arith.constant 0 : index
    %c0_37 = arith.constant 0 : index
    %30 = vector.load %arg4[%c0_36, %c0_37] : memref<23x12xf32, #tpu.memory_space<vmem>>, vector<23x12xf32>
    %c0_38 = arith.constant 0 : index
    %c0_39 = arith.constant 0 : index
    %31 = vector.load %arg7[%c0_38, %c0_39] : memref<72x1xf32, #tpu.memory_space<vmem>>, vector<72x1xf32>
    %32 = vector.extract_strided_slice %28 {offsets = [0, 0], sizes = [144, 23], strides = [1, 1]} : vector<144x24xf32> to vector<144x23xf32>
    %33 = vector.extract_strided_slice %28 {offsets = [0, 1], sizes = [144, 23], strides = [1, 1]} : vector<144x24xf32> to vector<144x23xf32>
    %34 = arith.maximumf %32, %33 : vector<144x23xf32>
    %35 = vector.extract_strided_slice %34 {offsets = [0, 0], sizes = [143, 23], strides = [1, 1]} : vector<144x23xf32> to vector<143x23xf32>
    %36 = vector.extract_strided_slice %34 {offsets = [1, 0], sizes = [143, 23], strides = [1, 1]} : vector<144x23xf32> to vector<143x23xf32>
    %37 = arith.maximumf %35, %36 : vector<143x23xf32>
    %cst_40 = arith.constant dense<0.000000e+00> : vector<72x23xf32>
    %38 = tpu.matmul %29, %37, %cst_40 {dimension_numbers = #tpu.dot_dimension_numbers<[1], [0], [0], [1], [0, 0, 1, 1], [], []>} : vector<72x143xf32>, vector<143x23xf32>, vector<72x23xf32> -> vector<72x23xf32>
    %cst_41 = arith.constant dense<0.000000e+00> : vector<72x12xf32>
    %39 = tpu.matmul %38, %30, %cst_41 {dimension_numbers = #tpu.dot_dimension_numbers<[1], [0], [0], [1], [0, 0, 1, 1], [], []>} : vector<72x23xf32>, vector<23x12xf32>, vector<72x12xf32> -> vector<72x12xf32>
    %40 = vector.broadcast %31 : vector<72x1xf32> to vector<72x12xf32>
    %41 = arith.addf %39, %40 : vector<72x12xf32>
    %cst_42 = arith.constant 0.000000e+00 : f32
    %42 = vector.broadcast %cst_42 : f32 to vector<72x12xf32>
    %43 = arith.maximumf %41, %42 : vector<72x12xf32>
    %c0_43 = arith.constant 0 : index
    %c0_44 = arith.constant 0 : index
    %c0_45 = arith.constant 0 : index
    %44 = vector.load %arg2[%c0_43, %c0_44, %c0_45] : memref<5x128x72xf32, #tpu.memory_space<vmem>>, vector<1x128x72xf32>
    %45 = vector.shape_cast %44 : vector<1x128x72xf32> to vector<128x72xf32>
    %46 = vector.extract_strided_slice %43 {offsets = [0, 0], sizes = [72, 8], strides = [1, 1]} : vector<72x12xf32> to vector<72x8xf32>
    %cst_46 = arith.constant dense<0.000000e+00> : vector<128x8xf32>
    %47 = tpu.matmul %45, %46, %cst_46 {dimension_numbers = #tpu.dot_dimension_numbers<[1], [0], [0], [1], [0, 0, 1, 1], [], []>} : vector<128x72xf32>, vector<72x8xf32>, vector<128x8xf32> -> vector<128x8xf32>
    %c1_47 = arith.constant 1 : index
    %c0_48 = arith.constant 0 : index
    %c0_49 = arith.constant 0 : index
    %48 = vector.load %arg2[%c1_47, %c0_48, %c0_49] : memref<5x128x72xf32, #tpu.memory_space<vmem>>, vector<1x128x72xf32>
    %49 = vector.shape_cast %48 : vector<1x128x72xf32> to vector<128x72xf32>
    %50 = vector.extract_strided_slice %43 {offsets = [0, 1], sizes = [72, 8], strides = [1, 1]} : vector<72x12xf32> to vector<72x8xf32>
    %cst_50 = arith.constant dense<0.000000e+00> : vector<128x8xf32>
    %51 = tpu.matmul %49, %50, %cst_50 {dimension_numbers = #tpu.dot_dimension_numbers<[1], [0], [0], [1], [0, 0, 1, 1], [], []>} : vector<128x72xf32>, vector<72x8xf32>, vector<128x8xf32> -> vector<128x8xf32>
    %52 = arith.addf %47, %51 : vector<128x8xf32>
    %c2_51 = arith.constant 2 : index
    %c0_52 = arith.constant 0 : index
    %c0_53 = arith.constant 0 : index
    %53 = vector.load %arg2[%c2_51, %c0_52, %c0_53] : memref<5x128x72xf32, #tpu.memory_space<vmem>>, vector<1x128x72xf32>
    %54 = vector.shape_cast %53 : vector<1x128x72xf32> to vector<128x72xf32>
    %55 = vector.extract_strided_slice %43 {offsets = [0, 2], sizes = [72, 8], strides = [1, 1]} : vector<72x12xf32> to vector<72x8xf32>
    %cst_54 = arith.constant dense<0.000000e+00> : vector<128x8xf32>
    %56 = tpu.matmul %54, %55, %cst_54 {dimension_numbers = #tpu.dot_dimension_numbers<[1], [0], [0], [1], [0, 0, 1, 1], [], []>} : vector<128x72xf32>, vector<72x8xf32>, vector<128x8xf32> -> vector<128x8xf32>
    %57 = arith.addf %52, %56 : vector<128x8xf32>
    %c3_55 = arith.constant 3 : index
    %c0_56 = arith.constant 0 : index
    %c0_57 = arith.constant 0 : index
    %58 = vector.load %arg2[%c3_55, %c0_56, %c0_57] : memref<5x128x72xf32, #tpu.memory_space<vmem>>, vector<1x128x72xf32>
    %59 = vector.shape_cast %58 : vector<1x128x72xf32> to vector<128x72xf32>
    %60 = vector.extract_strided_slice %43 {offsets = [0, 3], sizes = [72, 8], strides = [1, 1]} : vector<72x12xf32> to vector<72x8xf32>
    %cst_58 = arith.constant dense<0.000000e+00> : vector<128x8xf32>
    %61 = tpu.matmul %59, %60, %cst_58 {dimension_numbers = #tpu.dot_dimension_numbers<[1], [0], [0], [1], [0, 0, 1, 1], [], []>} : vector<128x72xf32>, vector<72x8xf32>, vector<128x8xf32> -> vector<128x8xf32>
    %62 = arith.addf %57, %61 : vector<128x8xf32>
    %c4_59 = arith.constant 4 : index
    %c0_60 = arith.constant 0 : index
    %c0_61 = arith.constant 0 : index
    %63 = vector.load %arg2[%c4_59, %c0_60, %c0_61] : memref<5x128x72xf32, #tpu.memory_space<vmem>>, vector<1x128x72xf32>
    %64 = vector.shape_cast %63 : vector<1x128x72xf32> to vector<128x72xf32>
    %65 = vector.extract_strided_slice %43 {offsets = [0, 4], sizes = [72, 8], strides = [1, 1]} : vector<72x12xf32> to vector<72x8xf32>
    %cst_62 = arith.constant dense<0.000000e+00> : vector<128x8xf32>
    %66 = tpu.matmul %64, %65, %cst_62 {dimension_numbers = #tpu.dot_dimension_numbers<[1], [0], [0], [1], [0, 0, 1, 1], [], []>} : vector<128x72xf32>, vector<72x8xf32>, vector<128x8xf32> -> vector<128x8xf32>
    %67 = arith.addf %62, %66 : vector<128x8xf32>
    %c0_63 = arith.constant 0 : index
    %c0_64 = arith.constant 0 : index
    %68 = vector.load %arg5[%c0_63, %c0_64] : memref<64x127xf32, #tpu.memory_space<vmem>>, vector<64x127xf32>
    %c0_65 = arith.constant 0 : index
    %c0_66 = arith.constant 0 : index
    %69 = vector.load %arg6[%c0_65, %c0_66] : memref<7x4xf32, #tpu.memory_space<vmem>>, vector<7x4xf32>
    %c0_67 = arith.constant 0 : index
    %c0_68 = arith.constant 0 : index
    %70 = vector.load %arg8[%c0_67, %c0_68] : memref<64x1xf32, #tpu.memory_space<vmem>>, vector<64x1xf32>
    %71 = vector.extract_strided_slice %67 {offsets = [0, 0], sizes = [128, 7], strides = [1, 1]} : vector<128x8xf32> to vector<128x7xf32>
    %72 = vector.extract_strided_slice %67 {offsets = [0, 1], sizes = [128, 7], strides = [1, 1]} : vector<128x8xf32> to vector<128x7xf32>
    %73 = arith.maximumf %71, %72 : vector<128x7xf32>
    %74 = vector.extract_strided_slice %73 {offsets = [0, 0], sizes = [127, 7], strides = [1, 1]} : vector<128x7xf32> to vector<127x7xf32>
    %75 = vector.extract_strided_slice %73 {offsets = [1, 0], sizes = [127, 7], strides = [1, 1]} : vector<128x7xf32> to vector<127x7xf32>
    %76 = arith.maximumf %74, %75 : vector<127x7xf32>
    %cst_69 = arith.constant dense<0.000000e+00> : vector<64x7xf32>
    %77 = tpu.matmul %68, %76, %cst_69 {dimension_numbers = #tpu.dot_dimension_numbers<[1], [0], [0], [1], [0, 0, 1, 1], [], []>} : vector<64x127xf32>, vector<127x7xf32>, vector<64x7xf32> -> vector<64x7xf32>
    %cst_70 = arith.constant dense<0.000000e+00> : vector<64x4xf32>
    %78 = tpu.matmul %77, %69, %cst_70 {dimension_numbers = #tpu.dot_dimension_numbers<[1], [0], [0], [1], [0, 0, 1, 1], [], []>} : vector<64x7xf32>, vector<7x4xf32>, vector<64x4xf32> -> vector<64x4xf32>
    %79 = vector.broadcast %70 : vector<64x1xf32> to vector<64x4xf32>
    %80 = arith.addf %78, %79 : vector<64x4xf32>
    %cst_71 = arith.constant 0.000000e+00 : f32
    %81 = vector.broadcast %cst_71 : f32 to vector<64x4xf32>
    %82 = arith.maximumf %80, %81 : vector<64x4xf32>
    %c0_72 = arith.constant 0 : index
    %c0_73 = arith.constant 0 : index
    %83 = vector.load %arg10[%c0_72, %c0_73] : memref<1x120xf32, #tpu.memory_space<vmem>>, vector<1x120xf32>
    %84 = vector.extract_strided_slice %82 {offsets = [0, 0], sizes = [64, 1], strides = [1, 1]} : vector<64x4xf32> to vector<64x1xf32>
    %c0_74 = arith.constant 0 : index
    %c0_75 = arith.constant 0 : index
    %c0_76 = arith.constant 0 : index
    %85 = vector.load %arg9[%c0_74, %c0_75, %c0_76] : memref<4x64x120xf32, #tpu.memory_space<vmem>>, vector<1x64x120xf32>
    %86 = vector.shape_cast %85 : vector<1x64x120xf32> to vector<64x120xf32>
    %87 = vector.broadcast %84 : vector<64x1xf32> to vector<64x120xf32>
    %88 = arith.mulf %87, %86 : vector<64x120xf32>
    %cst_77 = arith.constant dense<0.000000e+00> : vector<120xf32>
    %89 = vector.multi_reduction <add>, %88, %cst_77 [0] : vector<64x120xf32> to vector<120xf32>
    %90 = vector.shape_cast %89 : vector<120xf32> to vector<1x120xf32>
    %91 = arith.addf %83, %90 : vector<1x120xf32>
    %92 = vector.extract_strided_slice %82 {offsets = [0, 1], sizes = [64, 1], strides = [1, 1]} : vector<64x4xf32> to vector<64x1xf32>
    %c1_78 = arith.constant 1 : index
    %c0_79 = arith.constant 0 : index
    %c0_80 = arith.constant 0 : index
    %93 = vector.load %arg9[%c1_78, %c0_79, %c0_80] : memref<4x64x120xf32, #tpu.memory_space<vmem>>, vector<1x64x120xf32>
    %94 = vector.shape_cast %93 : vector<1x64x120xf32> to vector<64x120xf32>
    %95 = vector.broadcast %92 : vector<64x1xf32> to vector<64x120xf32>
    %96 = arith.mulf %95, %94 : vector<64x120xf32>
    %cst_81 = arith.constant dense<0.000000e+00> : vector<120xf32>
    %97 = vector.multi_reduction <add>, %96, %cst_81 [0] : vector<64x120xf32> to vector<120xf32>
    %98 = vector.shape_cast %97 : vector<120xf32> to vector<1x120xf32>
    %99 = arith.addf %91, %98 : vector<1x120xf32>
    %100 = vector.extract_strided_slice %82 {offsets = [0, 2], sizes = [64, 1], strides = [1, 1]} : vector<64x4xf32> to vector<64x1xf32>
    %c2_82 = arith.constant 2 : index
    %c0_83 = arith.constant 0 : index
    %c0_84 = arith.constant 0 : index
    %101 = vector.load %arg9[%c2_82, %c0_83, %c0_84] : memref<4x64x120xf32, #tpu.memory_space<vmem>>, vector<1x64x120xf32>
    %102 = vector.shape_cast %101 : vector<1x64x120xf32> to vector<64x120xf32>
    %103 = vector.broadcast %100 : vector<64x1xf32> to vector<64x120xf32>
    %104 = arith.mulf %103, %102 : vector<64x120xf32>
    %cst_85 = arith.constant dense<0.000000e+00> : vector<120xf32>
    %105 = vector.multi_reduction <add>, %104, %cst_85 [0] : vector<64x120xf32> to vector<120xf32>
    %106 = vector.shape_cast %105 : vector<120xf32> to vector<1x120xf32>
    %107 = arith.addf %99, %106 : vector<1x120xf32>
    %108 = vector.extract_strided_slice %82 {offsets = [0, 3], sizes = [64, 1], strides = [1, 1]} : vector<64x4xf32> to vector<64x1xf32>
    %c3_86 = arith.constant 3 : index
    %c0_87 = arith.constant 0 : index
    %c0_88 = arith.constant 0 : index
    %109 = vector.load %arg9[%c3_86, %c0_87, %c0_88] : memref<4x64x120xf32, #tpu.memory_space<vmem>>, vector<1x64x120xf32>
    %110 = vector.shape_cast %109 : vector<1x64x120xf32> to vector<64x120xf32>
    %111 = vector.broadcast %108 : vector<64x1xf32> to vector<64x120xf32>
    %112 = arith.mulf %111, %110 : vector<64x120xf32>
    %cst_89 = arith.constant dense<0.000000e+00> : vector<120xf32>
    %113 = vector.multi_reduction <add>, %112, %cst_89 [0] : vector<64x120xf32> to vector<120xf32>
    %114 = vector.shape_cast %113 : vector<120xf32> to vector<1x120xf32>
    %115 = arith.addf %107, %114 : vector<1x120xf32>
    %cst_90 = arith.constant 0.000000e+00 : f32
    %116 = vector.broadcast %cst_90 : f32 to vector<1x120xf32>
    %117 = arith.maximumf %115, %116 : vector<1x120xf32>
    %c0_91 = arith.constant 0 : index
    %c0_92 = arith.constant 0 : index
    %118 = vector.load %arg11[%c0_91, %c0_92] : memref<120x84xf32, #tpu.memory_space<vmem>>, vector<120x84xf32>
    %cst_93 = arith.constant dense<0.000000e+00> : vector<1x84xf32>
    %119 = tpu.matmul %117, %118, %cst_93 {dimension_numbers = #tpu.dot_dimension_numbers<[1], [0], [0], [1], [0, 0, 1, 1], [], []>} : vector<1x120xf32>, vector<120x84xf32>, vector<1x84xf32> -> vector<1x84xf32>
    %c0_94 = arith.constant 0 : index
    %c0_95 = arith.constant 0 : index
    %120 = vector.load %arg12[%c0_94, %c0_95] : memref<1x84xf32, #tpu.memory_space<vmem>>, vector<1x84xf32>
    %121 = arith.addf %119, %120 : vector<1x84xf32>
    %cst_96 = arith.constant 0.000000e+00 : f32
    %122 = vector.broadcast %cst_96 : f32 to vector<1x84xf32>
    %123 = arith.maximumf %121, %122 : vector<1x84xf32>
    %c0_97 = arith.constant 0 : index
    %c0_98 = arith.constant 0 : index
    %124 = vector.load %arg13[%c0_97, %c0_98] : memref<84x10xf32, #tpu.memory_space<vmem>>, vector<84x10xf32>
    %cst_99 = arith.constant dense<0.000000e+00> : vector<1x10xf32>
    %125 = tpu.matmul %123, %124, %cst_99 {dimension_numbers = #tpu.dot_dimension_numbers<[1], [0], [0], [1], [0, 0, 1, 1], [], []>} : vector<1x84xf32>, vector<84x10xf32>, vector<1x10xf32> -> vector<1x10xf32>
    %c0_100 = arith.constant 0 : index
    %c0_101 = arith.constant 0 : index
    %126 = vector.load %arg14[%c0_100, %c0_101] : memref<1x10xf32, #tpu.memory_space<vmem>>, vector<1x10xf32>
    %127 = arith.addf %125, %126 : vector<1x10xf32>
    %c0_102 = arith.constant 0 : index
    %c0_103 = arith.constant 0 : index
    %128 = vector.load %arg15[%c0_102, %c0_103] : memref<2x10xf32, #tpu.memory_space<vmem>>, vector<1x10xf32>
    tpu.vector_store %arg15[%c0_102, %c0_103], %127 {strides = array<i32>} : memref<2x10xf32, #tpu.memory_space<vmem>>, vector<1x10xf32>,
    %c0_104 = arith.constant 0 : index
    %c0_105 = arith.constant 0 : index
    %c0_106 = arith.constant 0 : index
    %129 = vector.load %arg1[%c0_104, %c0_105, %c0_106] : memref<5x144x28xf32, #tpu.memory_space<vmem>>, vector<1x144x28xf32>
    %130 = vector.shape_cast %129 : vector<1x144x28xf32> to vector<144x28xf32>
    %c1_107 = arith.constant 1 : index
    %c0_108 = arith.constant 0 : index
    %c0_109 = arith.constant 0 : index
    %c0_110 = arith.constant 0 : index
    %131 = vector.load %arg0[%c1_107, %c0_108, %c0_109, %c0_110] : memref<2x1x28x28xf32, #tpu.memory_space<vmem>>, vector<1x1x28x24xf32>
    %132 = vector.shape_cast %131 : vector<1x1x28x24xf32> to vector<28x24xf32>
    %cst_111 = arith.constant dense<0.000000e+00> : vector<144x24xf32>
    %133 = tpu.matmul %130, %132, %cst_111 {dimension_numbers = #tpu.dot_dimension_numbers<[1], [0], [0], [1], [0, 0, 1, 1], [], []>} : vector<144x28xf32>, vector<28x24xf32>, vector<144x24xf32> -> vector<144x24xf32>
    %c1_112 = arith.constant 1 : index
    %c0_113 = arith.constant 0 : index
    %c0_114 = arith.constant 0 : index
    %134 = vector.load %arg1[%c1_112, %c0_113, %c0_114] : memref<5x144x28xf32, #tpu.memory_space<vmem>>, vector<1x144x28xf32>
    %135 = vector.shape_cast %134 : vector<1x144x28xf32> to vector<144x28xf32>
    %c1_115 = arith.constant 1 : index
    %c0_116 = arith.constant 0 : index
    %c0_117 = arith.constant 0 : index
    %c1_118 = arith.constant 1 : index
    %136 = vector.load %arg0[%c1_115, %c0_116, %c0_117, %c1_118] : memref<2x1x28x28xf32, #tpu.memory_space<vmem>>, vector<1x1x28x24xf32>
    %137 = vector.shape_cast %136 : vector<1x1x28x24xf32> to vector<28x24xf32>
    %cst_119 = arith.constant dense<0.000000e+00> : vector<144x24xf32>
    %138 = tpu.matmul %135, %137, %cst_119 {dimension_numbers = #tpu.dot_dimension_numbers<[1], [0], [0], [1], [0, 0, 1, 1], [], []>} : vector<144x28xf32>, vector<28x24xf32>, vector<144x24xf32> -> vector<144x24xf32>
    %139 = arith.addf %133, %138 : vector<144x24xf32>
    %c2_120 = arith.constant 2 : index
    %c0_121 = arith.constant 0 : index
    %c0_122 = arith.constant 0 : index
    %140 = vector.load %arg1[%c2_120, %c0_121, %c0_122] : memref<5x144x28xf32, #tpu.memory_space<vmem>>, vector<1x144x28xf32>
    %141 = vector.shape_cast %140 : vector<1x144x28xf32> to vector<144x28xf32>
    %c1_123 = arith.constant 1 : index
    %c0_124 = arith.constant 0 : index
    %c0_125 = arith.constant 0 : index
    %c2_126 = arith.constant 2 : index
    %142 = vector.load %arg0[%c1_123, %c0_124, %c0_125, %c2_126] : memref<2x1x28x28xf32, #tpu.memory_space<vmem>>, vector<1x1x28x24xf32>
    %143 = vector.shape_cast %142 : vector<1x1x28x24xf32> to vector<28x24xf32>
    %cst_127 = arith.constant dense<0.000000e+00> : vector<144x24xf32>
    %144 = tpu.matmul %141, %143, %cst_127 {dimension_numbers = #tpu.dot_dimension_numbers<[1], [0], [0], [1], [0, 0, 1, 1], [], []>} : vector<144x28xf32>, vector<28x24xf32>, vector<144x24xf32> -> vector<144x24xf32>
    %145 = arith.addf %139, %144 : vector<144x24xf32>
    %c3_128 = arith.constant 3 : index
    %c0_129 = arith.constant 0 : index
    %c0_130 = arith.constant 0 : index
    %146 = vector.load %arg1[%c3_128, %c0_129, %c0_130] : memref<5x144x28xf32, #tpu.memory_space<vmem>>, vector<1x144x28xf32>
    %147 = vector.shape_cast %146 : vector<1x144x28xf32> to vector<144x28xf32>
    %c1_131 = arith.constant 1 : index
    %c0_132 = arith.constant 0 : index
    %c0_133 = arith.constant 0 : index
    %c3_134 = arith.constant 3 : index
    %148 = vector.load %arg0[%c1_131, %c0_132, %c0_133, %c3_134] : memref<2x1x28x28xf32, #tpu.memory_space<vmem>>, vector<1x1x28x24xf32>
    %149 = vector.shape_cast %148 : vector<1x1x28x24xf32> to vector<28x24xf32>
    %cst_135 = arith.constant dense<0.000000e+00> : vector<144x24xf32>
    %150 = tpu.matmul %147, %149, %cst_135 {dimension_numbers = #tpu.dot_dimension_numbers<[1], [0], [0], [1], [0, 0, 1, 1], [], []>} : vector<144x28xf32>, vector<28x24xf32>, vector<144x24xf32> -> vector<144x24xf32>
    %151 = arith.addf %145, %150 : vector<144x24xf32>
    %c4_136 = arith.constant 4 : index
    %c0_137 = arith.constant 0 : index
    %c0_138 = arith.constant 0 : index
    %152 = vector.load %arg1[%c4_136, %c0_137, %c0_138] : memref<5x144x28xf32, #tpu.memory_space<vmem>>, vector<1x144x28xf32>
    %153 = vector.shape_cast %152 : vector<1x144x28xf32> to vector<144x28xf32>
    %c1_139 = arith.constant 1 : index
    %c0_140 = arith.constant 0 : index
    %c0_141 = arith.constant 0 : index
    %c4_142 = arith.constant 4 : index
    %154 = vector.load %arg0[%c1_139, %c0_140, %c0_141, %c4_142] : memref<2x1x28x28xf32, #tpu.memory_space<vmem>>, vector<1x1x28x24xf32>
    %155 = vector.shape_cast %154 : vector<1x1x28x24xf32> to vector<28x24xf32>
    %cst_143 = arith.constant dense<0.000000e+00> : vector<144x24xf32>
    %156 = tpu.matmul %153, %155, %cst_143 {dimension_numbers = #tpu.dot_dimension_numbers<[1], [0], [0], [1], [0, 0, 1, 1], [], []>} : vector<144x28xf32>, vector<28x24xf32>, vector<144x24xf32> -> vector<144x24xf32>
    %157 = arith.addf %151, %156 : vector<144x24xf32>
    %c0_144 = arith.constant 0 : index
    %c0_145 = arith.constant 0 : index
    %158 = vector.load %arg3[%c0_144, %c0_145] : memref<72x143xf32, #tpu.memory_space<vmem>>, vector<72x143xf32>
    %c0_146 = arith.constant 0 : index
    %c0_147 = arith.constant 0 : index
    %159 = vector.load %arg4[%c0_146, %c0_147] : memref<23x12xf32, #tpu.memory_space<vmem>>, vector<23x12xf32>
    %c0_148 = arith.constant 0 : index
    %c0_149 = arith.constant 0 : index
    %160 = vector.load %arg7[%c0_148, %c0_149] : memref<72x1xf32, #tpu.memory_space<vmem>>, vector<72x1xf32>
    %161 = vector.extract_strided_slice %157 {offsets = [0, 0], sizes = [144, 23], strides = [1, 1]} : vector<144x24xf32> to vector<144x23xf32>
    %162 = vector.extract_strided_slice %157 {offsets = [0, 1], sizes = [144, 23], strides = [1, 1]} : vector<144x24xf32> to vector<144x23xf32>
    %163 = arith.maximumf %161, %162 : vector<144x23xf32>
    %164 = vector.extract_strided_slice %163 {offsets = [0, 0], sizes = [143, 23], strides = [1, 1]} : vector<144x23xf32> to vector<143x23xf32>
    %165 = vector.extract_strided_slice %163 {offsets = [1, 0], sizes = [143, 23], strides = [1, 1]} : vector<144x23xf32> to vector<143x23xf32>
    %166 = arith.maximumf %164, %165 : vector<143x23xf32>
    %cst_150 = arith.constant dense<0.000000e+00> : vector<72x23xf32>
    %167 = tpu.matmul %158, %166, %cst_150 {dimension_numbers = #tpu.dot_dimension_numbers<[1], [0], [0], [1], [0, 0, 1, 1], [], []>} : vector<72x143xf32>, vector<143x23xf32>, vector<72x23xf32> -> vector<72x23xf32>
    %cst_151 = arith.constant dense<0.000000e+00> : vector<72x12xf32>
    %168 = tpu.matmul %167, %159, %cst_151 {dimension_numbers = #tpu.dot_dimension_numbers<[1], [0], [0], [1], [0, 0, 1, 1], [], []>} : vector<72x23xf32>, vector<23x12xf32>, vector<72x12xf32> -> vector<72x12xf32>
    %169 = vector.broadcast %160 : vector<72x1xf32> to vector<72x12xf32>
    %170 = arith.addf %168, %169 : vector<72x12xf32>
    %cst_152 = arith.constant 0.000000e+00 : f32
    %171 = vector.broadcast %cst_152 : f32 to vector<72x12xf32>
    %172 = arith.maximumf %170, %171 : vector<72x12xf32>
    %c0_153 = arith.constant 0 : index
    %c0_154 = arith.constant 0 : index
    %c0_155 = arith.constant 0 : index
    %173 = vector.load %arg2[%c0_153, %c0_154, %c0_155] : memref<5x128x72xf32, #tpu.memory_space<vmem>>, vector<1x128x72xf32>
    %174 = vector.shape_cast %173 : vector<1x128x72xf32> to vector<128x72xf32>
    %175 = vector.extract_strided_slice %172 {offsets = [0, 0], sizes = [72, 8], strides = [1, 1]} : vector<72x12xf32> to vector<72x8xf32>
    %cst_156 = arith.constant dense<0.000000e+00> : vector<128x8xf32>
    %176 = tpu.matmul %174, %175, %cst_156 {dimension_numbers = #tpu.dot_dimension_numbers<[1], [0], [0], [1], [0, 0, 1, 1], [], []>} : vector<128x72xf32>, vector<72x8xf32>, vector<128x8xf32> -> vector<128x8xf32>
    %c1_157 = arith.constant 1 : index
    %c0_158 = arith.constant 0 : index
    %c0_159 = arith.constant 0 : index
    %177 = vector.load %arg2[%c1_157, %c0_158, %c0_159] : memref<5x128x72xf32, #tpu.memory_space<vmem>>, vector<1x128x72xf32>
    %178 = vector.shape_cast %177 : vector<1x128x72xf32> to vector<128x72xf32>
    %179 = vector.extract_strided_slice %172 {offsets = [0, 1], sizes = [72, 8], strides = [1, 1]} : vector<72x12xf32> to vector<72x8xf32>
    %cst_160 = arith.constant dense<0.000000e+00> : vector<128x8xf32>
    %180 = tpu.matmul %178, %179, %cst_160 {dimension_numbers = #tpu.dot_dimension_numbers<[1], [0], [0], [1], [0, 0, 1, 1], [], []>} : vector<128x72xf32>, vector<72x8xf32>, vector<128x8xf32> -> vector<128x8xf32>
    %181 = arith.addf %176, %180 : vector<128x8xf32>
    %c2_161 = arith.constant 2 : index
    %c0_162 = arith.constant 0 : index
    %c0_163 = arith.constant 0 : index
    %182 = vector.load %arg2[%c2_161, %c0_162, %c0_163] : memref<5x128x72xf32, #tpu.memory_space<vmem>>, vector<1x128x72xf32>
    %183 = vector.shape_cast %182 : vector<1x128x72xf32> to vector<128x72xf32>
    %184 = vector.extract_strided_slice %172 {offsets = [0, 2], sizes = [72, 8], strides = [1, 1]} : vector<72x12xf32> to vector<72x8xf32>
    %cst_164 = arith.constant dense<0.000000e+00> : vector<128x8xf32>
    %185 = tpu.matmul %183, %184, %cst_164 {dimension_numbers = #tpu.dot_dimension_numbers<[1], [0], [0], [1], [0, 0, 1, 1], [], []>} : vector<128x72xf32>, vector<72x8xf32>, vector<128x8xf32> -> vector<128x8xf32>
    %186 = arith.addf %181, %185 : vector<128x8xf32>
    %c3_165 = arith.constant 3 : index
    %c0_166 = arith.constant 0 : index
    %c0_167 = arith.constant 0 : index
    %187 = vector.load %arg2[%c3_165, %c0_166, %c0_167] : memref<5x128x72xf32, #tpu.memory_space<vmem>>, vector<1x128x72xf32>
    %188 = vector.shape_cast %187 : vector<1x128x72xf32> to vector<128x72xf32>
    %189 = vector.extract_strided_slice %172 {offsets = [0, 3], sizes = [72, 8], strides = [1, 1]} : vector<72x12xf32> to vector<72x8xf32>
    %cst_168 = arith.constant dense<0.000000e+00> : vector<128x8xf32>
    %190 = tpu.matmul %188, %189, %cst_168 {dimension_numbers = #tpu.dot_dimension_numbers<[1], [0], [0], [1], [0, 0, 1, 1], [], []>} : vector<128x72xf32>, vector<72x8xf32>, vector<128x8xf32> -> vector<128x8xf32>
    %191 = arith.addf %186, %190 : vector<128x8xf32>
    %c4_169 = arith.constant 4 : index
    %c0_170 = arith.constant 0 : index
    %c0_171 = arith.constant 0 : index
    %192 = vector.load %arg2[%c4_169, %c0_170, %c0_171] : memref<5x128x72xf32, #tpu.memory_space<vmem>>, vector<1x128x72xf32>
    %193 = vector.shape_cast %192 : vector<1x128x72xf32> to vector<128x72xf32>
    %194 = vector.extract_strided_slice %172 {offsets = [0, 4], sizes = [72, 8], strides = [1, 1]} : vector<72x12xf32> to vector<72x8xf32>
    %cst_172 = arith.constant dense<0.000000e+00> : vector<128x8xf32>
    %195 = tpu.matmul %193, %194, %cst_172 {dimension_numbers = #tpu.dot_dimension_numbers<[1], [0], [0], [1], [0, 0, 1, 1], [], []>} : vector<128x72xf32>, vector<72x8xf32>, vector<128x8xf32> -> vector<128x8xf32>
    %196 = arith.addf %191, %195 : vector<128x8xf32>
    %c0_173 = arith.constant 0 : index
    %c0_174 = arith.constant 0 : index
    %197 = vector.load %arg5[%c0_173, %c0_174] : memref<64x127xf32, #tpu.memory_space<vmem>>, vector<64x127xf32>
    %c0_175 = arith.constant 0 : index
    %c0_176 = arith.constant 0 : index
    %198 = vector.load %arg6[%c0_175, %c0_176] : memref<7x4xf32, #tpu.memory_space<vmem>>, vector<7x4xf32>
    %c0_177 = arith.constant 0 : index
    %c0_178 = arith.constant 0 : index
    %199 = vector.load %arg8[%c0_177, %c0_178] : memref<64x1xf32, #tpu.memory_space<vmem>>, vector<64x1xf32>
    %200 = vector.extract_strided_slice %196 {offsets = [0, 0], sizes = [128, 7], strides = [1, 1]} : vector<128x8xf32> to vector<128x7xf32>
    %201 = vector.extract_strided_slice %196 {offsets = [0, 1], sizes = [128, 7], strides = [1, 1]} : vector<128x8xf32> to vector<128x7xf32>
    %202 = arith.maximumf %200, %201 : vector<128x7xf32>
    %203 = vector.extract_strided_slice %202 {offsets = [0, 0], sizes = [127, 7], strides = [1, 1]} : vector<128x7xf32> to vector<127x7xf32>
    %204 = vector.extract_strided_slice %202 {offsets = [1, 0], sizes = [127, 7], strides = [1, 1]} : vector<128x7xf32> to vector<127x7xf32>
    %205 = arith.maximumf %203, %204 : vector<127x7xf32>
    %cst_179 = arith.constant dense<0.000000e+00> : vector<64x7xf32>
    %206 = tpu.matmul %197, %205, %cst_179 {dimension_numbers = #tpu.dot_dimension_numbers<[1], [0], [0], [1], [0, 0, 1, 1], [], []>} : vector<64x127xf32>, vector<127x7xf32>, vector<64x7xf32> -> vector<64x7xf32>
    %cst_180 = arith.constant dense<0.000000e+00> : vector<64x4xf32>
    %207 = tpu.matmul %206, %198, %cst_180 {dimension_numbers = #tpu.dot_dimension_numbers<[1], [0], [0], [1], [0, 0, 1, 1], [], []>} : vector<64x7xf32>, vector<7x4xf32>, vector<64x4xf32> -> vector<64x4xf32>
    %208 = vector.broadcast %199 : vector<64x1xf32> to vector<64x4xf32>
    %209 = arith.addf %207, %208 : vector<64x4xf32>
    %cst_181 = arith.constant 0.000000e+00 : f32
    %210 = vector.broadcast %cst_181 : f32 to vector<64x4xf32>
    %211 = arith.maximumf %209, %210 : vector<64x4xf32>
    %c0_182 = arith.constant 0 : index
    %c0_183 = arith.constant 0 : index
    %212 = vector.load %arg10[%c0_182, %c0_183] : memref<1x120xf32, #tpu.memory_space<vmem>>, vector<1x120xf32>
    %213 = vector.extract_strided_slice %211 {offsets = [0, 0], sizes = [64, 1], strides = [1, 1]} : vector<64x4xf32> to vector<64x1xf32>
    %c0_184 = arith.constant 0 : index
    %c0_185 = arith.constant 0 : index
    %c0_186 = arith.constant 0 : index
    %214 = vector.load %arg9[%c0_184, %c0_185, %c0_186] : memref<4x64x120xf32, #tpu.memory_space<vmem>>, vector<1x64x120xf32>
    %215 = vector.shape_cast %214 : vector<1x64x120xf32> to vector<64x120xf32>
    %216 = vector.broadcast %213 : vector<64x1xf32> to vector<64x120xf32>
    %217 = arith.mulf %216, %215 : vector<64x120xf32>
    %cst_187 = arith.constant dense<0.000000e+00> : vector<120xf32>
    %218 = vector.multi_reduction <add>, %217, %cst_187 [0] : vector<64x120xf32> to vector<120xf32>
    %219 = vector.shape_cast %218 : vector<120xf32> to vector<1x120xf32>
    %220 = arith.addf %212, %219 : vector<1x120xf32>
    %221 = vector.extract_strided_slice %211 {offsets = [0, 1], sizes = [64, 1], strides = [1, 1]} : vector<64x4xf32> to vector<64x1xf32>
    %c1_188 = arith.constant 1 : index
    %c0_189 = arith.constant 0 : index
    %c0_190 = arith.constant 0 : index
    %222 = vector.load %arg9[%c1_188, %c0_189, %c0_190] : memref<4x64x120xf32, #tpu.memory_space<vmem>>, vector<1x64x120xf32>
    %223 = vector.shape_cast %222 : vector<1x64x120xf32> to vector<64x120xf32>
    %224 = vector.broadcast %221 : vector<64x1xf32> to vector<64x120xf32>
    %225 = arith.mulf %224, %223 : vector<64x120xf32>
    %cst_191 = arith.constant dense<0.000000e+00> : vector<120xf32>
    %226 = vector.multi_reduction <add>, %225, %cst_191 [0] : vector<64x120xf32> to vector<120xf32>
    %227 = vector.shape_cast %226 : vector<120xf32> to vector<1x120xf32>
    %228 = arith.addf %220, %227 : vector<1x120xf32>
    %229 = vector.extract_strided_slice %211 {offsets = [0, 2], sizes = [64, 1], strides = [1, 1]} : vector<64x4xf32> to vector<64x1xf32>
    %c2_192 = arith.constant 2 : index
    %c0_193 = arith.constant 0 : index
    %c0_194 = arith.constant 0 : index
    %230 = vector.load %arg9[%c2_192, %c0_193, %c0_194] : memref<4x64x120xf32, #tpu.memory_space<vmem>>, vector<1x64x120xf32>
    %231 = vector.shape_cast %230 : vector<1x64x120xf32> to vector<64x120xf32>
    %232 = vector.broadcast %229 : vector<64x1xf32> to vector<64x120xf32>
    %233 = arith.mulf %232, %231 : vector<64x120xf32>
    %cst_195 = arith.constant dense<0.000000e+00> : vector<120xf32>
    %234 = vector.multi_reduction <add>, %233, %cst_195 [0] : vector<64x120xf32> to vector<120xf32>
    %235 = vector.shape_cast %234 : vector<120xf32> to vector<1x120xf32>
    %236 = arith.addf %228, %235 : vector<1x120xf32>
    %237 = vector.extract_strided_slice %211 {offsets = [0, 3], sizes = [64, 1], strides = [1, 1]} : vector<64x4xf32> to vector<64x1xf32>
    %c3_196 = arith.constant 3 : index
    %c0_197 = arith.constant 0 : index
    %c0_198 = arith.constant 0 : index
    %238 = vector.load %arg9[%c3_196, %c0_197, %c0_198] : memref<4x64x120xf32, #tpu.memory_space<vmem>>, vector<1x64x120xf32>
    %239 = vector.shape_cast %238 : vector<1x64x120xf32> to vector<64x120xf32>
    %240 = vector.broadcast %237 : vector<64x1xf32> to vector<64x120xf32>
    %241 = arith.mulf %240, %239 : vector<64x120xf32>
    %cst_199 = arith.constant dense<0.000000e+00> : vector<120xf32>
    %242 = vector.multi_reduction <add>, %241, %cst_199 [0] : vector<64x120xf32> to vector<120xf32>
    %243 = vector.shape_cast %242 : vector<120xf32> to vector<1x120xf32>
    %244 = arith.addf %236, %243 : vector<1x120xf32>
    %cst_200 = arith.constant 0.000000e+00 : f32
    %245 = vector.broadcast %cst_200 : f32 to vector<1x120xf32>
    %246 = arith.maximumf %244, %245 : vector<1x120xf32>
    %c0_201 = arith.constant 0 : index
    %c0_202 = arith.constant 0 : index
    %247 = vector.load %arg11[%c0_201, %c0_202] : memref<120x84xf32, #tpu.memory_space<vmem>>, vector<120x84xf32>
    %cst_203 = arith.constant dense<0.000000e+00> : vector<1x84xf32>
    %248 = tpu.matmul %246, %247, %cst_203 {dimension_numbers = #tpu.dot_dimension_numbers<[1], [0], [0], [1], [0, 0, 1, 1], [], []>} : vector<1x120xf32>, vector<120x84xf32>, vector<1x84xf32> -> vector<1x84xf32>
    %c0_204 = arith.constant 0 : index
    %c0_205 = arith.constant 0 : index
    %249 = vector.load %arg12[%c0_204, %c0_205] : memref<1x84xf32, #tpu.memory_space<vmem>>, vector<1x84xf32>
    %250 = arith.addf %248, %249 : vector<1x84xf32>
    %cst_206 = arith.constant 0.000000e+00 : f32
    %251 = vector.broadcast %cst_206 : f32 to vector<1x84xf32>
    %252 = arith.maximumf %250, %251 : vector<1x84xf32>
    %c0_207 = arith.constant 0 : index
    %c0_208 = arith.constant 0 : index
    %253 = vector.load %arg13[%c0_207, %c0_208] : memref<84x10xf32, #tpu.memory_space<vmem>>, vector<84x10xf32>
    %cst_209 = arith.constant dense<0.000000e+00> : vector<1x10xf32>
    %254 = tpu.matmul %252, %253, %cst_209 {dimension_numbers = #tpu.dot_dimension_numbers<[1], [0], [0], [1], [0, 0, 1, 1], [], []>} : vector<1x84xf32>, vector<84x10xf32>, vector<1x10xf32> -> vector<1x10xf32>
    %c0_210 = arith.constant 0 : index
    %c0_211 = arith.constant 0 : index
    %255 = vector.load %arg14[%c0_210, %c0_211] : memref<1x10xf32, #tpu.memory_space<vmem>>, vector<1x10xf32>
    %256 = arith.addf %254, %255 : vector<1x10xf32>
    %c1_212 = arith.constant 1 : index
    %c0_213 = arith.constant 0 : index
    %257 = vector.load %arg15[%c1_212, %c0_213] : memref<2x10xf32, #tpu.memory_space<vmem>>, vector<1x10xf32>
    tpu.vector_store %arg15[%c1_212, %c0_213], %256 {strides = array<i32>} : memref<2x10xf32, #tpu.memory_space<vmem>>, vector<1x10xf32>,
    return
  }
}

</mosaic_0001>

<bundles_post_ra>
// kernel: lenet_forward.1
= control target key start
LH: loop header
LB: loop body
LE: loop exit
PB: predicated region body
PF: predicated region fallthrough
CT: control target
= control target key end

     0   :  { %s6946_s24 = smov 127   ;;  %s10322_s0 = inlined_call_operand.vmem [shape: f32[2,1,28,28], index: 0, kind: input, shape index: {}]   ;;  %s10323_s1 = inlined_call_operand.vmem [shape: f32[5,144,28], index: 1, kind: input, shape index: {}]   ;;  %s10324_s2 = inlined_call_operand.vmem [shape: f32[5,128,72], index: 2, kind: input, shape index: {}]   ;;  %s10325_s3 = inlined_call_operand.vmem [shape: f32[72,143], index: 3, kind: input, shape index: {}]   ;;  %s10326_s4 = inlined_call_operand.vmem [shape: f32[23,12], index: 4, kind: input, shape index: {}]   ;;  %s10327_s5 = inlined_call_operand.vmem [shape: f32[64,127], index: 5, kind: input, shape index: {}]   ;;  %s10328_s6 = inlined_call_operand.vmem [shape: f32[7,4], index: 6, kind: input, shape index: {}]   ;;  %s10329_s7 = inlined_call_operand.vmem [shape: f32[72,1], index: 7, kind: input, shape index: {}]   ;;  %s10330_s8 = inlined_call_operand.vmem [shape: f32[64,1], index: 8, kind: input, shape index: {}]   ;;  %s10331_s9 = inlined_call_operand.vmem [shape: f32[4,64,120], index: 9, kind: input, shape index: {}]   ;;  %s10332_s10 = inlined_call_operand.vmem [shape: f32[1,120], index: 10, kind: input, shape index: {}]   ;;  %s10333_s11 = inlined_call_operand.vmem [shape: f32[120,84], index: 11, kind: input, shape index: {}]   ;;  %s10334_s12 = inlined_call_operand.vmem [shape: f32[1,84], index: 12, kind: input, shape index: {}]   ;;  %s10335_s13 = inlined_call_operand.vmem [shape: f32[84,10], index: 13, kind: input, shape index: {}]   ;;  %s10336_s14 = inlined_call_operand.vmem [shape: f32[1,10], index: 14, kind: input, shape index: {}]   ;;  %s10337_s15 = inlined_call_operand.hbm [shape: f32[2,10], index: 15, kind: output, shape index: {}]  }
   0x1   :  { %v7038_v0 = vld [vmem:[%s10322_s0 + $0x18] sm:$0xf]  ;;  %v7043_v1 = vld [vmem:[%s10322_s0] sm:$0xff]  ;;  %v7048_v2 = vld [vmem:[%s10322_s0 + $0x8] sm:$0xff] }
   0x2   :  { %102 = vrot.lane.b32.xlu0 %v7038_v0, %s6946_s24  ;;  %96 = vrot.lane.b32.xlu1 %v7043_v1, %s6946_s24  ;;  %v7057_v3 = vld [vmem:[%s10322_s0 + $0x10] sm:$0xff] }
   0x3   :  { %20 = vsyncpa [#allocation3], 0  ;;  %v6518_v4 = vpack.i.bf16 %v7048_v2, %v7057_v3  ;;  %s6947_s27 = smov 126   ;;  %s6948_s28 = smov 125   ;;  %vm162_vm0 = vcmask 1043456   ;;  %vm107_vm1 = vcmask 228352  }
   0x4   :  { %s6949_s29 = smov 124   ;;  %6496 = vmatpush.msk.msra.mxu1 %vm162_vm0, %v7038_v0  ;;  %v53_v7 = vld [vmem:[%s10323_s1 + $0x10] sm:$0xff]  ;;  %v54_v12 = vld [vmem:[%s10323_s1 + $0x18] sm:$0xff]  ;;  %v5796_v18 = vld [vmem:[%s10323_s1 + $0x120] sm:$0xff]  ;;  %vm1026_vm2 = vcmask 1046528   ;;  %vm1098_vm3 = vcmask 121856  }
   0x5   :  { %6519 = vrot.lane.b32.xlu2 %v6518_v4, %s6947_s27  ;;  %v5740_v17 = vld [vmem:[%s10323_s1 + $0x90] sm:$0xff]  ;;  %v5811_v19 = vld [vmem:[%s10323_s1 + $0x198] sm:$0xff]  ;;  %v55_v22 = vld [vmem:[%s10323_s1 + $0x20] sm:$0xff]  ;;  %vm1262_vm4 = vcmask 187392   ;;  %vm1415_vm5 = vcmask 588800   ;;  %vm2337_vm6 = vcmask 1039360  }
   0x6   :  { %6497 = vmatpush.msra.mxu1 %v7057_v3  ;;  %v5741_v25 = vld [vmem:[%s10323_s1 + $0x98] sm:$0xff]  ;;  %v5797_v27 = vld [vmem:[%s10323_s1 + $0x128] sm:$0xff]  ;;  %v5812_v28 = vld [vmem:[%s10323_s1 + $0x1a0] sm:$0xff]  ;;  %vm2446_vm7 = vcmask 56320   ;;  %vm2580_vm8 = vcmask 982016   ;;  %vm2869_vm9 = vcmask 687104  }
   0x7   :  { %v56_v29 = vld [vmem:[%s10323_s1 + $0x28] sm:$0xff]  ;;  %v5742_v30 = vld [vmem:[%s10323_s1 + $0xa0] sm:$0xff]  ;;  %v5798_v31 = vld [vmem:[%s10323_s1 + $0x130] sm:$0xff]  ;;  %vm2896_vm10 = vcmask 73728   ;;  %s6954_s22 = smov [#allocation2]  }
   0x8   :  { %6498 = vmatpush.msra.mxu1 %v7048_v2  ;;  %v5813_v32 = vld [vmem:[%s10323_s1 + $0x1a8] sm:$0xff]  ;;  %v57_v33 = vld [vmem:[%s10323_s1 + $0x30] sm:$0xff]  ;;  %v5799_v35 = vld [vmem:[%s10323_s1 + $0x138] sm:$0xff]  ;;  %s5729_s23 = sshll.u32 %s6954_s22, 4  ;;  %s5730_s23 = int_to_ptr.vmem [resolvable:$true] %s5729_s23 }
   0x9   :  { %v5743_v34 = vld [vmem:[%s10323_s1 + $0xa8] sm:$0xff]  ;;  %v5833_v36 = vld [vmem:[%s10323_s1 + $0x1b0] sm:$0xff]  ;;  %v58_v37 = vld [vmem:[%s10323_s1 + $0x38] sm:$0xff] }
   0xa   :  { %6514 = vrot.lane.b32.xlu0 %v6518_v4, %s6946_s24  ;;  %388 = vrot.lane.b32.xlu1 %v7038_v0, %s6947_s27  ;;  %v5744_v38 = vld [vmem:[%s10323_s1 + $0xb0] sm:$0xff]  ;;  %v5800_v39 = vld [vmem:[%s10323_s1 + $0x140] sm:$0xff] }
   0xb   :  { %6499 = vmatpush.msra.mxu1 %v7043_v1  ;;  %v5834_v40 = vld [vmem:[%s10323_s1 + $0x1b8] sm:$0xff]  ;;  %v59_v41 = vld [vmem:[%s10323_s1 + $0x40] sm:$0xff]  ;;  %v5801_v43 = vld [vmem:[%s10323_s1 + $0x148] sm:$0xff] }
   0xc   :  { %5780 = vmatmul.msk.f32.vlgmr.msra.gmra.mxu1 %vm107_vm1, %v53_v7  ;;  %v5745_v42 = vld [vmem:[%s10323_s1 + $0xb8] sm:$0xff]  ;;  %v5835_v44 = vld [vmem:[%s10323_s1 + $0x1c0] sm:$0xff]  ;;  %v60_v45 = vld [vmem:[%s10323_s1 + $0x48] sm:$0xff] }
   0xd   :  { %382 = vrot.lane.b32.xlu2 %v7043_v1, %s6947_s27  ;;  %v5746_v46 = vld [vmem:[%s10323_s1 + $0xc0] sm:$0xff]  ;;  %v5802_v47 = vld [vmem:[%s10323_s1 + $0x150] sm:$0xff]  ;;  %v5836_v48 = vld [vmem:[%s10323_s1 + $0x1c8] sm:$0xff] }
   0xe   :  { %v61_v49 = vld [vmem:[%s10323_s1 + $0x50] sm:$0xff]  ;;  %v5747_v50 = vld [vmem:[%s10323_s1 + $0xc8] sm:$0xff]  ;;  %v5803_v51 = vld [vmem:[%s10323_s1 + $0x158] sm:$0xff] }
   0xf   :  { %v5837_v52 = vld [vmem:[%s10323_s1 + $0x1d0] sm:$0xff]  ;;  %v62_v53 = vld [vmem:[%s10323_s1 + $0x58] sm:$0xff]  ;;  %v5804_v55 = vld [vmem:[%s10323_s1 + $0x160] sm:$0xff] }
  0x10   :  { %v5748_v54 = vld [vmem:[%s10323_s1 + $0xd0] sm:$0xff]  ;;  %v5838_v56 = vld [vmem:[%s10323_s1 + $0x1d8] sm:$0xff]  ;;  %v63_v57 = vld [vmem:[%s10323_s1 + $0x60] sm:$0xff] }
  0x11   :  { %v5749_v58 = vld [vmem:[%s10323_s1 + $0xd8] sm:$0xff]  ;;  %v5805_v59 = vld [vmem:[%s10323_s1 + $0x168] sm:$0xff]  ;;  %v5839_v60 = vld [vmem:[%s10323_s1 + $0x1e0] sm:$0xff] }
  0x12   :  { %563 = vrot.lane.b32.xlu0 %v7038_v0, %s6948_s28  ;;  %6524 = vrot.lane.b32.xlu1 %v6518_v4, %s6948_s28  ;;  %v64_v61 = vld [vmem:[%s10323_s1 + $0x68] sm:$0xff]  ;;  %v5750_v62 = vld [vmem:[%s10323_s1 + $0xe0] sm:$0xff] }
  0x13   :  { %v5806_v63 = vld [vmem:[%s10323_s1 + $0x170] sm:$0xff]  ;;  %v5808_v7 = vld [vmem:[%s10323_s1 + $0x180] sm:$0xff] }
  0x14   :  { %5781 = vmatmul.msk.f32.gmra.mxu1 %vm107_vm1, %v54_v12  ;;  %v5843_v12 = vld [vmem:[%s10323_s1 + $0x200] sm:$0xff] }
  0x15   :  { %557 = vrot.lane.b32.xlu2 %v7043_v1, %s6948_s28 }
  0x1a   :  { %738 = vrot.lane.b32.xlu0 %v7038_v0, %s6949_s29  ;;  %6529 = vrot.lane.b32.xlu1 %v6518_v4, %s6949_s29  ;;  %v5841_v4 = vld [vmem:[%s10323_s1 + $0x1f0] sm:$0xff] }
  0x1c   :  { %5782 = vmatmul.msk.f32.gmra.mxu1 %vm107_vm1, %v55_v22 }
  0x1d   :  { %732 = vrot.lane.b32.xlu2 %v7043_v1, %s6949_s29 }
  0x24   :  { %5783 = vmatmul.msk.f32.gmra.mxu1 %vm107_vm1, %v56_v29  ;;  %v5847_v29 = vld [vmem:[%s10323_s1 + $0x220] sm:$0xff] }
  0x2c   :  { %5784 = vmatmul.msk.f32.gmra.mxu1 %vm107_vm1, %v57_v33 }
  0x34   :  { %5785 = vmatmul.msk.f32.gmra.mxu1 %vm107_vm1, %v58_v37  ;;  %v5870_v37 = vld [vmem:[%s10323_s1 + $0x240] sm:$0xff] }
  0x3c   :  { %5786 = vmatmul.msk.f32.gmra.mxu1 %vm107_vm1, %v59_v41 }
  0x44   :  { %5787 = vmatmul.msk.f32.gmra.mxu1 %vm107_vm1, %v60_v45 }
  0x4c   :  { %5788 = vmatmul.msk.f32.gmra.mxu1 %vm107_vm1, %v61_v49 }
  0x54   :  { %5789 = vmatmul.msk.f32.gmra.mxu1 %vm107_vm1, %v62_v53 }
  0x5c   :  { %5790 = vmatmul.msk.f32.gmra.mxu1 %vm107_vm1, %v63_v57 }
  0x5f   :  { %v6520_v8 = vpop.permute.xlu2 %6519 }
  0x60   :  { %v6521_v9 = vunpack.i.l.bf16 %v6520_v8  ;;  %v6522_v14 = vunpack.i.h.bf16 %v6520_v8  ;;  %v5842_v8 = vld [vmem:[%s10323_s1 + $0x1f8] sm:$0xff] }
  0x64   :  { %5791 = vmatmul.msk.f32.gmra.mxu1 %vm107_vm1, %v64_v61  ;;  %v5880_v61 = vld [vmem:[%s10323_s1 + $0x290] sm:$0xff] }
  0x67   :  { %v383_v16 = vpop.permute.xlu2 %382 }
  0x6f   :  { %v558_v26 = vpop.permute.xlu2 %557 }
  0x74   :  { %v103_v5 = vpop.permute.xlu0 %102  ;;  %v97_v6 = vpop.permute.xlu1 %96 }
  0x75   :  { %5758 = vmatpush.msk.msra.mxu0 %vm162_vm0, %v103_v5  ;;  %v66_v5 = vld [vmem:[%s10323_s1 + $0x78] sm:$0xff] }
  0x7c   :  { %v6515_v10 = vpop.permute.xlu0 %6514  ;;  %v389_v11 = vpop.permute.xlu1 %388 }
  0x7d   :  { %5814 = vmatpush.msk.msra.mxu2 %vm162_vm0, %v389_v11  ;;  %6500 = vmatpush.msk.msra.mxu3 %vm162_vm0, %v389_v11  ;;  %v6516_v13 = vunpack.i.l.bf16 %v6515_v10  ;;  %v6517_v15 = vunpack.i.h.bf16 %v6515_v10  ;;  %v5753_v10 = vld [vmem:[%s10323_s1 + $0xf8] sm:$0xff]  ;;  %v5809_v11 = vld [vmem:[%s10323_s1 + $0x188] sm:$0xff] }
  0x7f   :  { %178 = vmatpush.msra.mxu0 %v6516_v13  ;;  %462 = vmatpush.msra.mxu2 %v6521_v9  ;;  %v68_v13 = vld [vmem:[%s10323_s1 + $0x88] sm:$0xff] }
  0x80   :  { %6501 = vmatpush.msra.mxu3 %v6521_v9  ;;  %v67_v9 = vld [vmem:[%s10323_s1 + $0x80] sm:$0xff] }
  0x81   :  { %179 = vmatpush.msra.mxu0 %v6517_v15  ;;  %463 = vmatpush.msra.mxu2 %v6522_v14  ;;  %v5810_v15 = vld [vmem:[%s10323_s1 + $0x190] sm:$0xff] }
  0x82   :  { %6502 = vmatpush.msra.mxu3 %v6522_v14  ;;  %v5754_v14 = vld [vmem:[%s10323_s1 + $0x100] sm:$0xff] }
  0x83   :  { %180 = vmatpush.msra.mxu0 %v97_v6  ;;  %464 = vmatpush.msra.mxu2 %v383_v16  ;;  %v5752_v6 = vld [vmem:[%s10323_s1 + $0xf0] sm:$0xff] }
  0x84   :  { %6503 = vmatpush.msra.mxu3 %v383_v16  ;;  %5759 = vmatmul.msk.f32.vlgmr.msra.gmra.mxu0 %vm107_vm1, %v5740_v17  ;;  %v564_v20 = vpop.permute.xlu0 %563  ;;  %v6525_v21 = vpop.permute.xlu1 %6524  ;;  %v5844_v16 = vld [vmem:[%s10323_s1 + $0x208] sm:$0xff] }
  0x85   :  { %5815 = vmatmul.msk.f32.vlgmr.msra.gmra.mxu2 %vm107_vm1, %v5796_v18  ;;  %5830 = vmatmul.msk.f32.vlgmr.msra.gmra.mxu3 %vm107_vm1, %v5811_v19  ;;  %v6526_v23 = vunpack.i.l.bf16 %v6525_v21  ;;  %v6527_v24 = vunpack.i.h.bf16 %v6525_v21  ;;  %v5755_v17 = vld [vmem:[%s10323_s1 + $0x108] sm:$0xff]  ;;  %v5845_v18 = vld [vmem:[%s10323_s1 + $0x210] sm:$0xff] }
  0x86   :  { %5851 = vmatpush.msk.msrb.mxu3 %vm162_vm0, %v564_v20  ;;  %5777 = vmatpush.msk.msrb.mxu0 %vm162_vm0, %v7038_v0  ;;  %v5840_v0 = vld [vmem:[%s10323_s1 + $0x1e8] sm:$0xff] }
  0x88   :  { %637 = vmatpush.msrb.mxu3 %v6526_v23  ;;  %305 = vmatpush.msrb.mxu0 %v7057_v3  ;;  %v5807_v3 = vld [vmem:[%s10323_s1 + $0x178] sm:$0xff] }
  0x8a   :  { %638 = vmatpush.msrb.mxu3 %v6527_v24  ;;  %306 = vmatpush.msrb.mxu0 %v7048_v2  ;;  %v5751_v2 = vld [vmem:[%s10323_s1 + $0xe8] sm:$0xff]  ;;  %v5756_v24 = vld [vmem:[%s10323_s1 + $0x110] sm:$0xff] }
  0x8c   :  { %5760 = vmatmul.msk.f32.gmra.mxu0 %vm107_vm1, %v5741_v25  ;;  %639 = vmatpush.msrb.mxu3 %v558_v26  ;;  %v739_v19 = vpop.permute.xlu0 %738  ;;  %v6530_v20 = vpop.permute.xlu1 %6529  ;;  %v5846_v25 = vld [vmem:[%s10323_s1 + $0x218] sm:$0xff] }
  0x8d   :  { %5816 = vmatmul.msk.f32.gmra.mxu2 %vm107_vm1, %v5797_v27  ;;  %5831 = vmatmul.msk.f32.gmra.mxu3 %vm107_vm1, %v5812_v28  ;;  %v6532_v21 = vunpack.i.h.bf16 %v6530_v20  ;;  %v6531_v22 = vunpack.i.l.bf16 %v6530_v20  ;;  %v733_v26 = vpop.permute.xlu2 %732  ;;  %v5757_v28 = vld [vmem:[%s10323_s1 + $0x118] sm:$0xff]  ;;  %v5886_v20 = vld [vmem:[%s10323_s1 + $0x2c0] sm:$0xff] }
  0x8e   :  { %307 = vmatpush.msrb.mxu0 %v7043_v1  ;;  %v65_v1 = vld [vmem:[%s10323_s1 + $0x70] sm:$0xff] }
  0x8f   :  { %5792 = vmatmul.msk.f32.gmra.mxu1 %vm107_vm1, %v65_v1 }
  0x90   :  { %5888 = vmatpush.msk.msra.mxu0 %vm162_vm0, %v739_v19 }
  0x92   :  { %812 = vmatpush.msra.mxu0 %v6531_v22 }
  0x94   :  { %5761 = vmatmul.msk.f32.gmra.mxu0 %vm107_vm1, %v5742_v30 }
  0x95   :  { %5817 = vmatmul.msk.f32.gmra.mxu2 %vm107_vm1, %v5798_v31  ;;  %5832 = vmatmul.msk.f32.gmra.mxu3 %vm107_vm1, %v5813_v32  ;;  %v51_v31 = vld [vmem:[%s10323_s1] sm:$0xff]  ;;  %v5848_v32 = vld [vmem:[%s10323_s1 + $0x228] sm:$0xff] }
  0x96   :  { %813 = vmatpush.msra.mxu0 %v6532_v21 }
  0x97   :  { %5793 = vmatmul.msk.f32.gmra.mxu1 %vm107_vm1, %v66_v5  ;;  %v7478_v5 = vpop.f32.mrf.mxu1 }
  0x98   :  { %814 = vmatpush.msra.mxu0 %v733_v26  ;;  %v5887_v26 = vld [vmem:[%s10323_s1 + $0x2c8] sm:$0xff] }
  0x9c   :  { %5762 = vmatmul.msk.f32.gmra.mxu0 %vm107_vm1, %v5743_v34  ;;  %v52_v34 = vld [vmem:[%s10323_s1 + $0x8] sm:$0xff] }
  0x9d   :  { %5818 = vmatmul.msk.f32.gmra.mxu2 %vm107_vm1, %v5799_v35  ;;  %5852 = vmatmul.msk.f32.vlgmr.msrb.gmra.mxu3 %vm107_vm1, %v5833_v36  ;;  %v5849_v35 = vld [vmem:[%s10323_s1 + $0x230] sm:$0xff] }
  0x9f   :  { %5794 = vmatmul.msk.f32.gmra.mxu1 %vm107_vm1, %v67_v9 }
  0xa4   :  { %5763 = vmatmul.msk.f32.gmra.mxu0 %vm107_vm1, %v5744_v38  ;;  %v5850_v38 = vld [vmem:[%s10323_s1 + $0x238] sm:$0xff] }
  0xa5   :  { %5819 = vmatmul.msk.f32.gmra.mxu2 %vm107_vm1, %v5800_v39  ;;  %5853 = vmatmul.msk.f32.gmra.mxu3 %vm107_vm1, %v5834_v40  ;;  %v5871_v40 = vld [vmem:[%s10323_s1 + $0x248] sm:$0xff] }
  0xa7   :  { %5795 = vmatmul.msk.f32.gmra.mxu1 %vm107_vm1, %v68_v13 }
  0xac   :  { %5764 = vmatmul.msk.f32.gmra.mxu0 %vm107_vm1, %v5745_v42  ;;  %v5872_v42 = vld [vmem:[%s10323_s1 + $0x250] sm:$0xff] }
  0xad   :  { %5820 = vmatmul.msk.f32.gmra.mxu2 %vm107_vm1, %v5801_v43  ;;  %5854 = vmatmul.msk.f32.gmra.mxu3 %vm107_vm1, %v5835_v44  ;;  %v5873_v44 = vld [vmem:[%s10323_s1 + $0x258] sm:$0xff] }
  0xb4   :  { %5765 = vmatmul.msk.f32.gmra.mxu0 %vm107_vm1, %v5746_v46  ;;  %v5874_v46 = vld [vmem:[%s10323_s1 + $0x260] sm:$0xff] }
  0xb5   :  { %5821 = vmatmul.msk.f32.gmra.mxu2 %vm107_vm1, %v5802_v47  ;;  %5855 = vmatmul.msk.f32.gmra.mxu3 %vm107_vm1, %v5836_v48  ;;  %v5875_v48 = vld [vmem:[%s10323_s1 + $0x268] sm:$0xff] }
  0xbc   :  { %5766 = vmatmul.msk.f32.gmra.mxu0 %vm107_vm1, %v5747_v50  ;;  %v5876_v50 = vld [vmem:[%s10323_s1 + $0x270] sm:$0xff] }
  0xbd   :  { %5822 = vmatmul.msk.f32.gmra.mxu2 %vm107_vm1, %v5803_v51  ;;  %5856 = vmatmul.msk.f32.gmra.mxu3 %vm107_vm1, %v5837_v52  ;;  %v5877_v52 = vld [vmem:[%s10323_s1 + $0x278] sm:$0xff] }
  0xc4   :  { %5767 = vmatmul.msk.f32.gmra.mxu0 %vm107_vm1, %v5748_v54 }
  0xc5   :  { %5823 = vmatmul.msk.f32.gmra.mxu2 %vm107_vm1, %v5804_v55  ;;  %5857 = vmatmul.msk.f32.gmra.mxu3 %vm107_vm1, %v5838_v56  ;;  %v5878_v55 = vld [vmem:[%s10323_s1 + $0x280] sm:$0xff] }
  0xcc   :  { %5768 = vmatmul.msk.f32.gmra.mxu0 %vm107_vm1, %v5749_v58  ;;  %v5879_v58 = vld [vmem:[%s10323_s1 + $0x288] sm:$0xff] }
  0xcd   :  { %5824 = vmatmul.msk.f32.gmra.mxu2 %vm107_vm1, %v5805_v59  ;;  %5858 = vmatmul.msk.f32.gmra.mxu3 %vm107_vm1, %v5839_v60 }
  0xd4   :  { %5769 = vmatmul.msk.f32.gmra.mxu0 %vm107_vm1, %v5750_v62 }
  0xd5   :  { %5825 = vmatmul.msk.f32.gmra.mxu2 %vm107_vm1, %v5806_v63  ;;  %5859 = vmatmul.msk.f32.gmra.mxu3 %vm107_vm1, %v5840_v0  ;;  %v5881_v63 = vld [vmem:[%s10323_s1 + $0x298] sm:$0xff] }
  0xdc   :  { %5770 = vmatmul.msk.f32.gmra.mxu0 %vm107_vm1, %v5751_v2 }
  0xdd   :  { %5826 = vmatmul.msk.f32.gmra.mxu2 %vm107_vm1, %v5807_v3  ;;  %5860 = vmatmul.msk.f32.gmra.mxu3 %vm107_vm1, %v5841_v4  ;;  %v5882_v3 = vld [vmem:[%s10323_s1 + $0x2a0] sm:$0xff] }
  0xe4   :  { %5771 = vmatmul.msk.f32.gmra.mxu0 %vm107_vm1, %v5752_v6 }
  0xe5   :  { %5827 = vmatmul.msk.f32.gmra.mxu2 %vm107_vm1, %v5808_v7  ;;  %5861 = vmatmul.msk.f32.gmra.mxu3 %vm107_vm1, %v5842_v8  ;;  %v5883_v8 = vld [vmem:[%s10323_s1 + $0x2a8] sm:$0xff] }
  0xec   :  { %5772 = vmatmul.msk.f32.gmra.mxu0 %vm107_vm1, %v5753_v10 }
  0xed   :  { %5828 = vmatmul.msk.f32.gmra.mxu2 %vm107_vm1, %v5809_v11  ;;  %5862 = vmatmul.msk.f32.gmra.mxu3 %vm107_vm1, %v5843_v12  ;;  %v5884_v11 = vld [vmem:[%s10323_s1 + $0x2b0] sm:$0xff]  ;;  %v7495_v12 = vpop.f32.mrf.mxu1 }
  0xee   :  { %10355 = vst [vmem:[#allocation13_spill] sm:$0xff] %v7495_v12 }
  0xf4   :  { %5773 = vmatmul.msk.f32.gmra.mxu0 %vm107_vm1, %v5754_v14 }
  0xf5   :  { %5829 = vmatmul.msk.f32.gmra.mxu2 %vm107_vm1, %v5810_v15  ;;  %5863 = vmatmul.msk.f32.gmra.mxu3 %vm107_vm1, %v5844_v16  ;;  %v5885_v16 = vld [vmem:[%s10323_s1 + $0x2b8] sm:$0xff] }
  0xfc   :  { %5774 = vmatmul.msk.f32.gmra.mxu0 %vm107_vm1, %v5755_v17  ;;  %v7507_v17 = vpop.f32.mrf.mxu1 }
  0xfd   :  { %5864 = vmatmul.msk.f32.gmra.mxu3 %vm107_vm1, %v5845_v18  ;;  %10357 = vst [vmem:[#allocation15_spill] sm:$0xff] %v7507_v17 }
 0x101   :  { %v7344_v23 = vpop.f32.mrf.mxu0 }
 0x102   :  { %10347 = vst [vmem:[#allocation5_spill] sm:$0xff] %v7344_v23 }
 0x104   :  { %5775 = vmatmul.msk.f32.gmra.mxu0 %vm107_vm1, %v5756_v24  ;;  %v324_v22 = vpop.f32.mrf.mxu1 }
 0x105   :  { %5865 = vmatmul.msk.f32.gmra.mxu3 %vm107_vm1, %v5846_v25 }
 0x108   :  { %v7436_v53 = vpop.f32.mrf.mxu3  ;;  %v7468_v1 = vpop.f32.mrf.mxu2 }
 0x109   :  { %v7354_v27 = vpop.f32.mrf.mxu0  ;;  %10353 = vst [vmem:[#allocation11_spill] sm:$0xff] %v7468_v1 }
 0x10c   :  { %5776 = vmatmul.msk.f32.gmra.mxu0 %vm107_vm1, %v5757_v28 }
 0x10d   :  { %5866 = vmatmul.msk.f32.gmra.mxu3 %vm107_vm1, %v5847_v29  ;;  %v327_v29 = vpop.f32.mrf.mxu1 }
 0x110   :  { %v7444_v56 = vpop.f32.mrf.mxu3  ;;  %v7480_v6 = vpop.f32.mrf.mxu2 }
 0x111   :  { %v7364_v30 = vpop.f32.mrf.mxu0 }
 0x114   :  { %5778 = vmatmul.msk.f32.vlgmr.msrb.gmra.mxu0 %vm107_vm1, %v51_v31 }
 0x115   :  { %5867 = vmatmul.msk.f32.gmra.mxu3 %vm107_vm1, %v5848_v32 }
 0x118   :  { %v7452_v59 = vpop.f32.mrf.mxu3  ;;  %v7497_v13 = vpop.f32.mrf.mxu2 }
 0x119   :  { %v7374_v33 = vpop.f32.mrf.mxu0  ;;  %10351 = vst [vmem:[#allocation9_spill] sm:$0xff] %v7452_v59 }
 0x11a   :  { %10348 = vst [vmem:[#allocation6_spill] sm:$0xff] %v7374_v33 }
 0x11c   :  { %5779 = vmatmul.msk.f32.gmra.mxu0 %vm107_vm1, %v52_v34 }
 0x11d   :  { %5868 = vmatmul.msk.f32.gmra.mxu3 %vm107_vm1, %v5849_v35 }
 0x120   :  { %v7465_v0 = vpop.f32.mrf.mxu3  ;;  %v7510_v18 = vpop.f32.mrf.mxu2 }
 0x121   :  { %v7384_v36 = vpop.f32.mrf.mxu0  ;;  %10352 = vst [vmem:[#allocation10_spill] sm:$0xff] %v7465_v0 }
 0x122   :  { %10349 = vst [vmem:[#allocation7_spill] sm:$0xff] %v7384_v36 }
 0x123   :  { %10358 = vst [vmem:[#allocation16_spill] sm:$0xff] %v7510_v18 }
 0x124   :  { %5889 = vmatmul.msk.f32.vlgmr.msra.gmra.mxu0 %vm107_vm1, %v5870_v37  ;;  %v7532_v37 = vpop.f32.mrf.mxu1 }
 0x125   :  { %5869 = vmatmul.msk.f32.gmra.mxu3 %vm107_vm1, %v5850_v38 }
 0x128   :  { %v7476_v4 = vpop.f32.mrf.mxu3  ;;  %v7520_v24 = vpop.f32.mrf.mxu2 }
 0x129   :  { %v7394_v39 = vpop.f32.mrf.mxu0  ;;  %10361 = vst [vmem:[#allocation19_spill] sm:$0xff] %v7520_v24 }
 0x12c   :  { %5890 = vmatmul.msk.f32.gmra.mxu0 %vm107_vm1, %v5871_v40 }
 0x130   :  { %v7488_v9 = vpop.f32.mrf.mxu3  ;;  %v481_v31 = vpop.f32.mrf.mxu2 }
 0x131   :  { %v7400_v41 = vpop.f32.mrf.mxu0 }
 0x134   :  { %5891 = vmatmul.msk.f32.gmra.mxu0 %vm107_vm1, %v5872_v42 }
 0x138   :  { %v7500_v14 = vpop.f32.mrf.mxu3  ;;  %v484_v38 = vpop.f32.mrf.mxu2 }
 0x139   :  { %v7406_v43 = vpop.f32.mrf.mxu0  ;;  %10356 = vst [vmem:[#allocation14_spill] sm:$0xff] %v7500_v14 }
 0x13c   :  { %5892 = vmatmul.msk.f32.gmra.mxu0 %vm107_vm1, %v5873_v44  ;;  %v7538_v44 = vpop.f32.mrf.mxu1 }
 0x140   :  { %v7517_v21 = vpop.f32.mrf.mxu3 }
 0x141   :  { %v7412_v45 = vpop.f32.mrf.mxu0  ;;  %10360 = vst [vmem:[#allocation18_spill] sm:$0xff] %v7517_v21 }
 0x144   :  { %5893 = vmatmul.msk.f32.gmra.mxu0 %vm107_vm1, %v5874_v46  ;;  %v7540_v46 = vpop.f32.mrf.mxu2 }
 0x148   :  { %v656_v28 = vpop.f32.mrf.mxu3 }
 0x149   :  { %v7418_v47 = vpop.f32.mrf.mxu0 }
 0x14a   :  { %10350 = vst [vmem:[#allocation8_spill] sm:$0xff] %v7418_v47 }
 0x14c   :  { %5894 = vmatmul.msk.f32.gmra.mxu0 %vm107_vm1, %v5875_v48 }
 0x150   :  { %v659_v34 = vpop.f32.mrf.mxu3 }
 0x151   :  { %v7424_v49 = vpop.f32.mrf.mxu0 }
 0x154   :  { %5895 = vmatmul.msk.f32.gmra.mxu0 %vm107_vm1, %v5876_v50 }
 0x158   :  { %v7534_v40 = vpop.f32.mrf.mxu3 }
 0x159   :  { %v7430_v51 = vpop.f32.mrf.mxu0 }
 0x15c   :  { %5896 = vmatmul.msk.f32.gmra.mxu0 %vm107_vm1, %v5877_v52  ;;  %v7544_v52 = vpop.f32.mrf.mxu1 }
 0x15d   :  { %10364 = vst [vmem:[#allocation22_spill] sm:$0xff] %v7544_v52  ;;  %v325_v52 = vadd.f32 %v324_v22, %v7394_v39 }
 0x160   :  { %v7542_v50 = vpop.f32.mrf.mxu3 }
 0x161   :  { %v7438_v54 = vpop.f32.mrf.mxu0 }
 0x164   :  { %5897 = vmatmul.msk.f32.gmra.mxu0 %vm107_vm1, %v5878_v55  ;;  %v7546_v55 = vpop.f32.mrf.mxu2 }
 0x169   :  { %v7446_v57 = vpop.f32.mrf.mxu0 }
 0x16c   :  { %5898 = vmatmul.msk.f32.gmra.mxu0 %vm107_vm1, %v5879_v58 }
 0x171   :  { %v7454_v60 = vpop.f32.mrf.mxu0 }
 0x174   :  { %5899 = vmatmul.msk.f32.gmra.mxu0 %vm107_vm1, %v5880_v61  ;;  %v7548_v61 = vpop.f32.mrf.mxu3 }
 0x175   :  { %10365 = vst [vmem:[#allocation23_spill] sm:$0xff] %v7548_v61 }
 0x179   :  { %v7460_v62 = vpop.f32.mrf.mxu0 }
 0x17c   :  { %5900 = vmatmul.msk.f32.gmra.mxu0 %vm107_vm1, %v5881_v63  ;;  %v7550_v63 = vpop.f32.mrf.mxu1 }
 0x181   :  { %v7470_v2 = vpop.f32.mrf.mxu0 }
 0x184   :  { %5901 = vmatmul.msk.f32.gmra.mxu0 %vm107_vm1, %v5882_v3  ;;  %v7552_v3 = vpop.f32.mrf.mxu2 }
 0x185   :  { %10366 = vst [vmem:[#allocation24_spill] sm:$0xff] %v7552_v3  ;;  %v328_v3 = vadd.f32 %v327_v29, %v7400_v41 }
 0x187   :  { %v526_v47 = vadd.f32 %v484_v38, %v328_v3 }
 0x189   :  { %v7482_v7 = vpop.f32.mrf.mxu0 }
 0x18c   :  { %5902 = vmatmul.msk.f32.gmra.mxu0 %vm107_vm1, %v5883_v8 }
 0x191   :  { %v7490_v10 = vpop.f32.mrf.mxu0 }
 0x192   :  { %10354 = vst [vmem:[#allocation12_spill] sm:$0xff] %v7490_v10 }
 0x194   :  { %5903 = vmatmul.msk.f32.gmra.mxu0 %vm107_vm1, %v5884_v11  ;;  %v7556_v11 = vpop.f32.mrf.mxu3 }
 0x195   :  { %10367 = vst [vmem:[#allocation25_spill] sm:$0xff] %v7556_v11 }
 0x199   :  { %v7502_v15 = vpop.f32.mrf.mxu0 }
 0x19c   :  { %5904 = vmatmul.msk.f32.gmra.mxu0 %vm107_vm1, %v5885_v16 }
 0x1a1   :  { %v7512_v19 = vpop.f32.mrf.mxu0 }
 0x1a2   :  { %10359 = vst [vmem:[#allocation17_spill] sm:$0xff] %v7512_v19  ;;  %v674_v19 = vpop.f32.mrf.mxu3 }
 0x1a4   :  { %5905 = vmatmul.msk.f32.gmra.mxu0 %vm107_vm1, %v5886_v20  ;;  %v342_v20 = vpop.f32.mrf.mxu1 }
 0x1a5   :  { %v343_v18 = vadd.f32 %v342_v20, %v7430_v51  ;;  %v10372_v20 = vld [vmem:[#allocation22_spill] sm:$0xff] }
 0x1a9   :  { %v7522_v25 = vpop.f32.mrf.mxu0 }
 0x1aa   :  { %v677_v23 = vpop.f32.mrf.mxu3 }
 0x1ac   :  { %5906 = vmatmul.msk.f32.gmra.mxu0 %vm107_vm1, %v5887_v26  ;;  %v7560_v26 = vpop.f32.mrf.mxu2  ;;  %v345_v1 = vpop.f32.mrf.mxu1 }
 0x1ad   :  { %10368 = vst [vmem:[#allocation26_spill] sm:$0xff] %v7560_v26  ;;  %v346_v24 = vadd.f32 %v345_v1, %v7438_v54  ;;  %v525_v54 = vadd.f32 %v481_v31, %v325_v52  ;;  %v701_v1 = vadd.f32 %v659_v34, %v526_v47 }
 0x1b1   :  { %v7528_v32 = vpop.f32.mrf.mxu0 }
 0x1b2   :  { %v680_v12 = vpop.f32.mrf.mxu3 }
 0x1b9   :  { %v7530_v35 = vpop.f32.mrf.mxu0 }
 0x1ba   :  { %10362 = vst [vmem:[#allocation20_spill] sm:$0xff] %v7530_v35  ;;  %v499_v35 = vpop.f32.mrf.mxu2 }
 0x1bb   :  { %v531_v33 = vadd.f32 %v499_v35, %v343_v18 }
 0x1bd   :  { %v706_v61 = vadd.f32 %v674_v19, %v531_v33  ;;  %v683_v33 = vpop.f32.mrf.mxu3 }
 0x1c1   :  { %v7536_v42 = vpop.f32.mrf.mxu0 }
 0x1c2   :  { %10363 = vst [vmem:[#allocation21_spill] sm:$0xff] %v7536_v42  ;;  %v348_v42 = vpop.f32.mrf.mxu1  ;;  %v502_v14 = vpop.f32.mrf.mxu2 }
 0x1c3   :  { %v532_v17 = vadd.f32 %v502_v14, %v346_v24  ;;  %v313_v14 = vadd.f32 %v7502_v15, %v7354_v27  ;;  %v349_v47 = vadd.f32 %v348_v42, %v7446_v57 }
 0x1c5   :  { %v707_v59 = vadd.f32 %v677_v23, %v532_v17  ;;  %v700_v23 = vadd.f32 %v656_v28, %v525_v54  ;;  %v521_v22 = vadd.f32 %v7480_v6, %v313_v14  ;;  %v686_v57 = vpop.f32.mrf.mxu3  ;;  %v10373_v54 = vld [vmem:[#allocation26_spill] sm:$0xff]  ;;  %v10375_v14 = vld [vmem:[#allocation25_spill] sm:$0xff] }
 0x1c9   :  { %v831_v48 = vpop.f32.mrf.mxu0 }
 0x1ca   :  { %v351_v36 = vpop.f32.mrf.mxu1  ;;  %v505_v11 = vpop.f32.mrf.mxu2  ;;  %v7583_v39 = vadd.f32 %v831_v48, %v700_v23 }
 0x1cb   :  { %v533_v24 = vadd.f32 %v505_v11, %v349_v47 }
 0x1d1   :  { %v834_v58 = vpop.f32.mrf.mxu0 }
 0x1d2   :  { %v7579_v41 = vadd.f32 %v834_v58, %v701_v1  ;;  %v508_v18 = vpop.f32.mrf.mxu2  ;;  %v354_v19 = vpop.f32.mrf.mxu1 }
 0x1d3   :  { %v355_v42 = vadd.f32 %v354_v19, %v7460_v62  ;;  %v340_v62 = vadd.f32 %v7550_v63, %v7424_v49  ;;  %v10377_v49 = vld [vmem:[#allocation23_spill] sm:$0xff] }
 0x1d4   :  { %v6558_v27 = vpack.i.bf16 %v7583_v39, %v7579_v41 }
 0x1d5   :  { %v535_v52 = vadd.f32 %v7436_v53, %v355_v42  ;;  %v530_v53 = vadd.f32 %v10373_v54, %v340_v62  ;;  %v10390_v42 = vld [vmem:[#allocation12_spill] sm:$0xff] }
 0x1d7   :  { %v710_v58 = vadd.f32 %v686_v57, %v535_v52  ;;  %v10384_v57 = vld [vmem:[#allocation19_spill] sm:$0xff] }
 0x1d9   :  { %v7554_v8 = vpop.f32.mrf.mxu0 }
 0x1da   :  { %v357_v35 = vpop.f32.mrf.mxu1 }
 0x1e1   :  { %v7558_v16 = vpop.f32.mrf.mxu0 }
 0x1e9   :  { %v7562_v0 = vpop.f32.mrf.mxu0 }
 0x1ea   :  { %10369 = vst [vmem:[#allocation27_spill] sm:$0xff] %v7562_v0 }
 0x1f1   :  { %v7564_v10 = vpop.f32.mrf.mxu0 }
 0x1f2   :  { %10370 = vst [vmem:[#allocation28_spill] sm:$0xff] %v7564_v10 }
 0x1f9   :  { %v849_v21 = vpop.f32.mrf.mxu0 }
 0x1fa   :  { %v7569_v26 = vadd.f32 %v849_v21, %v706_v61  ;;  %v352_v21 = vadd.f32 %v351_v36, %v7454_v60  ;;  %v334_v60 = vadd.f32 %v7538_v44, %v7412_v45  ;;  %v358_v44 = vadd.f32 %v357_v35, %v7470_v2  ;;  %v10387_v35 = vld [vmem:[#allocation14_spill] sm:$0xff] }
 0x201   :  { %v852_v0 = vpop.f32.mrf.mxu0 }
 0x202   :  { %v7571_v10 = vadd.f32 %v852_v0, %v707_v59  ;;  %v316_v59 = vadd.f32 %v7478_v5, %v7364_v30  ;;  %v534_v30 = vadd.f32 %v508_v18, %v352_v21  ;;  %v708_v5 = vadd.f32 %v680_v12, %v533_v24  ;;  %v10378_v18 = vld [vmem:[#allocation28_spill] sm:$0xff]  ;;  %v10379_v21 = vld [vmem:[#allocation7_spill] sm:$0xff] }
 0x203   :  { %v331_v12 = vadd.f32 %v7532_v37, %v7406_v43 }
 0x204   :  { %v6543_v51 = vpack.i.bf16 %v7569_v26, %v7571_v10  ;;  %v522_v17 = vadd.f32 %v7497_v13, %v316_v59  ;;  %v709_v28 = vadd.f32 %v683_v33, %v534_v30  ;;  %v696_v13 = vadd.f32 %v7476_v4, %v521_v22  ;;  %v10374_v33 = vld [vmem:[#allocation24_spill] sm:$0xff]  ;;  %v10380_v22 = vld [vmem:[#allocation15_spill] sm:$0xff] }
 0x205   :  { %v528_v4 = vadd.f32 %v7546_v55, %v334_v60  ;;  %v527_v45 = vadd.f32 %v7540_v46, %v331_v12  ;;  %v689_v46 = vpop.f32.mrf.mxu3  ;;  %v536_v55 = vadd.f32 %v7444_v56, %v358_v44  ;;  %v705_v59 = vadd.f32 %v10375_v14, %v530_v53  ;;  %v10385_v12 = vld [vmem:[#allocation16_spill] sm:$0xff] }
 0x206   :  { %6544 = vrot.lane.b32.xlu2 %v6543_v51, %s6946_s24  ;;  %v697_v15 = vadd.f32 %v7488_v9, %v522_v17  ;;  %v7600_v6 = vadd.f32 %v7522_v25, %v696_v13 }
 0x207   :  { %v703_v25 = vadd.f32 %v7542_v50, %v528_v4  ;;  %v702_v38 = vadd.f32 %v7534_v40, %v527_v45  ;;  %v360_v40 = vpop.f32.mrf.mxu1  ;;  %v711_v61 = vadd.f32 %v689_v46, %v536_v55  ;;  %v7643_v19 = vadd.f32 %v10378_v18, %v705_v59  ;;  %v10391_v46 = vld [vmem:[#allocation20_spill] sm:$0xff]  ;;  %v10392_v55 = vld [vmem:[#allocation11_spill] sm:$0xff] }
 0x208   :  { %v7595_v29 = vadd.f32 %v7528_v32, %v697_v15  ;;  %v361_v2 = vadd.f32 %v360_v40, %v7482_v7  ;;  %v10381_v15 = vld [vmem:[#allocation27_spill] sm:$0xff] }
 0x209   :  { %v855_v0 = vpop.f32.mrf.mxu0  ;;  %v7619_v43 = vadd.f32 %v7558_v16, %v703_v25  ;;  %v7624_v48 = vadd.f32 %v7554_v8, %v702_v38  ;;  %v10371_v16 = vld [vmem:[#allocation8_spill] sm:$0xff]  ;;  %v10388_v25 = vld [vmem:[#allocation21_spill] sm:$0xff] }
 0x20a   :  { %v7602_v9 = vadd.f32 %v855_v0, %v708_v5  ;;  %v6568_v32 = vpack.i.bf16 %v7600_v6, %v7595_v29  ;;  %v337_v51 = vadd.f32 %v10372_v20, %v10371_v16  ;;  %v10376_v0 = vld [vmem:[#allocation9_spill] sm:$0xff]  ;;  %v10382_v5 = vld [vmem:[#allocation6_spill] sm:$0xff] }
 0x20b   :  { %v6553_v50 = vpack.i.bf16 %v7624_v48, %v7619_v43  ;;  %v537_v17 = vadd.f32 %v10376_v0, %v361_v2 }
 0x20c   :  { %v529_v23 = vadd.f32 %v10374_v33, %v337_v51 }
 0x20d   :  { %v692_v56 = vpop.f32.mrf.mxu3 }
 0x20e   :  { %6559 = vrot.lane.b32.xlu2 %v6558_v27, %s6946_s24  ;;  %v704_v63 = vadd.f32 %v10377_v49, %v529_v23  ;;  %v712_v7 = vadd.f32 %v692_v56, %v537_v17  ;;  %v322_v27 = vadd.f32 %v10380_v22, %v10379_v21 }
 0x210   :  { %v7648_v24 = vadd.f32 %v10381_v15, %v704_v63 }
 0x211   :  { %v858_v36 = vpop.f32.mrf.mxu0 }
 0x212   :  { %v7604_v31 = vadd.f32 %v858_v36, %v709_v28  ;;  %v10383_v28 = vld [vmem:[#allocation13_spill] sm:$0xff]  ;;  %v524_v36 = vadd.f32 %v10384_v57, %v322_v27  ;;  %v6548_v60 = vpack.i.bf16 %v7648_v24, %v7643_v19 }
 0x213   :  { %v319_v13 = vadd.f32 %v10383_v28, %v10382_v5 }
 0x214   :  { %v6538_v34 = vpack.i.bf16 %v7602_v9, %v7604_v31 }
 0x215   :  { %v523_v4 = vadd.f32 %v10385_v12, %v319_v13 }
 0x216   :  { %6539 = vrot.lane.b32.xlu1 %v6538_v34, %s6946_s24  ;;  %6569 = vrot.lane.b32.xlu2 %v6568_v32, %s6946_s24  ;;  %v10386_v32 = vld [vmem:[#allocation18_spill] sm:$0xff] }
 0x217   :  { %v699_v34 = vadd.f32 %v10386_v32, %v524_v36  ;;  %v698_v45 = vadd.f32 %v10387_v35, %v523_v4 }
 0x219   :  { %v861_v37 = vpop.f32.mrf.mxu0  ;;  %v7661_v38 = vadd.f32 %v10388_v25, %v699_v34 }
 0x21a   :  { %v885_v8 = vadd.f32 %v861_v37, %v710_v58  ;;  %v10389_v37 = vld [vmem:[#allocation5_spill] sm:$0xff]  ;;  %v10393_v58 = vld [vmem:[#allocation10_spill] sm:$0xff] }
 0x21b   :  { %v310_v44 = vadd.f32 %v10390_v42, %v10389_v37 }
 0x21d   :  { %v520_v40 = vadd.f32 %v10392_v55, %v310_v44 }
 0x21e   :  { %6554 = vrot.lane.b32.xlu1 %v6553_v50, %s6946_s24  ;;  %v7666_v50 = vadd.f32 %v10391_v46, %v698_v45 }
 0x220   :  { %v6563_v52 = vpack.i.bf16 %v7666_v50, %v7661_v38 }
 0x221   :  { %v864_v3 = vpop.f32.mrf.mxu0 }
 0x222   :  { %v886_v11 = vadd.f32 %v864_v3, %v711_v61  ;;  %v695_v61 = vadd.f32 %v10393_v58, %v520_v40  ;;  %v10394_v3 = vld [vmem:[#allocation17_spill] sm:$0xff] }
 0x223   :  { %v889_v58 = vld [vmem:[%s10325_s3 + $0x8] sm:$0xff] }
 0x224   :  { %v6533_v1 = vpack.i.bf16 %v886_v11, %v885_v8  ;;  %v7674_v62 = vadd.f32 %v10394_v3, %v695_v61 }
 0x226   :  { %6534 = vrot.lane.b32.xlu0 %v6533_v1, %s6946_s24 }
 0x229   :  { %v867_v47 = vpop.f32.mrf.mxu0 }
 0x22a   :  { %v887_v30 = vadd.f32 %v867_v47, %v712_v7 }
 0x22c   :  { %970 = vrot.lane.b32.xlu1 %v887_v30, %s6946_s24 }
 0x22e   :  { %6549 = vrot.lane.b32.xlu0 %v6548_v60, %s6946_s24 }
 0x236   :  { %6564 = vrot.lane.b32.xlu0 %v6563_v52, %s6946_s24 }
 0x23e   :  { %936 = vrot.lane.b32.xlu0 %v7674_v62, %s6946_s24 }
 0x260   :  { %v6545_v16 = vpop.permute.xlu2 %6544 }
 0x261   :  { %v6547_v54 = vunpack.i.h.bf16 %v6545_v16  ;;  %v6546_v53 = vunpack.i.l.bf16 %v6545_v16 }
 0x263   :  { %v1002_v0 = vmax.f32 %v7571_v10, %v6546_v53  ;;  %v1001_v17 = vmax.f32 %v7569_v26, %v6547_v54 }
 0x265   :  { %v1050_v27 = vrot.slane %v1002_v0, 1  ;;  %v1048_v15 = vrot.slane %v1001_v17, 1 }
 0x268   :  { %v6560_v5 = vpop.permute.xlu2 %6559 }
 0x269   :  { %v6562_v12 = vunpack.i.h.bf16 %v6560_v5  ;;  %v6561_v37 = vunpack.i.l.bf16 %v6560_v5 }
 0x26b   :  { %v995_v16 = vmax.f32 %v7583_v39, %v6562_v12  ;;  %v895_v12 = vld [vmem:[%s10325_s3 + $0x38] sm:$0xff] }
 0x270   :  { %v6570_v53 = vpop.permute.xlu2 %6569 }
 0x271   :  { %v6571_v39 = vunpack.i.l.bf16 %v6570_v53 }
 0x288   :  { %v6540_v2 = vpop.permute.xlu1 %6539 }
 0x289   :  { %v6542_v20 = vunpack.i.h.bf16 %v6540_v2  ;;  %v6541_v51 = vunpack.i.l.bf16 %v6540_v2  ;;  %v996_v2 = vmax.f32 %v7579_v41, %v6561_v37  ;;  %v1036_v41 = vrot.slane %v995_v16, 1  ;;  %v894_v37 = vld [vmem:[%s10325_s3 + $0x30] sm:$0xff] }
 0x28b   :  { %v1004_v33 = vmax.f32 %v7604_v31, %v6541_v51  ;;  %v1003_v23 = vmax.f32 %v7602_v9, %v6542_v20 }
 0x28d   :  { %v1054_v7 = vrot.slane %v1004_v33, 1  ;;  %v1052_v18 = vrot.slane %v1003_v23, 1 }
 0x28f   :  { %v1055_v26 = vsel %vm1026_vm2, %v1052_v18, %v1054_v7  ;;  %v1053_v32 = vsel %vm1026_vm2, %v1050_v27, %v1052_v18 }
 0x290   :  { %v6555_v1 = vpop.permute.xlu1 %6554  ;;  %v1093_v42 = vmax.f32 %v1003_v23, %v1055_v26 }
 0x291   :  { %v6556_v13 = vunpack.i.l.bf16 %v6555_v1 }
 0x293   :  { %v998_v46 = vmax.f32 %v7619_v43, %v6556_v13 }
 0x295   :  { %v1042_v43 = vrot.slane %v998_v46, 1 }
 0x298   :  { %v6535_v56 = vpop.permute.xlu0 %6534 }
 0x299   :  { %v6537_v14 = vunpack.i.h.bf16 %v6535_v56  ;;  %v6536_v59 = vunpack.i.l.bf16 %v6535_v56 }
 0x29b   :  { %v1006_v49 = vmax.f32 %v886_v11, %v6537_v14  ;;  %v1005_v63 = vmax.f32 %v885_v8, %v6536_v59  ;;  %v6557_v8 = vunpack.i.h.bf16 %v6555_v1  ;;  %v1038_v14 = vrot.slane %v996_v2, 1 }
 0x29c   :  { %v6572_v59 = vunpack.i.h.bf16 %v6570_v53  ;;  %v910_v53 = vld [vmem:[%s10329_s7 + $0x8] sm:$0xff] }
 0x29d   :  { %v1056_v47 = vrot.slane %v1005_v63, 1  ;;  %v1058_v21 = vrot.slane %v1006_v49, 1  ;;  %v997_v40 = vmax.f32 %v7624_v48, %v6557_v8 }
 0x29e   :  { %v971_v22 = vpop.permute.xlu1 %970 }
 0x29f   :  { %v1007_v31 = vmax.f32 %v887_v30, %v971_v22  ;;  %v1059_v9 = vsel %vm1026_vm2, %v1056_v47, %v1058_v21  ;;  %v1057_v28 = vsel %vm1026_vm2, %v1054_v7, %v1056_v47  ;;  %v1051_v30 = vsel %vm1026_vm2, %v1048_v15, %v1050_v27 }
 0x2a0   :  { %v6550_v10 = vpop.permute.xlu0 %6549  ;;  %v1095_v57 = vmax.f32 %v1005_v63, %v1059_v9  ;;  %v1094_v4 = vmax.f32 %v1004_v33, %v1057_v28  ;;  %v1091_v3 = vmax.f32 %v1001_v17, %v1051_v30  ;;  %v1040_v54 = vrot.slane %v997_v40, 1  ;;  %v897_v30 = vld [vmem:[%s10325_s3 + $0x48] sm:$0xff] }
 0x2a1   :  { %v1060_v11 = vrot.slane %v1007_v31, 1  ;;  %v6552_v36 = vunpack.i.h.bf16 %v6550_v10  ;;  %v6551_v60 = vunpack.i.l.bf16 %v6550_v10  ;;  %v992_v27 = vmax.f32 %v7595_v29, %v6571_v39 }
 0x2a2   :  { %1129 = vmatpush.msrb.mxu1 %v1095_v57  ;;  %v1041_v7 = vsel %vm1026_vm2, %v1038_v14, %v1040_v54  ;;  %v893_v57 = vld [vmem:[%s10325_s3 + $0x28] sm:$0xff] }
 0x2a3   :  { %v1097_v34 = vmax.f32 %v1007_v31, %v1060_v11  ;;  %v1061_v35 = vsel %vm1026_vm2, %v1058_v21, %v1060_v11  ;;  %v1000_v45 = vmax.f32 %v7643_v19, %v6551_v60  ;;  %v999_v25 = vmax.f32 %v7648_v24, %v6552_v36 }
 0x2a4   :  { %1130 = vmatpush.msrb.mxu1 %v1094_v4  ;;  %v1096_v44 = vmax.f32 %v1006_v49, %v1061_v35  ;;  %v1092_v19 = vmax.f32 %v1002_v0, %v1053_v32  ;;  %v1043_v0 = vsel %vm1026_vm2, %v1040_v54, %v1042_v43  ;;  %v891_v49 = vld [vmem:[%s10325_s3 + $0x18] sm:$0xff]  ;;  %v1039_v21 = vsel %vm1026_vm2, %v1036_v41, %v1038_v14  ;;  %v888_v32 = vld [vmem:[%s10325_s3] sm:$0xff] }
 0x2a5   :  { %5907 = vmatpush.msk.msrb.mxu2 %vm1026_vm2, %v1097_v34  ;;  %v1046_v52 = vrot.slane %v1000_v45, 1  ;;  %v1044_v55 = vrot.slane %v999_v25, 1  ;;  %v1087_v47 = vmax.f32 %v997_v40, %v1043_v0  ;;  %v1085_v9 = vmax.f32 %v995_v16, %v1039_v21  ;;  %v890_v34 = vld [vmem:[%s10325_s3 + $0x10] sm:$0xff]  ;;  %v899_v35 = vld [vmem:[%s10325_s3 + $0x58] sm:$0xff]  ;;  %v905_v40 = vld [vmem:[%s10325_s3 + $0x88] sm:$0xff] }
 0x2a6   :  { %1131 = vmatpush.msrb.mxu1 %v1093_v42  ;;  %v1030_v13 = vrot.slane %v992_v27, 1  ;;  %v903_v42 = vld [vmem:[%s10325_s3 + $0x78] sm:$0xff] }
 0x2a7   :  { %1188 = vmatpush.msrb.mxu2 %v1096_v44  ;;  %v1049_v24 = vsel %vm1026_vm2, %v1046_v52, %v1048_v15  ;;  %v1047_v51 = vsel %vm1026_vm2, %v1044_v55, %v1046_v52  ;;  %v1045_v56 = vsel %vm1026_vm2, %v1042_v43, %v1044_v55  ;;  %v1086_v15 = vmax.f32 %v996_v2, %v1041_v7  ;;  %v896_v44 = vld [vmem:[%s10325_s3 + $0x40] sm:$0xff]  ;;  %v914_v2 = vld [vmem:[%s10329_s7 + $0x28] sm:$0xff]  ;;  %v912_v16 = vld [vmem:[%s10329_s7 + $0x18] sm:$0xff] }
 0x2a8   :  { %v6565_v61 = vpop.permute.xlu0 %6564  ;;  %1132 = vmatpush.msrb.mxu1 %v1092_v19  ;;  %5908 = vmatmul.msk.f32.vlgmr.msrb.gmra.mxu2 %vm1098_vm3, %v889_v58  ;;  %v1090_v1 = vmax.f32 %v1000_v45, %v1049_v24  ;;  %v1089_v23 = vmax.f32 %v999_v25, %v1047_v51  ;;  %v1088_v63 = vmax.f32 %v998_v46, %v1045_v56  ;;  %v892_v45 = vld [vmem:[%s10325_s3 + $0x20] sm:$0xff]  ;;  %v901_v25 = vld [vmem:[%s10325_s3 + $0x68] sm:$0xff]  ;;  %v908_v46 = vld [vmem:[%s10326_s4 + $0x10] sm:$0x7f]  ;;  %v10338_v55 = vmov 0  }
 0x2a9   :  { %v6567_v48 = vunpack.i.h.bf16 %v6565_v61  ;;  %v6566_v20 = vunpack.i.l.bf16 %v6565_v61  ;;  %v917_v52 = vld [vmem:[%s10329_s7 + $0x40] sm:$0xff]  ;;  %5917 = vmatpush.msk.msra.mxu3 %vm1026_vm2, %v908_v46  ;;  %6573 = vset.pattern.permute.xlu1 %v10338_v55  ;;  %v898_v58 = vld [vmem:[%s10325_s3 + $0x50] sm:$0xff] }
 0x2aa   :  { %1133 = vmatpush.msrb.mxu1 %v1091_v3  ;;  %1259 = vperm.xlu1 %6573, %v917_v52   ;;  %v900_v19 = vld [vmem:[%s10325_s3 + $0x60] sm:$0xff]  ;;  %v902_v24 = vld [vmem:[%s10325_s3 + $0x70] sm:$0xff]  ;;  %v907_v3 = vld [vmem:[%s10326_s4 + $0x8] sm:$0xff] }
 0x2ab   :  { %v994_v33 = vmax.f32 %v7661_v38, %v6566_v20  ;;  %v993_v17 = vmax.f32 %v7666_v50, %v6567_v48  ;;  %v991_v50 = vmax.f32 %v7600_v6, %v6572_v59  ;;  %6575 = vset.pattern.permute.xlu0 %v10338_v55  ;;  %6574 = vset.pattern.permute.xlu2 %v10338_v55  ;;  %v904_v61 = vld [vmem:[%s10325_s3 + $0x80] sm:$0xff]  ;;  %v915_v51 = vld [vmem:[%s10329_s7 + $0x30] sm:$0xff] }
 0x2ac   :  { %1134 = vmatpush.msrb.mxu1 %v1090_v1  ;;  %1307 = vmatpush.msra.mxu3 %v907_v3  ;;  %v906_v43 = vld [vmem:[%s10326_s4] sm:$0xff] }
 0x2ad   :  { %v1034_v18 = vrot.slane %v994_v33, 1  ;;  %v1032_v22 = vrot.slane %v993_v17, 1  ;;  %v1028_v10 = vrot.slane %v991_v50, 1  ;;  %v909_v20 = vld [vmem:[%s10329_s7] sm:$0xff]  ;;  %1249 = vperm.xlu0 %6575, %v915_v51  }
 0x2ae   :  { %1135 = vmatpush.msrb.mxu1 %v1089_v23  ;;  %1308 = vmatpush.msra.mxu3 %v906_v43 }
 0x2af   :  { %v1037_v31 = vsel %vm1026_vm2, %v1034_v18, %v1036_v41  ;;  %v1035_v28 = vsel %vm1026_vm2, %v1032_v22, %v1034_v18  ;;  %v1033_v6 = vsel %vm1026_vm2, %v1030_v13, %v1032_v22  ;;  %v916_v41 = vld [vmem:[%s10329_s7 + $0x38] sm:$0xff]  ;;  %v911_v18 = vld [vmem:[%s10329_s7 + $0x10] sm:$0xff] }
 0x2b0   :  { %1136 = vmatpush.msrb.mxu1 %v1088_v63  ;;  %v937_v38 = vpop.permute.xlu0 %936  ;;  %5909 = vmatmul.msk.f32.gmra.mxu2 %vm1098_vm3, %v891_v49  ;;  %v1084_v29 = vmax.f32 %v994_v33, %v1037_v31  ;;  %v1083_v8 = vmax.f32 %v993_v17, %v1035_v28  ;;  %v1082_v11 = vmax.f32 %v992_v27, %v1033_v6  ;;  %v913_v17 = vld [vmem:[%s10329_s7 + $0x20] sm:$0xff] }
 0x2b1   :  { %v990_v5 = vmax.f32 %v7674_v62, %v937_v38  ;;  %v1031_v62 = vsel %vm1026_vm2, %v1028_v10, %v1030_v13  ;;  %1254 = vperm.xlu2 %6574, %v916_v41   ;;  %v1346_v41 = vld [vmem:[%s10324_s2] sm:$0xff] }
 0x2b2   :  { %1137 = vmatpush.msrb.mxu1 %v1087_v47  ;;  %v1081_v60 = vmax.f32 %v991_v50, %v1031_v62  ;;  %1244 = vperm.xlu1 %6573, %v914_v2  }
 0x2b3   :  { %v1027_v26 = vrot.slane %v990_v5, 1 }
 0x2b4   :  { %1138 = vmatpush.msrb.mxu1 %v1086_v15 }
 0x2b5   :  { %v1029_v36 = vsel %vm1026_vm2, %v1027_v26, %v1028_v10  ;;  %1224 = vperm.xlu0 %6575, %v910_v53  }
 0x2b6   :  { %1139 = vmatpush.msrb.mxu1 %v1085_v9  ;;  %v1080_v4 = vmax.f32 %v990_v5, %v1029_v36 }
 0x2b8   :  { %1140 = vmatpush.msrb.mxu1 %v1084_v29  ;;  %5910 = vmatmul.msk.f32.gmra.mxu2 %vm1098_vm3, %v893_v57 }
 0x2b9   :  { %1239 = vperm.xlu2 %6574, %v913_v17   ;;  %v1348_v17 = vld [vmem:[%s10324_s2 + $0x10] sm:$0xff] }
 0x2ba   :  { %1141 = vmatpush.msrb.mxu1 %v1083_v8  ;;  %1234 = vperm.xlu1 %6573, %v912_v16  }
 0x2bc   :  { %1142 = vmatpush.msrb.mxu1 %v1082_v11 }
 0x2be   :  { %1143 = vmatpush.msrb.mxu1 %v1081_v60 }
 0x2c0   :  { %1144 = vmatpush.msrb.mxu1 %v1080_v4  ;;  %5911 = vmatmul.msk.f32.gmra.mxu2 %vm1098_vm3, %v895_v12 }
 0x2c1   :  { %1145 = vmatmul.f32.vlgmr.msrb.gmra.mxu1 %v888_v32  ;;  %1229 = vperm.xlu2 %6574, %v911_v18  }
 0x2c2   :  { %1219 = vperm.xlu1 %6573, %v909_v20  }
 0x2c8   :  { %5912 = vmatmul.msk.f32.gmra.mxu2 %vm1098_vm3, %v897_v30 }
 0x2c9   :  { %1148 = vmatmul.f32.gmra.mxu1 %v890_v34 }
 0x2d0   :  { %5913 = vmatmul.msk.f32.gmra.mxu2 %vm1098_vm3, %v899_v35 }
 0x2d1   :  { %1151 = vmatmul.f32.gmra.mxu1 %v892_v45 }
 0x2d8   :  { %5914 = vmatmul.msk.f32.gmra.mxu2 %vm1098_vm3, %v901_v25 }
 0x2d9   :  { %1154 = vmatmul.f32.gmra.mxu1 %v894_v37 }
 0x2e0   :  { %5915 = vmatmul.msk.f32.gmra.mxu2 %vm1098_vm3, %v903_v42 }
 0x2e1   :  { %1157 = vmatmul.f32.gmra.mxu1 %v896_v44 }
 0x2e8   :  { %5916 = vmatmul.msk.f32.gmra.mxu2 %vm1098_vm3, %v905_v40 }
 0x2e9   :  { %1160 = vmatmul.f32.gmra.mxu1 %v898_v58 }
 0x2f1   :  { %1163 = vmatmul.f32.gmra.mxu1 %v900_v19 }
 0x2f9   :  { %1166 = vmatmul.f32.gmra.mxu1 %v902_v24 }
 0x301   :  { %1169 = vmatmul.f32.gmra.mxu1 %v904_v61 }
 0x30b   :  { %v1255_v11 = vpop.permute.xlu2 %1254 }
 0x313   :  { %v1240_v4 = vpop.permute.xlu2 %1239 }
 0x31c   :  { %v1260_v6 = vpop.permute.xlu1 %1259 }
 0x31f   :  { %v1250_v42 = vpop.permute.xlu0 %1249 }
 0x324   :  { %v1245_v62 = vpop.permute.xlu1 %1244 }
 0x32b   :  { %v1190_v48 = vpop.f32.mrf.mxu2 }
 0x32c   :  { %v1235_v60 = vpop.permute.xlu1 %1234 }
 0x333   :  { %v1193_v54 = vpop.f32.mrf.mxu2 }
 0x334   :  { %v1220_v19 = vpop.permute.xlu1 %1219 }
 0x33b   :  { %v1196_v33 = vpop.f32.mrf.mxu2 }
 0x33e   :  { %v1146_v1 = vpop.f32.mrf.mxu1 }
 0x33f   :  { %v1191_v56 = vadd.f32 %v1190_v48, %v1146_v1  ;;  %v1230_v48 = vpop.permute.xlu2 %1229 }
 0x341   :  { %5918 = vmatmul.msk.f32.vlgmr.msra.gmra.mxu3 %vm1262_vm4, %v1191_v56 }
 0x343   :  { %v1199_v59 = vpop.f32.mrf.mxu2 }
 0x346   :  { %v1149_v23 = vpop.f32.mrf.mxu1 }
 0x347   :  { %v1194_v14 = vadd.f32 %v1193_v54, %v1149_v23  ;;  %v1225_v54 = vpop.permute.xlu0 %1224 }
 0x349   :  { %5919 = vmatmul.msk.f32.gmra.mxu3 %vm1262_vm4, %v1194_v14 }
 0x34b   :  { %v1202_v49 = vpop.f32.mrf.mxu2 }
 0x34e   :  { %v1152_v39 = vpop.f32.mrf.mxu1 }
 0x34f   :  { %v1197_v0 = vadd.f32 %v1196_v33, %v1152_v39 }
 0x351   :  { %5920 = vmatmul.msk.f32.gmra.mxu3 %vm1262_vm4, %v1197_v0 }
 0x353   :  { %v1205_v47 = vpop.f32.mrf.mxu2 }
 0x356   :  { %v1155_v63 = vpop.f32.mrf.mxu1 }
 0x357   :  { %v1200_v7 = vadd.f32 %v1199_v59, %v1155_v63  ;;  %v1347_v59 = vld [vmem:[%s10324_s2 + $0x8] sm:$0xff] }
 0x359   :  { %5921 = vmatmul.msk.f32.gmra.mxu3 %vm1262_vm4, %v1200_v7 }
 0x35b   :  { %v1208_v50 = vpop.f32.mrf.mxu2 }
 0x35e   :  { %v1158_v38 = vpop.f32.mrf.mxu1 }
 0x35f   :  { %v1203_v21 = vadd.f32 %v1202_v49, %v1158_v38 }
 0x361   :  { %5922 = vmatmul.msk.f32.gmra.mxu3 %vm1262_vm4, %v1203_v21 }
 0x363   :  { %v1211_v31 = vpop.f32.mrf.mxu2 }
 0x366   :  { %v1161_v22 = vpop.f32.mrf.mxu1 }
 0x367   :  { %v1206_v27 = vadd.f32 %v1205_v47, %v1161_v22  ;;  %v1349_v47 = vld [vmem:[%s10324_s2 + $0x18] sm:$0xff] }
 0x369   :  { %5923 = vmatmul.msk.f32.gmra.mxu3 %vm1262_vm4, %v1206_v27 }
 0x36b   :  { %v1214_v13 = vpop.f32.mrf.mxu2 }
 0x36e   :  { %v1164_v15 = vpop.f32.mrf.mxu1 }
 0x36f   :  { %v1209_v5 = vadd.f32 %v1208_v50, %v1164_v15 }
 0x371   :  { %5924 = vmatmul.msk.f32.gmra.mxu3 %vm1262_vm4, %v1209_v5 }
 0x376   :  { %v1167_v9 = vpop.f32.mrf.mxu1 }
 0x377   :  { %v1212_v28 = vadd.f32 %v1211_v31, %v1167_v9  ;;  %v1350_v9 = vld [vmem:[%s10324_s2 + $0x20] sm:$0xff] }
 0x379   :  { %5925 = vmatmul.msk.f32.gmra.mxu3 %vm1262_vm4, %v1212_v28 }
 0x37e   :  { %v1170_v10 = vpop.f32.mrf.mxu1 }
 0x37f   :  { %v1215_v57 = vadd.f32 %v1214_v13, %v1170_v10  ;;  %v5927_v13 = vld [vmem:[%s10324_s2 + $0x80] sm:$0xff] }
 0x381   :  { %5926 = vmatmul.msk.f32.gmra.mxu3 %vm1262_vm4, %v1215_v57 }
 0x3c4   :  { %v1310_v29 = vpop.f32.mrf.mxu3 }
 0x3c5   :  { %v1311_v61 = vadd.f32 %v1310_v29, %v1220_v19 }
 0x3c7   :  { %v1337_v3 = vmax.f32 %v1311_v61, 0.0 }
 0x3cc   :  { %v1313_v26 = vpop.f32.mrf.mxu3 }
 0x3cd   :  { %v1314_v56 = vadd.f32 %v1313_v26, %v1225_v54  ;;  %v5930_v54 = vld [vmem:[%s10324_s2 + $0x98] sm:$0xff] }
 0x3cf   :  { %v1338_v23 = vmax.f32 %v1314_v56, 0.0 }
 0x3d4   :  { %v1316_v8 = vpop.f32.mrf.mxu3 }
 0x3d5   :  { %v1317_v53 = vadd.f32 %v1316_v8, %v1230_v48  ;;  %v1353_v48 = vld [vmem:[%s10324_s2 + $0x38] sm:$0xff] }
 0x3d7   :  { %v1339_v33 = vmax.f32 %v1317_v53, 0.0 }
 0x3d9   :  { %v6591_v14 = vpack.i.bf16 %v1338_v23, %v1339_v33 }
 0x3dc   :  { %v1319_v36 = vpop.f32.mrf.mxu3 }
 0x3dd   :  { %v1320_v12 = vadd.f32 %v1319_v36, %v1235_v60 }
 0x3df   :  { %v1340_v34 = vmax.f32 %v1320_v12, 0.0 }
 0x3e4   :  { %v1322_v32 = vpop.f32.mrf.mxu3 }
 0x3e5   :  { %v1323_v30 = vadd.f32 %v1322_v32, %v1240_v4 }
 0x3e7   :  { %v1341_v35 = vmax.f32 %v1323_v30, 0.0 }
 0x3e9   :  { %v6586_v45 = vpack.i.bf16 %v1340_v34, %v1341_v35 }
 0x3eb   :  { %6587 = vrot.lane.b32.xlu1 %v6586_v45, %s6946_s24 }
 0x3ec   :  { %v1325_v25 = vpop.f32.mrf.mxu3 }
 0x3ed   :  { %v1326_v37 = vadd.f32 %v1325_v25, %v1245_v62 }
 0x3ef   :  { %v1342_v52 = vmax.f32 %v1326_v37, 0.0 }
 0x3f4   :  { %v1328_v44 = vpop.f32.mrf.mxu3 }
 0x3f5   :  { %v1329_v46 = vadd.f32 %v1328_v44, %v1250_v42 }
 0x3f7   :  { %v1343_v40 = vmax.f32 %v1329_v46, 0.0 }
 0x3f9   :  { %v6611_v58 = vpack.i.bf16 %v1342_v52, %v1343_v40 }
 0x3fb   :  { %6612 = vrot.lane.b32.xlu1 %v6611_v58, %s6948_s28  ;;  %6582 = vrot.lane.b32.xlu0 %v6611_v58, %s6946_s24 }
 0x3fc   :  { %v1331_v24 = vpop.f32.mrf.mxu3 }
 0x3fd   :  { %v1332_v43 = vadd.f32 %v1331_v24, %v1255_v11  ;;  %v5928_v11 = vld [vmem:[%s10324_s2 + $0x88] sm:$0xff] }
 0x3ff   :  { %v1344_v20 = vmax.f32 %v1332_v43, 0.0 }
 0x403   :  { %1388 = vrot.lane.b32.xlu0 %v1337_v3, %s6946_s24 }
 0x404   :  { %v1334_v2 = vpop.f32.mrf.mxu3 }
 0x405   :  { %v1335_v16 = vadd.f32 %v1334_v2, %v1260_v6  ;;  %v1351_v6 = vld [vmem:[%s10324_s2 + $0x28] sm:$0xff] }
 0x407   :  { %v1345_v51 = vmax.f32 %v1335_v16, 0.0  ;;  %v5975_v16 = vld [vmem:[%s10324_s2 + $0x100] sm:$0xff] }
 0x409   :  { %1584 = vmatpush.msra.mxu2 %v1345_v51  ;;  %v6576_v1 = vpack.i.bf16 %v1344_v20, %v1345_v51 }
 0x40b   :  { %6577 = vrot.lane.b32.xlu2 %v6576_v1, %s6946_s24  ;;  %1585 = vmatpush.msra.mxu2 %v1344_v20 }
 0x40c   :  { %6622 = vrot.lane.b32.xlu1 %v6576_v1, %s6947_s27  ;;  %6602 = vrot.lane.b32.xlu0 %v6586_v45, %s6947_s27 }
 0x40d   :  { %1586 = vmatpush.msra.mxu2 %v1343_v40 }
 0x40f   :  { %1587 = vmatpush.msra.mxu2 %v1342_v52  ;;  %v5929_v52 = vld [vmem:[%s10324_s2 + $0x90] sm:$0xff] }
 0x411   :  { %1588 = vmatpush.msra.mxu2 %v1341_v35  ;;  %v1352_v35 = vld [vmem:[%s10324_s2 + $0x30] sm:$0xff] }
 0x413   :  { %1589 = vmatpush.msra.mxu2 %v1340_v34  ;;  %6592 = vrot.lane.b32.xlu2 %v6591_v14, %s6946_s24 }
 0x414   :  { %6627 = vrot.lane.b32.xlu1 %v6576_v1, %s6948_s28  ;;  %6607 = vrot.lane.b32.xlu0 %v6591_v14, %s6947_s27 }
 0x415   :  { %1590 = vmatpush.msra.mxu2 %v1339_v33 }
 0x417   :  { %1591 = vmatpush.msra.mxu2 %v1338_v23  ;;  %v5976_v23 = vld [vmem:[%s10324_s2 + $0x108] sm:$0xff] }
 0x419   :  { %1592 = vmatpush.msra.mxu2 %v1337_v3 }
 0x41a   :  { %5959 = vmatmul.msk.f32.vlgmr.msra.gmra.mxu2 %vm1415_vm5, %v1346_v41 }
 0x41b   :  { %6597 = vrot.lane.b32.xlu2 %v6611_v58, %s6947_s27 }
 0x41c   :  { %6632 = vrot.lane.b32.xlu1 %v6586_v45, %s6948_s28  ;;  %1659 = vrot.lane.b32.xlu0 %v1337_v3, %s6947_s27 }
 0x422   :  { %5960 = vmatmul.msk.f32.gmra.mxu2 %vm1415_vm5, %v1347_v59  ;;  %v1354_v59 = vld [vmem:[%s10324_s2 + $0x40] sm:$0xff] }
 0x423   :  { %6617 = vrot.lane.b32.xlu2 %v6611_v58, %s6949_s29 }
 0x424   :  { %6652 = vrot.lane.b32.xlu1 %v6591_v14, %s6949_s29  ;;  %6647 = vrot.lane.b32.xlu0 %v6591_v14, %s6948_s28 }
 0x42a   :  { %5961 = vmatmul.msk.f32.gmra.mxu2 %vm1415_vm5, %v1348_v17 }
 0x42b   :  { %6637 = vrot.lane.b32.xlu2 %v6576_v1, %s6949_s29 }
 0x42c   :  { %2005 = vrot.lane.b32.xlu0 %v1337_v3, %s6949_s29 }
 0x432   :  { %5962 = vmatmul.msk.f32.gmra.mxu2 %vm1415_vm5, %v1349_v47  ;;  %v5978_v47 = vld [vmem:[%s10324_s2 + $0x118] sm:$0xff] }
 0x433   :  { %6642 = vrot.lane.b32.xlu2 %v6586_v45, %s6949_s29 }
 0x43a   :  { %5963 = vmatmul.msk.f32.gmra.mxu2 %vm1415_vm5, %v1350_v9  ;;  %v5980_v9 = vld [vmem:[%s10324_s2 + $0x128] sm:$0xff] }
 0x43b   :  { %1832 = vrot.lane.b32.xlu2 %v1337_v3, %s6948_s28 }
 0x442   :  { %5964 = vmatmul.msk.f32.gmra.mxu2 %vm1415_vm5, %v1351_v6  ;;  %v6012_v6 = vld [vmem:[%s10324_s2 + $0x1a8] sm:$0xff] }
 0x44a   :  { %5965 = vmatmul.msk.f32.gmra.mxu2 %vm1415_vm5, %v1352_v35  ;;  %v6015_v35 = vld [vmem:[%s10324_s2 + $0x1c0] sm:$0xff] }
 0x452   :  { %5966 = vmatmul.msk.f32.gmra.mxu2 %vm1415_vm5, %v1353_v48  ;;  %v6040_v48 = vld [vmem:[%s10324_s2 + $0x208] sm:$0xff] }
 0x45a   :  { %5967 = vmatmul.msk.f32.gmra.mxu2 %vm1415_vm5, %v1354_v59  ;;  %v6044_v59 = vld [vmem:[%s10324_s2 + $0x228] sm:$0xff] }
 0x45d   :  { %v6588_v7 = vpop.permute.xlu1 %6587 }
 0x45e   :  { %v6589_v22 = vunpack.i.l.bf16 %v6588_v7  ;;  %v6590_v27 = vunpack.i.h.bf16 %v6588_v7  ;;  %v1355_v7 = vld [vmem:[%s10324_s2 + $0x48] sm:$0xff] }
 0x462   :  { %5968 = vmatmul.msk.f32.gmra.mxu2 %vm1415_vm5, %v1355_v7  ;;  %v6047_v7 = vld [vmem:[%s10324_s2 + $0x240] sm:$0xff] }
 0x465   :  { %v6578_v39 = vpop.permute.xlu2 %6577 }
 0x466   :  { %v6579_v0 = vunpack.i.l.bf16 %v6578_v39  ;;  %v6580_v49 = vunpack.i.h.bf16 %v6578_v39  ;;  %v5931_v39 = vld [vmem:[%s10324_s2 + $0xa0] sm:$0xff] }
 0x468   :  { %1471 = vmatpush.msra.mxu1 %v6579_v0  ;;  %v6007_v0 = vld [vmem:[%s10324_s2 + $0x180] sm:$0xff] }
 0x46a   :  { %1472 = vmatpush.msra.mxu1 %v6580_v49 }
 0x46d   :  { %v6593_v63 = vpop.permute.xlu2 %6592  ;;  %v6583_v18 = vpop.permute.xlu0 %6582 }
 0x46e   :  { %v6584_v38 = vunpack.i.l.bf16 %v6583_v18  ;;  %v6585_v21 = vunpack.i.h.bf16 %v6583_v18  ;;  %v6613_v15 = vpop.permute.xlu1 %6612  ;;  %v6594_v31 = vunpack.i.l.bf16 %v6593_v63  ;;  %v6595_v28 = vunpack.i.h.bf16 %v6593_v63  ;;  %v5977_v63 = vld [vmem:[%s10324_s2 + $0x110] sm:$0xff]  ;;  %v5932_v18 = vld [vmem:[%s10324_s2 + $0xa8] sm:$0xff] }
 0x46f   :  { %v6614_v44 = vunpack.i.l.bf16 %v6613_v15  ;;  %v6615_v40 = vunpack.i.h.bf16 %v6613_v15  ;;  %v1357_v15 = vld [vmem:[%s10324_s2 + $0x58] sm:$0xff] }
 0x470   :  { %1473 = vmatpush.msra.mxu1 %v6584_v38  ;;  %v6008_v38 = vld [vmem:[%s10324_s2 + $0x188] sm:$0xff] }
 0x472   :  { %1474 = vmatpush.msra.mxu1 %v6585_v21  ;;  %v1356_v21 = vld [vmem:[%s10324_s2 + $0x50] sm:$0xff] }
 0x473   :  { %5969 = vmatmul.msk.f32.gmra.mxu2 %vm1415_vm5, %v1356_v21  ;;  %v6049_v21 = vld [vmem:[%s10324_s2 + $0x250] sm:$0xff] }
 0x474   :  { %1475 = vmatpush.msra.mxu1 %v6589_v22  ;;  %v5933_v22 = vld [vmem:[%s10324_s2 + $0xb0] sm:$0xff] }
 0x475   :  { %v6598_v50 = vpop.permute.xlu2 %6597  ;;  %v1389_v5 = vpop.permute.xlu0 %1388 }
 0x476   :  { %1476 = vmatpush.msra.mxu1 %v6590_v27  ;;  %v6599_v62 = vunpack.i.l.bf16 %v6598_v50  ;;  %v6600_v36 = vunpack.i.h.bf16 %v6598_v50  ;;  %v6009_v27 = vld [vmem:[%s10324_s2 + $0x190] sm:$0xff]  ;;  %v5979_v50 = vld [vmem:[%s10324_s2 + $0x120] sm:$0xff] }
 0x478   :  { %1477 = vmatpush.msra.mxu1 %v6594_v31  ;;  %v6010_v31 = vld [vmem:[%s10324_s2 + $0x198] sm:$0xff] }
 0x47a   :  { %1478 = vmatpush.msra.mxu1 %v6595_v28  ;;  %v1358_v28 = vld [vmem:[%s10324_s2 + $0x60] sm:$0xff] }
 0x47b   :  { %5970 = vmatmul.msk.f32.gmra.mxu2 %vm1415_vm5, %v1357_v15 }
 0x47c   :  { %1479 = vmatpush.msra.mxu1 %v1389_v5  ;;  %v5934_v5 = vld [vmem:[%s10324_s2 + $0xb8] sm:$0xff] }
 0x47d   :  { %v6618_v10 = vpop.permute.xlu2 %6617  ;;  %5943 = vmatmul.msk.f32.vlgmr.msra.gmra.mxu1 %vm1415_vm5, %v5927_v13  ;;  %v5935_v13 = vld [vmem:[%s10324_s2 + $0xc0] sm:$0xff] }
 0x47e   :  { %v6623_v57 = vpop.permute.xlu1 %6622  ;;  %v6603_v29 = vpop.permute.xlu0 %6602  ;;  %v6619_v42 = vunpack.i.l.bf16 %v6618_v10  ;;  %v6620_v24 = vunpack.i.h.bf16 %v6618_v10  ;;  %v6011_v10 = vld [vmem:[%s10324_s2 + $0x1a0] sm:$0xff] }
 0x47f   :  { %v6624_v26 = vunpack.i.l.bf16 %v6623_v57  ;;  %v6625_v8 = vunpack.i.h.bf16 %v6623_v57  ;;  %v6604_v30 = vunpack.i.l.bf16 %v6603_v29  ;;  %v6605_v25 = vunpack.i.h.bf16 %v6603_v29  ;;  %v5981_v57 = vld [vmem:[%s10324_s2 + $0x130] sm:$0xff]  ;;  %v1359_v29 = vld [vmem:[%s10324_s2 + $0x68] sm:$0xff] }
 0x481   :  { %1741 = vmatpush.msrb.mxu3 %v6624_v26  ;;  %v5936_v26 = vld [vmem:[%s10324_s2 + $0xc8] sm:$0xff] }
 0x483   :  { %1742 = vmatpush.msrb.mxu3 %v6625_v8  ;;  %5971 = vmatmul.msk.f32.gmra.mxu2 %vm1415_vm5, %v1358_v28  ;;  %v5982_v8 = vld [vmem:[%s10324_s2 + $0x138] sm:$0xff] }
 0x485   :  { %1743 = vmatpush.msrb.mxu3 %v6599_v62  ;;  %v6638_v60 = vpop.permute.xlu2 %6637  ;;  %5944 = vmatmul.msk.f32.gmra.mxu1 %vm1415_vm5, %v5928_v11  ;;  %v1360_v62 = vld [vmem:[%s10324_s2 + $0x70] sm:$0xff] }
 0x486   :  { %v6628_v12 = vpop.permute.xlu1 %6627  ;;  %v6639_v4 = vunpack.i.l.bf16 %v6638_v60  ;;  %v6608_v32 = vpop.permute.xlu0 %6607  ;;  %v6640_v45 = vunpack.i.h.bf16 %v6638_v60  ;;  %v5937_v11 = vld [vmem:[%s10324_s2 + $0xd0] sm:$0xff]  ;;  %v5983_v60 = vld [vmem:[%s10324_s2 + $0x140] sm:$0xff] }
 0x487   :  { %v6629_v34 = vunpack.i.l.bf16 %v6628_v12  ;;  %1744 = vmatpush.msrb.mxu3 %v6600_v36  ;;  %v6630_v37 = vunpack.i.h.bf16 %v6628_v12  ;;  %v6609_v46 = vunpack.i.l.bf16 %v6608_v32  ;;  %v6610_v58 = vunpack.i.h.bf16 %v6608_v32  ;;  %v6013_v36 = vld [vmem:[%s10324_s2 + $0x1b0] sm:$0xff]  ;;  %v1361_v12 = vld [vmem:[%s10324_s2 + $0x78] sm:$0xff] }
 0x488   :  { %2087 = vmatpush.msrb.mxu1 %v6639_v4  ;;  %v5938_v4 = vld [vmem:[%s10324_s2 + $0xd8] sm:$0xff] }
 0x489   :  { %1745 = vmatpush.msrb.mxu3 %v6604_v30  ;;  %1914 = vmatpush.msrb.mxu0 %v6629_v34  ;;  %v6014_v32 = vld [vmem:[%s10324_s2 + $0x1b8] sm:$0xff]  ;;  %v5984_v30 = vld [vmem:[%s10324_s2 + $0x148] sm:$0xff]  ;;  %v5939_v34 = vld [vmem:[%s10324_s2 + $0xe0] sm:$0xff] }
 0x48a   :  { %2088 = vmatpush.msrb.mxu1 %v6640_v45  ;;  %v5985_v45 = vld [vmem:[%s10324_s2 + $0x150] sm:$0xff] }
 0x48b   :  { %1746 = vmatpush.msrb.mxu3 %v6605_v25  ;;  %1915 = vmatpush.msrb.mxu0 %v6630_v37  ;;  %v5940_v25 = vld [vmem:[%s10324_s2 + $0xe8] sm:$0xff] }
 0x48c   :  { %2089 = vmatpush.msrb.mxu1 %v6619_v42  ;;  %5972 = vmatmul.msk.f32.gmra.mxu2 %vm1415_vm5, %v1359_v29  ;;  %v6016_v37 = vld [vmem:[%s10324_s2 + $0x1c8] sm:$0xff]  ;;  %v5986_v42 = vld [vmem:[%s10324_s2 + $0x158] sm:$0xff] }
 0x48d   :  { %1747 = vmatpush.msrb.mxu3 %v6609_v46  ;;  %1916 = vmatpush.msrb.mxu0 %v6614_v44  ;;  %v6643_v19 = vpop.permute.xlu2 %6642  ;;  %v5941_v44 = vld [vmem:[%s10324_s2 + $0xf0] sm:$0xff]  ;;  %v6052_v29 = vld [vmem:[%s10324_s2 + $0x268] sm:$0xff] }
 0x48e   :  { %v6633_v61 = vpop.permute.xlu1 %6632  ;;  %v6644_v3 = vunpack.i.l.bf16 %v6643_v19  ;;  %v1660_v43 = vpop.permute.xlu0 %1659  ;;  %5945 = vmatmul.msk.f32.gmra.mxu1 %vm1415_vm5, %v5929_v52  ;;  %v6645_v51 = vunpack.i.h.bf16 %v6643_v19  ;;  %v6017_v46 = vld [vmem:[%s10324_s2 + $0x1d0] sm:$0xff]  ;;  %v5987_v52 = vld [vmem:[%s10324_s2 + $0x160] sm:$0xff]  ;;  %v5988_v19 = vld [vmem:[%s10324_s2 + $0x168] sm:$0xff] }
 0x48f   :  { %v6634_v2 = vunpack.i.l.bf16 %v6633_v61  ;;  %1748 = vmatpush.msrb.mxu3 %v6610_v58  ;;  %1917 = vmatpush.msrb.mxu0 %v6615_v40  ;;  %v6635_v20 = vunpack.i.h.bf16 %v6633_v61  ;;  %v5942_v40 = vld [vmem:[%s10324_s2 + $0xf8] sm:$0xff]  ;;  %v6019_v61 = vld [vmem:[%s10324_s2 + $0x1e0] sm:$0xff] }
 0x490   :  { %2090 = vmatpush.msrb.mxu1 %v6620_v24  ;;  %v6018_v58 = vld [vmem:[%s10324_s2 + $0x1d8] sm:$0xff] }
 0x491   :  { %1749 = vmatpush.msrb.mxu3 %v1660_v43  ;;  %1918 = vmatpush.msrb.mxu0 %v6634_v2  ;;  %v5989_v43 = vld [vmem:[%s10324_s2 + $0x170] sm:$0xff] }
 0x492   :  { %2091 = vmatpush.msrb.mxu1 %v6644_v3  ;;  %5991 = vmatmul.msk.f32.vlgmr.msrb.gmra.mxu3 %vm1415_vm5, %v5975_v16  ;;  %v6039_v3 = vld [vmem:[%s10324_s2 + $0x200] sm:$0xff]  ;;  %v6020_v16 = vld [vmem:[%s10324_s2 + $0x1e8] sm:$0xff] }
 0x493   :  { %1919 = vmatpush.msrb.mxu0 %v6635_v20  ;;  %v5990_v20 = vld [vmem:[%s10324_s2 + $0x178] sm:$0xff] }
 0x494   :  { %2092 = vmatpush.msrb.mxu1 %v6645_v51  ;;  %5973 = vmatmul.msk.f32.gmra.mxu2 %vm1415_vm5, %v1360_v62  ;;  %v6053_v62 = vld [vmem:[%s10324_s2 + $0x270] sm:$0xff] }
 0x495   :  { %v1833_v17 = vpop.permute.xlu2 %1832 }
 0x496   :  { %v6653_v53 = vpop.permute.xlu1 %6652  ;;  %v6648_v1 = vpop.permute.xlu0 %6647  ;;  %5946 = vmatmul.msk.f32.gmra.mxu1 %vm1415_vm5, %v5930_v54  ;;  %v6021_v54 = vld [vmem:[%s10324_s2 + $0x1f0] sm:$0xff] }
 0x497   :  { %v6654_v56 = vunpack.i.l.bf16 %v6653_v53  ;;  %v6649_v33 = vunpack.i.l.bf16 %v6648_v1  ;;  %v6655_v14 = vunpack.i.h.bf16 %v6653_v53  ;;  %v6650_v41 = vunpack.i.h.bf16 %v6648_v1  ;;  %v6041_v53 = vld [vmem:[%s10324_s2 + $0x210] sm:$0xff] }
 0x499   :  { %1920 = vmatpush.msrb.mxu0 %v6649_v33  ;;  %2093 = vmatpush.msrb.mxu1 %v6654_v56  ;;  %v6022_v56 = vld [vmem:[%s10324_s2 + $0x1f8] sm:$0xff] }
 0x49a   :  { %5992 = vmatmul.msk.f32.gmra.mxu3 %vm1415_vm5, %v5976_v23  ;;  %v6042_v33 = vld [vmem:[%s10324_s2 + $0x218] sm:$0xff] }
 0x49b   :  { %1921 = vmatpush.msrb.mxu0 %v6650_v41  ;;  %2094 = vmatpush.msrb.mxu1 %v6655_v14  ;;  %v6043_v14 = vld [vmem:[%s10324_s2 + $0x220] sm:$0xff] }
 0x49c   :  { %5974 = vmatmul.msk.f32.gmra.mxu2 %vm1415_vm5, %v1361_v12  ;;  %v6054_v12 = vld [vmem:[%s10324_s2 + $0x278] sm:$0xff] }
 0x49d   :  { %1922 = vmatpush.msrb.mxu0 %v1833_v17 }
 0x49e   :  { %v2006_v49 = vpop.permute.xlu0 %2005  ;;  %5947 = vmatmul.msk.f32.gmra.mxu1 %vm1415_vm5, %v5931_v39  ;;  %6023 = vmatmul.msk.f32.vlgmr.msrb.gmra.mxu0 %vm1415_vm5, %v6007_v0  ;;  %v6045_v0 = vld [vmem:[%s10324_s2 + $0x230] sm:$0xff] }
 0x49f   :  { %2095 = vmatpush.msrb.mxu1 %v2006_v49  ;;  %v6046_v49 = vld [vmem:[%s10324_s2 + $0x238] sm:$0xff] }
 0x4a2   :  { %5993 = vmatmul.msk.f32.gmra.mxu3 %vm1415_vm5, %v5977_v63 }
 0x4a6   :  { %5948 = vmatmul.msk.f32.gmra.mxu1 %vm1415_vm5, %v5932_v18  ;;  %6024 = vmatmul.msk.f32.gmra.mxu0 %vm1415_vm5, %v6008_v38  ;;  %v6048_v38 = vld [vmem:[%s10324_s2 + $0x248] sm:$0xff] }
 0x4aa   :  { %5994 = vmatmul.msk.f32.gmra.mxu3 %vm1415_vm5, %v5978_v47 }
 0x4ae   :  { %5949 = vmatmul.msk.f32.gmra.mxu1 %vm1415_vm5, %v5933_v22  ;;  %6025 = vmatmul.msk.f32.gmra.mxu0 %vm1415_vm5, %v6009_v27  ;;  %v6050_v27 = vld [vmem:[%s10324_s2 + $0x258] sm:$0xff] }
 0x4b2   :  { %5995 = vmatmul.msk.f32.gmra.mxu3 %vm1415_vm5, %v5979_v50  ;;  %v8170_v50 = vpop.f32.mrf.mxu2 }
 0x4b6   :  { %5950 = vmatmul.msk.f32.gmra.mxu1 %vm1415_vm5, %v5934_v5  ;;  %6026 = vmatmul.msk.f32.gmra.mxu0 %vm1415_vm5, %v6010_v31 }
 0x4ba   :  { %5996 = vmatmul.msk.f32.gmra.mxu3 %vm1415_vm5, %v5980_v9  ;;  %v6051_v9 = vld [vmem:[%s10324_s2 + $0x260] sm:$0xff]  ;;  %v8181_v28 = vpop.f32.mrf.mxu2 }
 0x4be   :  { %5951 = vmatmul.msk.f32.gmra.mxu1 %vm1415_vm5, %v5935_v13  ;;  %6027 = vmatmul.msk.f32.gmra.mxu0 %vm1415_vm5, %v6011_v10 }
 0x4c2   :  { %5997 = vmatmul.msk.f32.gmra.mxu3 %vm1415_vm5, %v5981_v57 }
 0x4c6   :  { %5952 = vmatmul.msk.f32.gmra.mxu1 %vm1415_vm5, %v5936_v26  ;;  %6028 = vmatmul.msk.f32.gmra.mxu0 %vm1415_vm5, %v6012_v6  ;;  %v8193_v26 = vpop.f32.mrf.mxu2 }
 0x4ca   :  { %5998 = vmatmul.msk.f32.gmra.mxu3 %vm1415_vm5, %v5982_v8 }
 0x4ce   :  { %5953 = vmatmul.msk.f32.gmra.mxu1 %vm1415_vm5, %v5937_v11  ;;  %6029 = vmatmul.msk.f32.gmra.mxu0 %vm1415_vm5, %v6013_v36  ;;  %v8205_v36 = vpop.f32.mrf.mxu2 }
 0x4cf   :  { %10400 = vst [vmem:[#allocation9_spill] sm:$0xff] %v8205_v36 }
 0x4d2   :  { %5999 = vmatmul.msk.f32.gmra.mxu3 %vm1415_vm5, %v5983_v60 }
 0x4d6   :  { %5954 = vmatmul.msk.f32.gmra.mxu1 %vm1415_vm5, %v5938_v4  ;;  %6030 = vmatmul.msk.f32.gmra.mxu0 %vm1415_vm5, %v6014_v32 }
 0x4da   :  { %6000 = vmatmul.msk.f32.gmra.mxu3 %vm1415_vm5, %v5984_v30 }
 0x4de   :  { %5955 = vmatmul.msk.f32.gmra.mxu1 %vm1415_vm5, %v5939_v34  ;;  %6031 = vmatmul.msk.f32.gmra.mxu0 %vm1415_vm5, %v6015_v35  ;;  %v8219_v34 = vpop.f32.mrf.mxu2 }
 0x4df   :  { %10403 = vst [vmem:[#allocation7_spill] sm:$0xff] %v8219_v34 }
 0x4e2   :  { %6001 = vmatmul.msk.f32.gmra.mxu3 %vm1415_vm5, %v5985_v45 }
 0x4e6   :  { %5956 = vmatmul.msk.f32.gmra.mxu1 %vm1415_vm5, %v5940_v25  ;;  %6032 = vmatmul.msk.f32.gmra.mxu0 %vm1415_vm5, %v6016_v37  ;;  %v1609_v37 = vpop.f32.mrf.mxu2 }
 0x4ea   :  { %6002 = vmatmul.msk.f32.gmra.mxu3 %vm1415_vm5, %v5986_v42 }
 0x4ee   :  { %5957 = vmatmul.msk.f32.gmra.mxu1 %vm1415_vm5, %v5941_v44  ;;  %6033 = vmatmul.msk.f32.gmra.mxu0 %vm1415_vm5, %v6017_v46 }
 0x4f2   :  { %6003 = vmatmul.msk.f32.gmra.mxu3 %vm1415_vm5, %v5987_v52  ;;  %v1612_v52 = vpop.f32.mrf.mxu2 }
 0x4f6   :  { %5958 = vmatmul.msk.f32.gmra.mxu1 %vm1415_vm5, %v5942_v40  ;;  %6034 = vmatmul.msk.f32.gmra.mxu0 %vm1415_vm5, %v6018_v58 }
 0x4fa   :  { %6004 = vmatmul.msk.f32.gmra.mxu3 %vm1415_vm5, %v5988_v19  ;;  %v8075_v24 = vpop.f32.mrf.mxu1 }
 0x4fe   :  { %6035 = vmatmul.msk.f32.gmra.mxu0 %vm1415_vm5, %v6019_v61  ;;  %6055 = vmatmul.msk.f32.vlgmr.msrb.gmra.mxu1 %vm1415_vm5, %v6039_v3  ;;  %v8231_v61 = vpop.f32.mrf.mxu2 }
 0x502   :  { %6005 = vmatmul.msk.f32.gmra.mxu3 %vm1415_vm5, %v5989_v43  ;;  %v8089_v2 = vpop.f32.mrf.mxu1 }
 0x506   :  { %6036 = vmatmul.msk.f32.gmra.mxu0 %vm1415_vm5, %v6020_v16  ;;  %6056 = vmatmul.msk.f32.gmra.mxu1 %vm1415_vm5, %v6040_v48 }
 0x50a   :  { %6006 = vmatmul.msk.f32.gmra.mxu3 %vm1415_vm5, %v5990_v20  ;;  %v1618_v20 = vpop.f32.mrf.mxu2 }
 0x50b   :  { %v8103_v51 = vpop.f32.mrf.mxu1 }
 0x50e   :  { %6037 = vmatmul.msk.f32.gmra.mxu0 %vm1415_vm5, %v6021_v54  ;;  %6057 = vmatmul.msk.f32.gmra.mxu1 %vm1415_vm5, %v6041_v53 }
 0x513   :  { %v8113_v1 = vpop.f32.mrf.mxu1 }
 0x514   :  { %10395 = vst [vmem:[#allocation8_spill] sm:$0xff] %v8113_v1 }
 0x515   :  { %v8173_v15 = vpop.f32.mrf.mxu3 }
 0x516   :  { %6038 = vmatmul.msk.f32.gmra.mxu0 %vm1415_vm5, %v6022_v56  ;;  %6058 = vmatmul.msk.f32.gmra.mxu1 %vm1415_vm5, %v6042_v33  ;;  %v8243_v33 = vpop.f32.mrf.mxu2 }
 0x51b   :  { %v8123_v23 = vpop.f32.mrf.mxu1  ;;  %v8175_v5 = vpop.f32.mrf.mxu0 }
 0x51c   :  { %10396 = vst [vmem:[#allocation22_spill] sm:$0xff] %v8123_v23 }
 0x51d   :  { %v8183_v13 = vpop.f32.mrf.mxu3 }
 0x51e   :  { %6059 = vmatmul.msk.f32.gmra.mxu1 %vm1415_vm5, %v6043_v14  ;;  %10397 = vst [vmem:[#allocation26_spill] sm:$0xff] %v8183_v13 }
 0x523   :  { %v8129_v41 = vpop.f32.mrf.mxu1  ;;  %v8185_v10 = vpop.f32.mrf.mxu0 }
 0x524   :  { %10398 = vst [vmem:[#allocation24_spill] sm:$0xff] %v8185_v10 }
 0x525   :  { %v8195_v6 = vpop.f32.mrf.mxu3 }
 0x526   :  { %6060 = vmatmul.msk.f32.gmra.mxu1 %vm1415_vm5, %v6044_v59 }
 0x52b   :  { %v8135_v39 = vpop.f32.mrf.mxu1  ;;  %v8202_v11 = vpop.f32.mrf.mxu0 }
 0x52c   :  { %10399 = vst [vmem:[#allocation25_spill] sm:$0xff] %v8202_v11  ;;  %v1610_v11 = vadd.f32 %v1609_v37, %v8129_v41 }
 0x52d   :  { %v8212_v4 = vpop.f32.mrf.mxu3 }
 0x52e   :  { %6061 = vmatmul.msk.f32.gmra.mxu1 %vm1415_vm5, %v6045_v0  ;;  %10401 = vst [vmem:[#allocation23_spill] sm:$0xff] %v8212_v4 }
 0x533   :  { %v8141_v17 = vpop.f32.mrf.mxu1  ;;  %v8215_v32 = vpop.f32.mrf.mxu0 }
 0x534   :  { %10402 = vst [vmem:[#allocation28_spill] sm:$0xff] %v8215_v32 }
 0x535   :  { %v8221_v35 = vpop.f32.mrf.mxu3 }
 0x536   :  { %6062 = vmatmul.msk.f32.gmra.mxu1 %vm1415_vm5, %v6046_v49  ;;  %10404 = vst [vmem:[#allocation15_spill] sm:$0xff] %v8221_v35  ;;  %v8251_v49 = vpop.f32.mrf.mxu2 }
 0x53b   :  { %v8147_v63 = vpop.f32.mrf.mxu1  ;;  %v8223_v45 = vpop.f32.mrf.mxu0 }
 0x53c   :  { %10405 = vst [vmem:[#allocation27_spill] sm:$0xff] %v8223_v45 }
 0x53d   :  { %v1766_v42 = vpop.f32.mrf.mxu3 }
 0x53e   :  { %6063 = vmatmul.msk.f32.gmra.mxu1 %vm1415_vm5, %v6047_v7 }
 0x543   :  { %v8153_v18 = vpop.f32.mrf.mxu1  ;;  %v1939_v44 = vpop.f32.mrf.mxu0 }
 0x545   :  { %v1769_v40 = vpop.f32.mrf.mxu3 }
 0x546   :  { %6064 = vmatmul.msk.f32.gmra.mxu1 %vm1415_vm5, %v6048_v38 }
 0x54b   :  { %v8159_v47 = vpop.f32.mrf.mxu1  ;;  %v1942_v19 = vpop.f32.mrf.mxu0 }
 0x54d   :  { %v8235_v43 = vpop.f32.mrf.mxu3 }
 0x54e   :  { %6065 = vmatmul.msk.f32.gmra.mxu1 %vm1415_vm5, %v6049_v21 }
 0x553   :  { %v8165_v22 = vpop.f32.mrf.mxu1  ;;  %v8237_v16 = vpop.f32.mrf.mxu0 }
 0x555   :  { %v8239_v54 = vpop.f32.mrf.mxu3 }
 0x556   :  { %6066 = vmatmul.msk.f32.gmra.mxu1 %vm1415_vm5, %v6050_v27  ;;  %v1627_v27 = vpop.f32.mrf.mxu2 }
 0x557   :  { %v1628_v45 = vadd.f32 %v1627_v27, %v8165_v22  ;;  %v1804_v22 = vadd.f32 %v1766_v42, %v1610_v11 }
 0x55b   :  { %v1517_v31 = vpop.f32.mrf.mxu1  ;;  %v8241_v53 = vpop.f32.mrf.mxu0 }
 0x55d   :  { %v8245_v14 = vpop.f32.mrf.mxu3 }
 0x55e   :  { %6067 = vmatmul.msk.f32.gmra.mxu1 %vm1415_vm5, %v6051_v9  ;;  %v1630_v55 = vpop.f32.mrf.mxu2 }
 0x55f   :  { %v1631_v4 = vadd.f32 %v1630_v55, %v1517_v31 }
 0x563   :  { %v8187_v57 = vpop.f32.mrf.mxu1  ;;  %v8247_v59 = vpop.f32.mrf.mxu0 }
 0x564   :  { %10410 = vst [vmem:[#allocation18_spill] sm:$0xff] %v8247_v59 }
 0x565   :  { %v8253_v7 = vpop.f32.mrf.mxu3 }
 0x566   :  { %6068 = vmatmul.msk.f32.gmra.mxu1 %vm1415_vm5, %v6052_v29 }
 0x56b   :  { %v8197_v8 = vpop.f32.mrf.mxu1  ;;  %v8257_v21 = vpop.f32.mrf.mxu0 }
 0x56d   :  { %v1784_v29 = vpop.f32.mrf.mxu3 }
 0x56e   :  { %6069 = vmatmul.msk.f32.gmra.mxu1 %vm1415_vm5, %v6053_v62  ;;  %v1810_v35 = vadd.f32 %v1784_v29, %v1628_v45 }
 0x573   :  { %v8207_v60 = vpop.f32.mrf.mxu1  ;;  %v1957_v62 = vpop.f32.mrf.mxu0 }
 0x576   :  { %6070 = vmatmul.msk.f32.gmra.mxu1 %vm1415_vm5, %v6054_v12 }
 0x57b   :  { %v8217_v30 = vpop.f32.mrf.mxu1 }
 0x583   :  { %v8225_v25 = vpop.f32.mrf.mxu1 }
 0x584   :  { %10406 = vst [vmem:[#allocation6_spill] sm:$0xff] %v8225_v25  ;;  %v1633_v25 = vpop.f32.mrf.mxu2 }
 0x58b   :  { %v8227_v46 = vpop.f32.mrf.mxu1 }
 0x58c   :  { %10407 = vst [vmem:[#allocation13_spill] sm:$0xff] %v8227_v46  ;;  %v1983_v46 = vadd.f32 %v1957_v62, %v1810_v35 }
 0x593   :  { %v8229_v58 = vpop.f32.mrf.mxu1 }
 0x594   :  { %10408 = vst [vmem:[#allocation19_spill] sm:$0xff] %v8229_v58  ;;  %v1787_v58 = vpop.f32.mrf.mxu3 }
 0x595   :  { %v1811_v36 = vadd.f32 %v1787_v58, %v1631_v4  ;;  %v1636_v4 = vpop.f32.mrf.mxu2 }
 0x596   :  { %v1637_v41 = vadd.f32 %v1636_v4, %v8197_v8  ;;  %v1619_v8 = vadd.f32 %v1618_v20, %v8147_v63 }
 0x59b   :  { %v8233_v3 = vpop.f32.mrf.mxu1 }
 0x59c   :  { %10409 = vst [vmem:[#allocation16_spill] sm:$0xff] %v8233_v3  ;;  %v1960_v3 = vpop.f32.mrf.mxu0  ;;  %v1790_v1 = vpop.f32.mrf.mxu3 }
 0x59d   :  { %v1984_v10 = vadd.f32 %v1960_v3, %v1811_v36  ;;  %v1977_v36 = vadd.f32 %v1939_v44, %v1804_v22 }
 0x5a3   :  { %v2112_v48 = vpop.f32.mrf.mxu1 }
 0x5a4   :  { %v1963_v34 = vpop.f32.mrf.mxu0  ;;  %v1793_v45 = vpop.f32.mrf.mxu3 }
 0x5a5   :  { %v1813_v42 = vadd.f32 %v1793_v45, %v1637_v41  ;;  %v10424_v41 = vld [vmem:[#allocation15_spill] sm:$0xff] }
 0x5ab   :  { %v2115_v56 = vpop.f32.mrf.mxu1 }
 0x5b3   :  { %v8249_v0 = vpop.f32.mrf.mxu1 }
 0x5bb   :  { %v8255_v38 = vpop.f32.mrf.mxu1 }
 0x5c3   :  { %v8259_v9 = vpop.f32.mrf.mxu1 }
 0x5c4   :  { %10411 = vst [vmem:[#allocation14_spill] sm:$0xff] %v8259_v9  ;;  %v1613_v9 = vadd.f32 %v1612_v52, %v8135_v39 }
 0x5c6   :  { %v1805_v13 = vadd.f32 %v1769_v40, %v1613_v9  ;;  %v1639_v40 = vpop.f32.mrf.mxu2 }
 0x5c8   :  { %v1978_v31 = vadd.f32 %v1942_v19, %v1805_v13  ;;  %v1595_v13 = vadd.f32 %v8170_v50, %v8075_v24  ;;  %v1616_v24 = vadd.f32 %v8231_v61, %v8141_v17  ;;  %v1807_v50 = vadd.f32 %v8239_v54, %v1619_v8  ;;  %v10428_v8 = vld [vmem:[#allocation28_spill] sm:$0xff] }
 0x5c9   :  { %v1625_v17 = vadd.f32 %v8251_v49, %v8159_v47  ;;  %v1598_v47 = vadd.f32 %v8181_v28, %v8089_v2  ;;  %v10415_v2 = vld [vmem:[#allocation18_spill] sm:$0xff] }
 0x5ca   :  { %v8273_v35 = vadd.f32 %v2115_v56, %v1978_v31  ;;  %v1799_v44 = vadd.f32 %v8173_v15, %v1595_v13  ;;  %v1640_v15 = vadd.f32 %v1639_v40, %v8207_v60  ;;  %v1806_v63 = vadd.f32 %v8235_v43, %v1616_v24  ;;  %v10420_v31 = vld [vmem:[#allocation13_spill] sm:$0xff]  ;;  %v10425_v13 = vld [vmem:[#allocation6_spill] sm:$0xff]  ;;  %v10427_v40 = vld [vmem:[#allocation27_spill] sm:$0xff] }
 0x5cb   :  { %v8261_v12 = vpop.f32.mrf.mxu1  ;;  %v1601_v43 = vadd.f32 %v8193_v26, %v8103_v51  ;;  %v1809_v56 = vadd.f32 %v8253_v7, %v1625_v17  ;;  %v10414_v7 = vld [vmem:[#allocation25_spill] sm:$0xff]  ;;  %v2173_v17 = vld [vmem:[%s10330_s8 + $0x18] sm:$0xff] }
 0x5cc   :  { %10412 = vst [vmem:[#allocation21_spill] sm:$0xff] %v8261_v12  ;;  %v1979_v60 = vadd.f32 %v8237_v16, %v1806_v63  ;;  %v2172_v16 = vld [vmem:[%s10330_s8 + $0x10] sm:$0xff]  ;;  %v2171_v63 = vld [vmem:[%s10330_s8 + $0x8] sm:$0xff] }
 0x5cd   :  { %v1801_v49 = vadd.f32 %v8195_v6, %v1601_v43  ;;  %v1982_v26 = vadd.f32 %v8257_v21, %v1809_v56  ;;  %v10417_v6 = vld [vmem:[#allocation22_spill] sm:$0xff] }
 0x5ce   :  { %v8317_v27 = vadd.f32 %v8249_v0, %v1979_v60  ;;  %v2177_v60 = vld [vmem:[%s10330_s8 + $0x38] sm:$0xff] }
 0x5d3   :  { %v2130_v32 = vpop.f32.mrf.mxu1  ;;  %v10416_v29 = vld [vmem:[#allocation21_spill] sm:$0xff] }
 0x5d4   :  { %v8265_v59 = vadd.f32 %v2130_v32, %v1983_v46  ;;  %v8275_v32 = vadd.f32 %v2112_v48, %v1977_v36  ;;  %v1980_v48 = vadd.f32 %v8241_v53, %v1807_v50  ;;  %v1622_v53 = vadd.f32 %v8243_v33, %v8153_v18  ;;  %v10413_v33 = vld [vmem:[#allocation26_spill] sm:$0xff] }
 0x5d5   :  { %v1800_v0 = vadd.f32 %v10413_v33, %v1598_v47  ;;  %v8334_v62 = vadd.f32 %v10416_v29, %v1982_v26  ;;  %v10421_v36 = vld [vmem:[#allocation14_spill] sm:$0xff] }
 0x5d6   :  { %v6676_v37 = vpack.i.bf16 %v8275_v32, %v8273_v35  ;;  %v8309_v61 = vadd.f32 %v8255_v38, %v1980_v48  ;;  %v1808_v51 = vadd.f32 %v8245_v14, %v1622_v53  ;;  %v1974_v38 = vadd.f32 %v10414_v7, %v1801_v49  ;;  %v10418_v14 = vld [vmem:[#allocation7_spill] sm:$0xff]  ;;  %v2170_v48 = vld [vmem:[%s10330_s8] sm:$0xff] }
 0x5d7   :  { %v1607_v21 = vadd.f32 %v10418_v14, %v10417_v6 }
 0x5d8   :  { %v6671_v18 = vpack.i.bf16 %v8317_v27, %v8309_v61  ;;  %v1981_v28 = vadd.f32 %v10415_v2, %v1808_v51  ;;  %v8341_v4 = vadd.f32 %v10420_v31, %v1974_v38 }
 0x5da   :  { %v8344_v45 = vadd.f32 %v10421_v36, %v1981_v28 }
 0x5db   :  { %v2133_v23 = vpop.f32.mrf.mxu1 }
 0x5dc   :  { %v8267_v12 = vadd.f32 %v2133_v23, %v1984_v10  ;;  %v1966_v23 = vpop.f32.mrf.mxu0  ;;  %v1634_v10 = vadd.f32 %v1633_v25, %v8187_v57  ;;  %v1972_v57 = vadd.f32 %v8175_v5, %v1799_v44  ;;  %v2175_v44 = vld [vmem:[%s10330_s8 + $0x28] sm:$0xff] }
 0x5dd   :  { %v1986_v52 = vadd.f32 %v1966_v23, %v1813_v42  ;;  %v10423_v23 = vld [vmem:[#allocation9_spill] sm:$0xff]  ;;  %v6666_v42 = vpack.i.bf16 %v8344_v45, %v8334_v62 }
 0x5de   :  { %v6661_v55 = vpack.i.bf16 %v8265_v59, %v8267_v12  ;;  %v1812_v11 = vadd.f32 %v1790_v1, %v1634_v10  ;;  %v1796_v1 = vpop.f32.mrf.mxu3 }
 0x5df   :  { %v1814_v20 = vadd.f32 %v1796_v1, %v1640_v15  ;;  %v10429_v1 = vld [vmem:[#allocation16_spill] sm:$0xff]  ;;  %v10430_v15 = vld [vmem:[#allocation19_spill] sm:$0xff] }
 0x5e0   :  { %6662 = vrot.lane.b32.xlu0 %v6661_v55, %s6946_s24  ;;  %v1985_v46 = vadd.f32 %v1963_v34, %v1812_v11  ;;  %v8296_v34 = vadd.f32 %v8217_v30, %v1972_v57  ;;  %v10419_v55 = vld [vmem:[#allocation24_spill] sm:$0xff] }
 0x5e1   :  { %v1973_v22 = vadd.f32 %v10419_v55, %v1800_v0 }
 0x5e3   :  { %v2136_v39 = vpop.f32.mrf.mxu1  ;;  %v8350_v11 = vadd.f32 %v10425_v13, %v1973_v22 }
 0x5e4   :  { %v8287_v25 = vadd.f32 %v2136_v39, %v1985_v46  ;;  %v1969_v3 = vpop.f32.mrf.mxu0  ;;  %v10422_v39 = vld [vmem:[#allocation8_spill] sm:$0xff]  ;;  %v10426_v46 = vld [vmem:[#allocation23_spill] sm:$0xff] }
 0x5e5   :  { %v1987_v30 = vadd.f32 %v1969_v3, %v1814_v20  ;;  %v1604_v10 = vadd.f32 %v10423_v23, %v10422_v39  ;;  %v6686_v57 = vpack.i.bf16 %v8350_v11, %v8341_v4  ;;  %v2174_v20 = vld [vmem:[%s10330_s8 + $0x20] sm:$0xff] }
 0x5e8   :  { %6677 = vrot.lane.b32.xlu0 %v6676_v37, %s6946_s24  ;;  %v1803_v37 = vadd.f32 %v10424_v41, %v1607_v21 }
 0x5eb   :  { %v2139_v58 = vpop.f32.mrf.mxu1 }
 0x5ec   :  { %v8289_v19 = vadd.f32 %v2139_v58, %v1986_v52  ;;  %v1802_v52 = vadd.f32 %v10426_v46, %v1604_v10  ;;  %v1976_v58 = vadd.f32 %v10427_v40, %v1803_v37 }
 0x5ee   :  { %v6656_v5 = vpack.i.bf16 %v8287_v25, %v8289_v19  ;;  %v1975_v24 = vadd.f32 %v10428_v8, %v1802_v52  ;;  %v8364_v50 = vadd.f32 %v10429_v1, %v1976_v58 }
 0x5f0   :  { %2194 = vrot.lane.b32.xlu0 %v8296_v34, %s6946_s24  ;;  %6657 = vrot.lane.b32.xlu2 %v6656_v5, %s6946_s24  ;;  %v8368_v5 = vadd.f32 %v10430_v15, %v1975_v24 }
 0x5f2   :  { %v6681_v3 = vpack.i.bf16 %v8368_v5, %v8364_v50 }
 0x5f3   :  { %v2142_v54 = vpop.f32.mrf.mxu1 }
 0x5f4   :  { %v2160_v9 = vadd.f32 %v2142_v54, %v1987_v30  ;;  %v2176_v30 = vld [vmem:[%s10330_s8 + $0x30] sm:$0xff] }
 0x5f6   :  { %2224 = vrot.lane.b32.xlu1 %v2160_v9, %s6946_s24 }
 0x5f8   :  { %2418 = vperm.xlu0 %6575, %v2172_v16   ;;  %6672 = vrot.lane.b32.xlu2 %v6671_v18, %s6946_s24 }
 0x5fe   :  { %6667 = vrot.lane.b32.xlu1 %v6666_v42, %s6946_s24 }
 0x600   :  { %2433 = vperm.xlu0 %6575, %v2175_v44   ;;  %6687 = vrot.lane.b32.xlu2 %v6686_v57, %s6946_s24 }
 0x606   :  { %6682 = vrot.lane.b32.xlu1 %v6681_v3, %s6946_s24 }
 0x608   :  { %2413 = vperm.xlu2 %6574, %v2171_v63  }
 0x60e   :  { %2408 = vperm.xlu1 %6573, %v2170_v48  }
 0x610   :  { %2428 = vperm.xlu2 %6574, %v2174_v20  }
 0x616   :  { %2423 = vperm.xlu1 %6573, %v2173_v17  }
 0x618   :  { %2443 = vperm.xlu2 %6574, %v2177_v60  }
 0x61e   :  { %2438 = vperm.xlu1 %6573, %v2176_v30  }
 0x64a   :  { %v6658_v43 = vpop.permute.xlu2 %6657 }
 0x64b   :  { %v6660_v54 = vunpack.i.h.bf16 %v6658_v43  ;;  %v6659_v53 = vunpack.i.l.bf16 %v6658_v43 }
 0x64d   :  { %v2255_v16 = vmax.f32 %v8287_v25, %v6660_v54  ;;  %v2256_v49 = vmax.f32 %v8289_v19, %v6659_v53 }
 0x64f   :  { %v2299_v33 = vrot.slane %v2255_v16, 1  ;;  %v2301_v0 = vrot.slane %v2256_v49, 1 }
 0x651   :  { %v2302_v21 = vsel %vm1026_vm2, %v2299_v33, %v2301_v0 }
 0x652   :  { %v6663_v56 = vpop.permute.xlu0 %6662  ;;  %v6673_v2 = vpop.permute.xlu2 %6672  ;;  %v2334_v23 = vmax.f32 %v2255_v16, %v2302_v21 }
 0x653   :  { %v6664_v47 = vunpack.i.l.bf16 %v6663_v56  ;;  %v6665_v51 = vunpack.i.h.bf16 %v6663_v56  ;;  %v6675_v55 = vunpack.i.h.bf16 %v6673_v2  ;;  %v6674_v19 = vunpack.i.l.bf16 %v6673_v2 }
 0x655   :  { %v2254_v26 = vmax.f32 %v8267_v12, %v6664_v47  ;;  %v2253_v38 = vmax.f32 %v8265_v59, %v6665_v51  ;;  %v2249_v10 = vmax.f32 %v8317_v27, %v6675_v55  ;;  %v2250_v41 = vmax.f32 %v8309_v61, %v6674_v19  ;;  %v2161_v19 = vld [vmem:[%s10327_s5] sm:$0xff] }
 0x657   :  { %v2297_v29 = vrot.slane %v2254_v26, 1  ;;  %v2295_v25 = vrot.slane %v2253_v38, 1  ;;  %v2287_v8 = vrot.slane %v2249_v10, 1  ;;  %v2289_v24 = vrot.slane %v2250_v41, 1 }
 0x659   :  { %v2298_v37 = vsel %vm1026_vm2, %v2295_v25, %v2297_v29  ;;  %v2290_v60 = vsel %vm1026_vm2, %v2287_v8, %v2289_v24 }
 0x65a   :  { %v6678_v22 = vpop.permute.xlu0 %6677  ;;  %v2332_v57 = vmax.f32 %v2253_v38, %v2298_v37  ;;  %v6688_v61 = vpop.permute.xlu2 %6687 }
 0x65b   :  { %v6679_v36 = vunpack.i.l.bf16 %v6678_v22  ;;  %v6680_v13 = vunpack.i.h.bf16 %v6678_v22  ;;  %v6690_v20 = vunpack.i.h.bf16 %v6688_v61  ;;  %v2162_v22 = vld [vmem:[%s10327_s5 + $0x8] sm:$0xff] }
 0x65d   :  { %v2248_v52 = vmax.f32 %v8273_v35, %v6679_v36  ;;  %v2247_v27 = vmax.f32 %v8275_v32, %v6680_v13  ;;  %v6689_v32 = vunpack.i.l.bf16 %v6688_v61  ;;  %v2243_v51 = vmax.f32 %v8350_v11, %v6690_v20  ;;  %v2166_v36 = vld [vmem:[%s10327_s5 + $0x28] sm:$0xff] }
 0x65e   :  { %v10431_v20 = vmov 0  }
 0x65f   :  { %v2285_v3 = vrot.slane %v2248_v52, 1  ;;  %v2283_v30 = vrot.slane %v2247_v27, 1  ;;  %v2275_v38 = vrot.slane %v2243_v51, 1 }
 0x661   :  { %v2288_v47 = vsel %vm1026_vm2, %v2285_v3, %v2287_v8 }
 0x662   :  { %v2195_v16 = vpop.permute.xlu0 %2194 }
 0x668   :  { %v2225_v18 = vpop.permute.xlu1 %2224 }
 0x669   :  { %v2257_v7 = vmax.f32 %v2160_v9, %v2225_v18  ;;  %v2300_v9 = vsel %vm1026_vm2, %v2297_v29, %v2299_v33  ;;  %v2286_v33 = vsel %vm1026_vm2, %v2283_v30, %v2285_v3 }
 0x66a   :  { %v2333_v46 = vmax.f32 %v2254_v26, %v2300_v9  ;;  %v2244_v26 = vmax.f32 %v8341_v4, %v6689_v32  ;;  %v2165_v9 = vld [vmem:[%s10327_s5 + $0x20] sm:$0xff] }
 0x66b   :  { %v2303_v28 = vrot.slane %v2257_v7, 1 }
 0x66c   :  { %v2277_v2 = vrot.slane %v2244_v26, 1 }
 0x66d   :  { %v2336_v6 = vmax.f32 %v2257_v7, %v2303_v28  ;;  %v2304_v14 = vsel %vm1026_vm2, %v2301_v0, %v2303_v28  ;;  %v2327_v0 = vmax.f32 %v2248_v52, %v2288_v47  ;;  %v2326_v7 = vmax.f32 %v2247_v27, %v2286_v33  ;;  %v2414_v27 = vpop.permute.xlu2 %2413 }
 0x66e   :  { %v2335_v31 = vmax.f32 %v2256_v49, %v2304_v14  ;;  %v2328_v49 = vmax.f32 %v2249_v10, %v2290_v60  ;;  %v2278_v14 = vsel %vm1026_vm2, %v2275_v38, %v2277_v2 }
 0x66f   :  { %6071 = vmatpush.msk.msrb.mxu2 %vm1026_vm2, %v2336_v6 }
 0x670   :  { %v6668_v12 = vpop.permute.xlu1 %6667 }
 0x671   :  { %v6670_v59 = vunpack.i.h.bf16 %v6668_v12  ;;  %v6669_v39 = vunpack.i.l.bf16 %v6668_v12  ;;  %2366 = vmatpush.msrb.mxu2 %v2335_v31  ;;  %v2163_v31 = vld [vmem:[%s10327_s5 + $0x10] sm:$0xff]  ;;  %v2164_v12 = vld [vmem:[%s10327_s5 + $0x18] sm:$0xff] }
 0x673   :  { %v2251_v42 = vmax.f32 %v8344_v45, %v6670_v59  ;;  %v2252_v44 = vmax.f32 %v8334_v62, %v6669_v39  ;;  %2367 = vmatpush.msrb.mxu2 %v2334_v23  ;;  %v2167_v59 = vld [vmem:[%s10327_s5 + $0x30] sm:$0xff]  ;;  %v2168_v39 = vld [vmem:[%s10327_s5 + $0x38] sm:$0xff]  ;;  %v2169_v23 = vld [vmem:[%s10328_s6] sm:$0x7f] }
 0x674   :  { %6080 = vmatpush.msk.msra.mxu3 %vm1026_vm2, %v2169_v23 }
 0x675   :  { %v2291_v40 = vrot.slane %v2251_v42, 1  ;;  %v2293_v58 = vrot.slane %v2252_v44, 1  ;;  %2368 = vmatpush.msrb.mxu2 %v2333_v46 }
 0x677   :  { %2369 = vmatpush.msrb.mxu2 %v2332_v57  ;;  %v2296_v1 = vsel %vm1026_vm2, %v2293_v58, %v2295_v25  ;;  %v2294_v45 = vsel %vm1026_vm2, %v2291_v40, %v2293_v58  ;;  %v2292_v35 = vsel %vm1026_vm2, %v2289_v24, %v2291_v40  ;;  %v2322_v25 = vmax.f32 %v2243_v51, %v2278_v14 }
 0x678   :  { %v6683_v15 = vpop.permute.xlu1 %6682  ;;  %v2331_v62 = vmax.f32 %v2252_v44, %v2296_v1  ;;  %v2330_v17 = vmax.f32 %v2251_v42, %v2294_v45  ;;  %v2329_v53 = vmax.f32 %v2250_v41, %v2292_v35  ;;  %v10344_v40 = vmov 2  }
 0x679   :  { %v6685_v63 = vunpack.i.h.bf16 %v6683_v15  ;;  %v6684_v48 = vunpack.i.l.bf16 %v6683_v15  ;;  %6692 = vset.pattern.permute.xlu2 %v10344_v40  ;;  %v10342_v15 = vmov 3  }
 0x67a   :  { %2370 = vmatpush.msrb.mxu2 %v2331_v62  ;;  %v10340_v62 = vmov 1  }
 0x67b   :  { %v2245_v43 = vmax.f32 %v8368_v5, %v6685_v63  ;;  %v2246_v54 = vmax.f32 %v8364_v50, %v6684_v48  ;;  %v2242_v5 = vmax.f32 %v8296_v34, %v2195_v16  ;;  %v2419_v63 = vpop.permute.xlu0 %2418 }
 0x67c   :  { %2371 = vmatpush.msrb.mxu2 %v2330_v17 }
 0x67d   :  { %v2281_v56 = vrot.slane %v2246_v54, 1  ;;  %v2279_v18 = vrot.slane %v2245_v43, 1  ;;  %v2274_v11 = vrot.slane %v2242_v5, 1 }
 0x67e   :  { %2372 = vmatpush.msrb.mxu2 %v2329_v53 }
 0x67f   :  { %v2284_v50 = vsel %vm1026_vm2, %v2281_v56, %v2283_v30  ;;  %v2282_v28 = vsel %vm1026_vm2, %v2279_v18, %v2281_v56  ;;  %v2280_v4 = vsel %vm1026_vm2, %v2277_v2, %v2279_v18  ;;  %v2276_v34 = vsel %vm1026_vm2, %v2274_v11, %v2275_v38  ;;  %v8501_v11 = vld [vmem:[%s10322_s0 + $0x30] sm:$0xff] }
 0x680   :  { %2373 = vmatpush.msrb.mxu2 %v2328_v49  ;;  %v2325_v29 = vmax.f32 %v2246_v54, %v2284_v50  ;;  %v2324_v6 = vmax.f32 %v2245_v43, %v2282_v28  ;;  %v2323_v21 = vmax.f32 %v2244_v26, %v2280_v4  ;;  %v2321_v55 = vmax.f32 %v2242_v5, %v2276_v34  ;;  %v2409_v58 = vpop.permute.xlu1 %2408  ;;  %v2429_v49 = vpop.permute.xlu2 %2428  ;;  %v8518_v34 = vld [vmem:[%s10322_s0 + $0x20] sm:$0xff] }
 0x682   :  { %2374 = vmatpush.msrb.mxu2 %v2327_v0 }
 0x683   :  { %v2434_v18 = vpop.permute.xlu0 %2433 }
 0x684   :  { %2375 = vmatpush.msrb.mxu2 %v2326_v7 }
 0x686   :  { %2376 = vmatpush.msrb.mxu2 %v2325_v29  ;;  %v8496_v29 = vld [vmem:[%s10322_s0 + $0x28] sm:$0xff] }
 0x687   :  { %v8505_v4 = vpack.i.bf16 %v8496_v29, %v8501_v11 }
 0x688   :  { %2377 = vmatpush.msrb.mxu2 %v2324_v6  ;;  %v2424_v30 = vpop.permute.xlu1 %2423  ;;  %v2444_v50 = vpop.permute.xlu2 %2443 }
 0x68a   :  { %2378 = vmatpush.msrb.mxu2 %v2323_v21  ;;  %v2524_v21 = vld [vmem:[%s10331_s9] sm:$0xff] }
 0x68c   :  { %2379 = vmatpush.msrb.mxu2 %v2322_v25 }
 0x68e   :  { %2380 = vmatpush.msrb.mxu2 %v2321_v55  ;;  %v2526_v55 = vld [vmem:[%s10331_s9 + $0x10] sm:$0xff] }
 0x68f   :  { %6072 = vmatmul.msk.f32.vlgmr.msrb.gmra.mxu2 %vm2337_vm6, %v2161_v19  ;;  %v2525_v19 = vld [vmem:[%s10331_s9 + $0x8] sm:$0xff] }
 0x690   :  { %v2439_v53 = vpop.permute.xlu1 %2438 }
 0x697   :  { %6073 = vmatmul.msk.f32.gmra.mxu2 %vm2337_vm6, %v2162_v22 }
 0x69f   :  { %6074 = vmatmul.msk.f32.gmra.mxu2 %vm2337_vm6, %v2163_v31 }
 0x6a7   :  { %6075 = vmatmul.msk.f32.gmra.mxu2 %vm2337_vm6, %v2164_v12 }
 0x6af   :  { %6076 = vmatmul.msk.f32.gmra.mxu2 %vm2337_vm6, %v2165_v9 }
 0x6b7   :  { %6077 = vmatmul.msk.f32.gmra.mxu2 %vm2337_vm6, %v2166_v36 }
 0x6bf   :  { %6078 = vmatmul.msk.f32.gmra.mxu2 %vm2337_vm6, %v2167_v59 }
 0x6c7   :  { %6079 = vmatmul.msk.f32.gmra.mxu2 %vm2337_vm6, %v2168_v39 }
 0x712   :  { %v2382_v10 = vpop.f32.mrf.mxu2 }
 0x713   :  { %6081 = vmatmul.msk.f32.vlgmr.msra.gmra.mxu3 %vm2446_vm7, %v2382_v10  ;;  %v8534_v10 = vld [vmem:[%s10322_s0 + $0x38] sm:$0xf] }
 0x71a   :  { %v2385_v41 = vpop.f32.mrf.mxu2 }
 0x71b   :  { %6082 = vmatmul.msk.f32.gmra.mxu3 %vm2446_vm7, %v2385_v41 }
 0x722   :  { %v2388_v37 = vpop.f32.mrf.mxu2 }
 0x723   :  { %6083 = vmatmul.msk.f32.gmra.mxu3 %vm2446_vm7, %v2388_v37 }
 0x72a   :  { %v2391_v13 = vpop.f32.mrf.mxu2 }
 0x72b   :  { %6084 = vmatmul.msk.f32.gmra.mxu3 %vm2446_vm7, %v2391_v13 }
 0x732   :  { %v2394_v42 = vpop.f32.mrf.mxu2 }
 0x733   :  { %6085 = vmatmul.msk.f32.gmra.mxu3 %vm2446_vm7, %v2394_v42  ;;  %v6090_v42 = vld [vmem:[%s10331_s9 + $0x48] sm:$0xff] }
 0x73a   :  { %v2397_v44 = vpop.f32.mrf.mxu2 }
 0x73b   :  { %6086 = vmatmul.msk.f32.gmra.mxu3 %vm2446_vm7, %v2397_v44 }
 0x742   :  { %v2400_v46 = vpop.f32.mrf.mxu2 }
 0x743   :  { %6087 = vmatmul.msk.f32.gmra.mxu3 %vm2446_vm7, %v2400_v46 }
 0x74a   :  { %v2403_v52 = vpop.f32.mrf.mxu2 }
 0x74b   :  { %6088 = vmatmul.msk.f32.gmra.mxu3 %vm2446_vm7, %v2403_v52  ;;  %v6089_v52 = vld [vmem:[%s10331_s9 + $0x40] sm:$0xff] }
 0x796   :  { %v2491_v57 = vpop.f32.mrf.mxu3 }
 0x797   :  { %v2492_v8 = vadd.f32 %v2491_v57, %v2409_v58 }
 0x799   :  { %v2515_v24 = vmax.f32 %v2492_v8, 0.0  ;;  %v6105_v8 = vld [vmem:[%s10331_s9 + $0xc0] sm:$0xff] }
 0x79b   :  { %2684 = vperm.xlu2 %6692, %v2515_v24   ;;  %2534 = vperm.xlu0 %6575, %v2515_v24  }
 0x79e   :  { %v2494_v61 = vpop.f32.mrf.mxu3 }
 0x79f   :  { %v2495_v1 = vadd.f32 %v2494_v61, %v2414_v27  ;;  %v6107_v61 = vld [vmem:[%s10331_s9 + $0xd0] sm:$0xff] }
 0x7a1   :  { %v2516_v45 = vmax.f32 %v2495_v1, 0.0 }
 0x7a3   :  { %6693 = vset.pattern.permute.xlu2 %v10342_v15  ;;  %6691 = vset.pattern.permute.xlu0 %v10340_v62 }
 0x7a4   :  { %2539 = vperm.xlu1 %6573, %v2516_v45   ;;  %2755 = vperm.xlu2 %6693, %v2515_v24  }
 0x7a5   :  { %2613 = vperm.xlu0 %6691, %v2515_v24   ;;  %v6091_v24 = vld [vmem:[%s10331_s9 + $0x50] sm:$0xff] }
 0x7a6   :  { %v2497_v3 = vpop.f32.mrf.mxu3 }
 0x7a7   :  { %v2498_v48 = vadd.f32 %v2497_v3, %v2419_v63  ;;  %v6106_v3 = vld [vmem:[%s10331_s9 + $0xc8] sm:$0xff] }
 0x7a9   :  { %v2517_v35 = vmax.f32 %v2498_v48, 0.0 }
 0x7ac   :  { %6694 = vset.pattern.permute.xlu1 %v10340_v62  ;;  %6697 = vset.pattern.permute.xlu2 %v10431_v20 }
 0x7ad   :  { %6695 = vset.pattern.permute.xlu0 %v10344_v40  ;;  %2617 = vperm.xlu1 %6694, %v2516_v45  }
 0x7ae   :  { %2688 = vperm.xlu0 %6695, %v2516_v45   ;;  %2544 = vperm.xlu2 %6697, %v2517_v35   ;;  %v2500_v17 = vpop.f32.mrf.mxu3 }
 0x7af   :  { %v2501_v32 = vadd.f32 %v2500_v17, %v2424_v30 }
 0x7b1   :  { %v2518_v43 = vmax.f32 %v2501_v32, 0.0 }
 0x7b5   :  { %2621 = vperm.xlu1 %6694, %v2517_v35  }
 0x7b6   :  { %6696 = vset.pattern.permute.xlu0 %v10342_v15  ;;  %6699 = vset.pattern.permute.xlu2 %v10342_v15  ;;  %v2503_v60 = vpop.f32.mrf.mxu3 }
 0x7b7   :  { %2759 = vperm.xlu0 %6696, %v2516_v45   ;;  %2763 = vperm.xlu2 %6699, %v2517_v35   ;;  %v2504_v51 = vadd.f32 %v2503_v60, %v2429_v49 }
 0x7b9   :  { %v2519_v26 = vmax.f32 %v2504_v51, 0.0 }
 0x7bd   :  { %6698 = vset.pattern.permute.xlu1 %v10344_v40 }
 0x7be   :  { %2692 = vperm.xlu1 %6698, %v2517_v35   ;;  %v2506_v54 = vpop.f32.mrf.mxu3 }
 0x7bf   :  { %6700 = vset.pattern.permute.xlu2 %v10431_v20  ;;  %6708 = vset.pattern.permute.xlu0 %v10431_v20  ;;  %v2507_v33 = vadd.f32 %v2506_v54, %v2434_v18 }
 0x7c0   :  { %2549 = vperm.xlu2 %6700, %v2518_v43  }
 0x7c1   :  { %v2520_v0 = vmax.f32 %v2507_v33, 0.0 }
 0x7c6   :  { %2696 = vperm.xlu1 %6698, %v2518_v43   ;;  %v2509_v56 = vpop.f32.mrf.mxu3 }
 0x7c7   :  { %v2510_v47 = vadd.f32 %v2509_v56, %v2439_v53 }
 0x7c8   :  { %6701 = vset.pattern.permute.xlu2 %v10340_v62 }
 0x7c9   :  { %v2521_v16 = vmax.f32 %v2510_v47, 0.0  ;;  %2625 = vperm.xlu2 %6701, %v2518_v43  }
 0x7cb   :  { %2564 = vperm.xlu0 %6708, %v2521_v16  }
 0x7ce   :  { %6702 = vset.pattern.permute.xlu1 %v10342_v15  ;;  %v2512_v5 = vpop.f32.mrf.mxu3 }
 0x7cf   :  { %2767 = vperm.xlu1 %6702, %v2518_v43   ;;  %v2513_v7 = vadd.f32 %v2512_v5, %v2444_v50 }
 0x7d1   :  { %2629 = vperm.xlu2 %6701, %v2519_v26   ;;  %v2522_v38 = vmax.f32 %v2513_v7, 0.0  ;;  %v2527_v7 = vld [vmem:[%s10331_s9 + $0x18] sm:$0xff] }
 0x7d3   :  { %6709 = vset.pattern.permute.xlu0 %v10340_v62 }
 0x7d4   :  { %2637 = vperm.xlu0 %6709, %v2521_v16  }
 0x7d7   :  { %6703 = vset.pattern.permute.xlu1 %v10431_v20 }
 0x7d8   :  { %2554 = vperm.xlu1 %6703, %v2519_v26  }
 0x7d9   :  { %6704 = vset.pattern.permute.xlu2 %v10344_v40 }
 0x7da   :  { %2700 = vperm.xlu2 %6704, %v2519_v26  }
 0x7dc   :  { %6710 = vset.pattern.permute.xlu0 %v10342_v15 }
 0x7dd   :  { %2775 = vperm.xlu0 %6710, %v2520_v0  }
 0x7e0   :  { %2559 = vperm.xlu1 %6703, %v2520_v0  }
 0x7e2   :  { %6705 = vset.pattern.permute.xlu2 %v10342_v15 }
 0x7e3   :  { %2771 = vperm.xlu2 %6705, %v2519_v26  }
 0x7e5   :  { %6777 = vset.pattern.permute.xlu0 %v10431_v20 }
 0x7e6   :  { %6718 = vrot.lane.b32.xlu0 %v8505_v4, %s6946_s24 }
 0x7e8   :  { %6706 = vset.pattern.permute.xlu1 %v10340_v62 }
 0x7e9   :  { %2633 = vperm.xlu1 %6706, %v2520_v0  }
 0x7eb   :  { %6711 = vset.pattern.permute.xlu2 %v10344_v40 }
 0x7ec   :  { %2708 = vperm.xlu2 %6711, %v2521_v16  }
 0x7ee   :  { %6723 = vrot.lane.b32.xlu0 %v8505_v4, %s6947_s27 }
 0x7f1   :  { %6707 = vset.pattern.permute.xlu1 %v10344_v40 }
 0x7f2   :  { %2704 = vperm.xlu1 %6707, %v2520_v0  }
 0x7f4   :  { %6712 = vset.pattern.permute.xlu2 %v10431_v20 }
 0x7f5   :  { %2569 = vperm.xlu2 %6712, %v2522_v38   ;;  %v8489_v2 = vpop.permute.xlu2 %2684 }
 0x7f6   :  { %6728 = vrot.lane.b32.xlu0 %v8505_v4, %s6948_s28 }
 0x7fa   :  { %6714 = vset.pattern.permute.xlu1 %v10340_v62 }
 0x7fb   :  { %2641 = vperm.xlu1 %6714, %v2522_v38  }
 0x7fd   :  { %6713 = vset.pattern.permute.xlu2 %v10342_v15 }
 0x7fe   :  { %2779 = vperm.xlu2 %6713, %v2521_v16   ;;  %v2756_v28 = vpop.permute.xlu2 %2755  ;;  %3400 = vrot.lane.b32.xlu0 %v8518_v34, %s6948_s28 }
 0x7ff   :  { %v2786_v63 = vmul.f32 %v6105_v8, %v2756_v28  ;;  %v6092_v8 = vld [vmem:[%s10331_s9 + $0x58] sm:$0xff] }
 0x801   :  { %v2794_v53 = vsel %vm2580_vm8, %v2786_v63, 0.0 }
 0x803   :  { %6715 = vset.pattern.permute.xlu1 %v10344_v40 }
 0x804   :  { %2712 = vperm.xlu1 %6715, %v2522_v38  }
 0x806   :  { %6779 = vset.pattern.permute.xlu2 %v10431_v20 }
 0x807   :  { %2949 = vrot.lane.b32.xlu2 %v8534_v10, %s6946_s24 }
 0x808   :  { %v2545_v6 = vpop.permute.xlu2 %2544 }
 0x809   :  { %v2574_v12 = vmul.f32 %v2545_v6, %v2526_v55 }
 0x80b   :  { %v2584_v41 = vsel %vm2580_vm8, %v2574_v12, 0.0  ;;  %v2530_v12 = vld [vmem:[%s10331_s9 + $0x30] sm:$0xff] }
 0x80c   :  { %6716 = vset.pattern.permute.xlu1 %v10342_v15 }
 0x80d   :  { %2783 = vperm.xlu1 %6716, %v2522_v38   ;;  %v2535_v14 = vpop.permute.xlu0 %2534  ;;  %v2528_v38 = vld [vmem:[%s10331_s9 + $0x20] sm:$0xff] }
 0x80e   :  { %v2572_v22 = vmul.f32 %v2535_v14, %v2524_v21  ;;  %v2529_v21 = vld [vmem:[%s10331_s9 + $0x28] sm:$0xff] }
 0x80f   :  { %3232 = vrot.lane.b32.xlu2 %v8534_v10, %s6947_s27 }
 0x810   :  { %v2581_v59 = vsel %vm2580_vm8, %v2572_v22, 0.0 }
 0x811   :  { %v2764_v25 = vpop.permute.xlu2 %2763 }
 0x812   :  { %v2788_v30 = vmul.f32 %v6107_v61, %v2764_v25  ;;  %v6093_v61 = vld [vmem:[%s10331_s9 + $0x60] sm:$0xff] }
 0x814   :  { %v2797_v16 = vsel %vm2580_vm8, %v2788_v30, 0.0  ;;  %v6097_v30 = vld [vmem:[%s10331_s9 + $0x80] sm:$0xff] }
 0x815   :  { %2943 = vrot.lane.b32.xlu1 %v8518_v34, %s6946_s24 }
 0x816   :  { %v2540_v31 = vpop.permute.xlu1 %2539  ;;  %6778 = vset.pattern.permute.xlu1 %v10431_v20 }
 0x817   :  { %v2573_v9 = vmul.f32 %v2540_v31, %v2525_v19  ;;  %v2614_v36 = vpop.permute.xlu0 %2613  ;;  %3406 = vrot.lane.b32.xlu2 %v8534_v10, %s6948_s28 }
 0x818   :  { %v2644_v57 = vmul.f32 %v6089_v52, %v2614_v36  ;;  %v2829_v52 = vld [vmem:[%s10333_s11 + $0x60] sm:$0xff] }
 0x819   :  { %v2582_v39 = vsel %vm2580_vm8, %v2573_v9, 0.0 }
 0x81a   :  { %v2583_v23 = vadd.f32 %v2582_v39, %v2581_v59  ;;  %v2550_v13 = vpop.permute.xlu2 %2549  ;;  %v2652_v48 = vsel %vm2580_vm8, %v2644_v57, 0.0  ;;  %v2831_v39 = vld [vmem:[%s10333_s11 + $0x70] sm:$0xff] }
 0x81b   :  { %v2575_v28 = vmul.f32 %v2550_v13, %v2527_v7  ;;  %2837 = vmatpush.msra.mxu2 %v2831_v39  ;;  %v2715_v7 = vmul.f32 %v6097_v30, %v8489_v2  ;;  %v2823_v2 = vld [vmem:[%s10333_s11 + $0x30] sm:$0xff]  ;;  %v6102_v39 = vld [vmem:[%s10331_s9 + $0xa8] sm:$0xff] }
 0x81c   :  { %v2585_v37 = vadd.f32 %v2584_v41, %v2583_v23  ;;  %v2531_v41 = vld [vmem:[%s10331_s9 + $0x38] sm:$0xff] }
 0x81d   :  { %3226 = vrot.lane.b32.xlu1 %v8518_v34, %s6947_s27  ;;  %v2586_v25 = vsel %vm2580_vm8, %v2575_v28, 0.0 }
 0x81e   :  { %v2587_v31 = vadd.f32 %v2586_v25, %v2585_v37 }
 0x81f   :  { %v2618_v44 = vpop.permute.xlu1 %2617  ;;  %6733 = vrot.lane.b32.xlu2 %v8505_v4, %s6949_s29  ;;  %v6126_v4 = vld [vmem:[%s10323_s1 + $0xc0] sm:$0xff] }
 0x820   :  { %v8544_v46 = vpop.permute.xlu0 %2688  ;;  %v2645_v58 = vmul.f32 %v6090_v42, %v2618_v44  ;;  %v2830_v42 = vld [vmem:[%s10333_s11 + $0x68] sm:$0xff] }
 0x821   :  { %2838 = vmatpush.msra.mxu2 %v2830_v42 }
 0x822   :  { %v2653_v27 = vsel %vm2580_vm8, %v2645_v58, 0.0 }
 0x823   :  { %v2626_v1 = vpop.permute.xlu2 %2625  ;;  %v2654_v17 = vadd.f32 %v2653_v27, %v2652_v48  ;;  %2839 = vmatpush.msra.mxu2 %v2829_v52  ;;  %v2828_v27 = vld [vmem:[%s10333_s11 + $0x58] sm:$0xff] }
 0x824   :  { %v2647_v63 = vmul.f32 %v6092_v8, %v2626_v1  ;;  %v6099_v1 = vld [vmem:[%s10331_s9 + $0x90] sm:$0xff] }
 0x825   :  { %3580 = vrot.lane.b32.xlu1 %v8534_v10, %s6949_s29  ;;  %2840 = vmatpush.msra.mxu2 %v2828_v27  ;;  %v2820_v27 = vld [vmem:[%s10333_s11 + $0x18] sm:$0xff] }
 0x827   :  { %v2622_v45 = vpop.permute.xlu1 %2621 }
 0x828   :  { %v2646_v35 = vmul.f32 %v6091_v24, %v2622_v45  ;;  %v2827_v45 = vld [vmem:[%s10333_s11 + $0x50] sm:$0xff] }
 0x829   :  { %v2760_v60 = vpop.permute.xlu0 %2759  ;;  %2841 = vmatpush.msra.mxu2 %v2827_v45 }
 0x82a   :  { %v2655_v32 = vsel %vm2580_vm8, %v2646_v35, 0.0  ;;  %v2787_v43 = vmul.f32 %v6106_v3, %v2760_v60  ;;  %v6098_v3 = vld [vmem:[%s10331_s9 + $0x88] sm:$0xff] }
 0x82b   :  { %v8568_v54 = vadd.f32 %v2655_v32, %v2654_v17  ;;  %v2630_v26 = vpop.permute.xlu2 %2629  ;;  %v6094_v17 = vld [vmem:[%s10331_s9 + $0x68] sm:$0xff] }
 0x82c   :  { %v2795_v56 = vsel %vm2580_vm8, %v2787_v43, 0.0  ;;  %v2826_v60 = vld [vmem:[%s10333_s11 + $0x48] sm:$0xff]  ;;  %v2648_v32 = vmul.f32 %v6093_v61, %v2630_v26 }
 0x82d   :  { %v2796_v47 = vadd.f32 %v2795_v56, %v2794_v53  ;;  %3574 = vrot.lane.b32.xlu1 %v8518_v34, %s6949_s29  ;;  %2842 = vmatpush.msra.mxu2 %v2826_v60  ;;  %v2716_v53 = vmul.f32 %v6098_v3, %v8544_v46  ;;  %v2825_v56 = vld [vmem:[%s10333_s11 + $0x40] sm:$0xff]  ;;  %v2824_v46 = vld [vmem:[%s10333_s11 + $0x38] sm:$0xff] }
 0x82f   :  { %v8577_v49 = vadd.f32 %v2797_v16, %v2796_v47  ;;  %v2657_v47 = vsel %vm2580_vm8, %v2647_v63, 0.0  ;;  %v6100_v16 = vld [vmem:[%s10331_s9 + $0x98] sm:$0xff]  ;;  %2843 = vmatpush.msra.mxu2 %v2825_v56  ;;  %v2724_v25 = vsel %vm2580_vm8, %v2716_v53, 0.0 }
 0x830   :  { %v2693_v51 = vpop.permute.xlu1 %2692  ;;  %v6108_v63 = vld [vmem:[%s10331_s9 + $0xd8] sm:$0xff] }
 0x831   :  { %v2717_v28 = vmul.f32 %v6099_v1, %v2693_v51  ;;  %2844 = vmatpush.msra.mxu2 %v2824_v46  ;;  %v2723_v51 = vsel %vm2580_vm8, %v2715_v7, 0.0  ;;  %v6104_v7 = vld [vmem:[%s10331_s9 + $0xb8] sm:$0xff] }
 0x833   :  { %2845 = vmatpush.msra.mxu2 %v2823_v2 }
 0x834   :  { %v8581_v33 = vpop.permute.xlu2 %2700 }
 0x838   :  { %v8579_v18 = vpop.permute.xlu1 %2696 }
 0x83d   :  { %v8585_v5 = vpop.permute.xlu2 %2771  ;;  %v2565_v9 = vpop.permute.xlu0 %2564 }
 0x83e   :  { %v2578_v23 = vmul.f32 %v2565_v9, %v2530_v12  ;;  %v2725_v9 = vadd.f32 %v2724_v25, %v2723_v51 }
 0x840   :  { %v2592_v58 = vsel %vm2580_vm8, %v2578_v23, 0.0 }
 0x841   :  { %v8583_v0 = vpop.permute.xlu1 %2767 }
 0x842   :  { %v2789_v53 = vmul.f32 %v6108_v63, %v8583_v0  ;;  %v6110_v0 = vld [vmem:[%s10331_s9 + $0xe8] sm:$0xff] }
 0x846   :  { %v8593_v6 = vpop.permute.xlu2 %2708  ;;  %v2638_v43 = vpop.permute.xlu0 %2637 }
 0x84a   :  { %v2555_v50 = vpop.permute.xlu1 %2554 }
 0x84b   :  { %v2576_v14 = vmul.f32 %v2555_v50, %v2528_v38  ;;  %v2658_v38 = vadd.f32 %v2657_v47, %v8568_v54 }
 0x84d   :  { %v2588_v22 = vsel %vm2580_vm8, %v2576_v14, 0.0 }
 0x84e   :  { %v2589_v59 = vadd.f32 %v2588_v22, %v2587_v31  ;;  %v2726_v31 = vsel %vm2580_vm8, %v2717_v28, 0.0 }
 0x84f   :  { %v2570_v13 = vpop.permute.xlu2 %2569  ;;  %v2727_v42 = vadd.f32 %v2726_v31, %v2725_v9 }
 0x850   :  { %v2579_v57 = vmul.f32 %v2570_v13, %v2531_v41  ;;  %v6096_v13 = vld [vmem:[%s10331_s9 + $0x78] sm:$0xff] }
 0x852   :  { %v2560_v55 = vpop.permute.xlu1 %2559  ;;  %v2594_v48 = vsel %vm2580_vm8, %v2579_v57, 0.0 }
 0x853   :  { %v2577_v19 = vmul.f32 %v2560_v55, %v2529_v21  ;;  %v2659_v21 = vsel %vm2580_vm8, %v2648_v32, 0.0  ;;  %v2718_v55 = vmul.f32 %v6100_v16, %v8579_v18  ;;  %v2822_v18 = vld [vmem:[%s10333_s11 + $0x28] sm:$0xff] }
 0x854   :  { %v2660_v22 = vadd.f32 %v2659_v21, %v2658_v38  ;;  %2846 = vmatpush.msra.mxu2 %v2822_v18  ;;  %v6109_v38 = vld [vmem:[%s10331_s9 + $0xe0] sm:$0xff]  ;;  %v2799_v21 = vsel %vm2580_vm8, %v2789_v53, 0.0 }
 0x855   :  { %v2590_v36 = vsel %vm2580_vm8, %v2577_v19, 0.0  ;;  %v6095_v19 = vld [vmem:[%s10331_s9 + $0x70] sm:$0xff]  ;;  %v2728_v23 = vsel %vm2580_vm8, %v2718_v55, 0.0  ;;  %v2790_v31 = vmul.f32 %v6109_v38, %v8585_v5  ;;  %v2800_v18 = vadd.f32 %v2799_v21, %v8577_v49  ;;  %v2898_v38 = vld [vmem:[%s10323_s1] sm:$0xff] }
 0x856   :  { %v2591_v37 = vadd.f32 %v2590_v36, %v2589_v59  ;;  %v6101_v36 = vld [vmem:[%s10331_s9 + $0xa0] sm:$0xff]  ;;  %v2650_v59 = vmul.f32 %v6095_v19, %v2638_v43  ;;  %v2729_v61 = vadd.f32 %v2728_v23, %v2727_v42  ;;  %v2818_v43 = vld [vmem:[%s10333_s11 + $0x8] sm:$0xff] }
 0x857   :  { %v2719_v52 = vmul.f32 %v6101_v36, %v8581_v33  ;;  %v2819_v33 = vld [vmem:[%s10333_s11 + $0x10] sm:$0xff]  ;;  %v2523_v23 = vld [vmem:[%s10332_s10] sm:$0x1]  ;;  %v2801_v5 = vsel %vm2580_vm8, %v2790_v31, 0.0 }
 0x858   :  { %v2593_v24 = vadd.f32 %v2592_v58, %v2591_v37  ;;  %v2821_v37 = vld [vmem:[%s10333_s11 + $0x20] sm:$0xff]  ;;  %v2780_v57 = vpop.permute.xlu2 %2779  ;;  %v2663_v45 = vsel %vm2580_vm8, %v2650_v59, 0.0 }
 0x859   :  { %2847 = vmatpush.msra.mxu2 %v2821_v37  ;;  %v2730_v60 = vsel %vm2580_vm8, %v2719_v52, 0.0  ;;  %v2802_v37 = vadd.f32 %v2801_v5, %v2800_v18  ;;  %v2902_v21 = vld [vmem:[%s10323_s1 + $0x20] sm:$0xff]  ;;  %v6131_v18 = vld [vmem:[%s10323_s1 + $0xe8] sm:$0xff] }
 0x85a   :  { %v2595_v35 = vadd.f32 %v2594_v48, %v2593_v24  ;;  %v2731_v56 = vadd.f32 %v2730_v60, %v2729_v61  ;;  %v6120_v60 = vld [vmem:[%s10323_s1 + $0x90] sm:$0xff]  ;;  %v2906_v31 = vld [vmem:[%s10323_s1 + $0x40] sm:$0xff] }
 0x85b   :  { %v2634_v44 = vpop.permute.xlu1 %2633  ;;  %2848 = vmatpush.msra.mxu2 %v2820_v27  ;;  %v2861_v5 = vld [vmem:[%s10335_s13 + $0x20] sm:$0xff] }
 0x85c   :  { %v2649_v50 = vmul.f32 %v6094_v17, %v2634_v44  ;;  %v2596_v14 = vrot.slane %v2595_v35, 4  ;;  %v2776_v44 = vpop.permute.xlu0 %2775 }
 0x85d   :  { %2849 = vmatpush.msra.mxu2 %v2819_v33 }
 0x85e   :  { %v2661_v54 = vsel %vm2580_vm8, %v2649_v50, 0.0  ;;  %v2597_v12 = vadd.f32 %v2596_v14, %v2595_v35  ;;  %v6103_v35 = vld [vmem:[%s10331_s9 + $0xb0] sm:$0xff]  ;;  %v2817_v50 = vld [vmem:[%s10333_s11] sm:$0xff] }
 0x85f   :  { %v2662_v41 = vadd.f32 %v2661_v54, %v2660_v22  ;;  %2850 = vmatpush.msra.mxu2 %v2818_v43  ;;  %v2721_v47 = vmul.f32 %v6103_v35, %v8593_v6  ;;  %v6111_v54 = vld [vmem:[%s10331_s9 + $0xf0] sm:$0xff] }
 0x860   :  { %v2598_v58 = vrot.slane %v2597_v12, 2 }
 0x861   :  { %v2664_v48 = vadd.f32 %v2663_v45, %v2662_v41  ;;  %2851 = vmatpush.msra.mxu2 %v2817_v50  ;;  %v2950_v46 = vpop.permute.xlu2 %2949  ;;  %v2734_v2 = vsel %vm2580_vm8, %v2721_v47, 0.0  ;;  %v6121_v47 = vld [vmem:[%s10323_s1 + $0x98] sm:$0xff] }
 0x862   :  { %v2599_v30 = vadd.f32 %v2598_v58, %v2597_v12  ;;  %6138 = vmatpush.msk.msra.mxu0 %vm162_vm0, %v2950_v46  ;;  %v2901_v46 = vld [vmem:[%s10323_s1 + $0x18] sm:$0xff] }
 0x863   :  { %6157 = vmatpush.msk.msrb.mxu2 %vm162_vm0, %v8534_v10  ;;  %v2791_v10 = vmul.f32 %v6110_v0, %v2776_v44  ;;  %v6123_v0 = vld [vmem:[%s10323_s1 + $0xa8] sm:$0xff] }
 0x864   :  { %v2705_v26 = vpop.permute.xlu1 %2704  ;;  %v2600_v6 = vrot.slane %v2599_v30, 1  ;;  %v6719_v14 = vpop.permute.xlu0 %6718 }
 0x865   :  { %v2720_v8 = vmul.f32 %v6102_v39, %v2705_v26  ;;  %v6721_v55 = vunpack.i.h.bf16 %v6719_v14  ;;  %v6720_v19 = vunpack.i.l.bf16 %v6719_v14  ;;  %3150 = vmatpush.msrb.mxu2 %v8501_v11  ;;  %v2792_v39 = vmul.f32 %v6111_v54, %v2780_v57  ;;  %v6125_v14 = vld [vmem:[%s10323_s1 + $0xb8] sm:$0xff] }
 0x866   :  { %v2601_v9 = vadd.f32 %v2600_v6, %v2599_v30  ;;  %v2803_v49 = vsel %vm2580_vm8, %v2791_v10, 0.0  ;;  %v2899_v6 = vld [vmem:[%s10323_s1 + $0x8] sm:$0xff]  ;;  %v6129_v54 = vld [vmem:[%s10323_s1 + $0xd8] sm:$0xff]  ;;  %v2867_v10 = vld [vmem:[%s10335_s13 + $0x50] sm:$0xf] }
 0x867   :  { %v2732_v32 = vsel %vm2580_vm8, %v2720_v8, 0.0  ;;  %3023 = vmatpush.msra.mxu0 %v6720_v19  ;;  %3151 = vmatpush.msrb.mxu2 %v8496_v29  ;;  %v6112_v29 = vld [vmem:[%s10331_s9 + $0xf8] sm:$0xff]  ;;  %v2805_v52 = vsel %vm2580_vm8, %v2792_v39, 0.0  ;;  %v2804_v57 = vadd.f32 %v2803_v49, %v2802_v37  ;;  %v6128_v19 = vld [vmem:[%s10323_s1 + $0xd0] sm:$0xff] }
 0x868   :  { %v2733_v26 = vadd.f32 %v2732_v32, %v2731_v56  ;;  %v2602_v42 = vadd.f32 %v2601_v9, %v2523_v23  ;;  %6114 = vmatpush.msk.msrb.mxu3 %vm162_vm0, %v2867_v10  ;;  %v2907_v9 = vld [vmem:[%s10323_s1 + $0x48] sm:$0xff]  ;;  %v6132_v39 = vld [vmem:[%s10323_s1 + $0xf0] sm:$0xff]  ;;  %v2860_v49 = vld [vmem:[%s10335_s13 + $0x18] sm:$0xff] }
 0x869   :  { %3024 = vmatpush.msra.mxu0 %v6721_v55  ;;  %3152 = vmatpush.msrb.mxu2 %v8518_v34  ;;  %v2806_v45 = vadd.f32 %v2805_v52, %v2804_v57  ;;  %v6124_v34 = vld [vmem:[%s10323_s1 + $0xb0] sm:$0xff]  ;;  %v2903_v55 = vld [vmem:[%s10323_s1 + $0x28] sm:$0xff]  ;;  %v2857_v52 = vld [vmem:[%s10335_s13] sm:$0xff] }
 0x86a   :  { %v2735_v12 = vadd.f32 %v2734_v2, %v2733_v26  ;;  %v2904_v2 = vld [vmem:[%s10323_s1 + $0x30] sm:$0xff]  ;;  %v6134_v57 = vld [vmem:[%s10323_s1 + $0x100] sm:$0xff] }
 0x86b   :  { %v2863_v23 = vld [vmem:[%s10335_s13 + $0x30] sm:$0xff] }
 0x86c   :  { %v2859_v37 = vld [vmem:[%s10335_s13 + $0x10] sm:$0xff] }
 0x86d   :  { %v2642_v24 = vpop.permute.xlu1 %2641  ;;  %v6217_v10 = vld [vmem:[%s10323_s1 + $0x1d0] sm:$0xff] }
 0x86e   :  { %v2651_v3 = vmul.f32 %v6096_v13, %v2642_v24 }
 0x870   :  { %v2665_v17 = vsel %vm2580_vm8, %v2651_v3, 0.0 }
 0x871   :  { %v2666_v1 = vadd.f32 %v2665_v17, %v2664_v48 }
 0x873   :  { %v2667_v16 = vrot.slane %v2666_v1, 4 }
 0x875   :  { %v2668_v28 = vadd.f32 %v2667_v16, %v2666_v1 }
 0x876   :  { %v2713_v25 = vpop.permute.xlu1 %2712 }
 0x877   :  { %v2669_v51 = vrot.slane %v2668_v28, 2  ;;  %v2722_v22 = vmul.f32 %v6104_v7, %v2713_v25  ;;  %v6122_v7 = vld [vmem:[%s10323_s1 + $0xa0] sm:$0xff]  ;;  %v6127_v25 = vld [vmem:[%s10323_s1 + $0xc8] sm:$0xff] }
 0x879   :  { %v2670_v36 = vadd.f32 %v2669_v51, %v2668_v28  ;;  %v2736_v59 = vsel %vm2580_vm8, %v2722_v22, 0.0  ;;  %v2900_v28 = vld [vmem:[%s10323_s1 + $0x10] sm:$0xff]  ;;  %v2905_v51 = vld [vmem:[%s10323_s1 + $0x38] sm:$0xff]  ;;  %v6130_v22 = vld [vmem:[%s10323_s1 + $0xe0] sm:$0xff] }
 0x87a   :  { %v2737_v41 = vadd.f32 %v2736_v59, %v2735_v12  ;;  %v2866_v12 = vld [vmem:[%s10335_s13 + $0x48] sm:$0xff]  ;;  %v2864_v59 = vld [vmem:[%s10335_s13 + $0x38] sm:$0xff] }
 0x87b   :  { %v2671_v11 = vrot.slane %v2670_v36, 1  ;;  %2882 = vmatpush.msrb.mxu3 %v2866_v12 }
 0x87c   :  { %v2738_v13 = vrot.slane %v2737_v41, 4 }
 0x87d   :  { %v2672_v44 = vadd.f32 %v2671_v11, %v2670_v36  ;;  %v2865_v36 = vld [vmem:[%s10335_s13 + $0x40] sm:$0xff]  ;;  %v2908_v11 = vld [vmem:[%s10323_s1 + $0x50] sm:$0xff] }
 0x87e   :  { %v2739_v58 = vadd.f32 %v2738_v13, %v2737_v41  ;;  %2883 = vmatpush.msrb.mxu3 %v2865_v36  ;;  %v2862_v41 = vld [vmem:[%s10335_s13 + $0x28] sm:$0xff]  ;;  %v6133_v13 = vld [vmem:[%s10323_s1 + $0xf8] sm:$0xff] }
 0x87f   :  { %v2673_v8 = vadd.f32 %v2672_v44, %v2602_v42  ;;  %v2784_v24 = vpop.permute.xlu1 %2783  ;;  %v2858_v42 = vld [vmem:[%s10335_s13 + $0x8] sm:$0xff]  ;;  %v2909_v44 = vld [vmem:[%s10323_s1 + $0x58] sm:$0xff] }
 0x880   :  { %v2740_v27 = vrot.slane %v2739_v58, 2  ;;  %v2793_v61 = vmul.f32 %v6112_v29, %v2784_v24  ;;  %2884 = vmatpush.msrb.mxu3 %v2864_v59  ;;  %v3233_v29 = vpop.permute.xlu2 %3232  ;;  %v6218_v36 = vld [vmem:[%s10323_s1 + $0x1d8] sm:$0xff] }
 0x882   :  { %v2741_v3 = vadd.f32 %v2740_v27, %v2739_v58  ;;  %v2807_v63 = vsel %vm2580_vm8, %v2793_v61, 0.0  ;;  %2885 = vmatpush.msrb.mxu3 %v2863_v23  ;;  %v6724_v58 = vpop.permute.xlu0 %6723  ;;  %v2910_v27 = vld [vmem:[%s10323_s1 + $0x60] sm:$0xff]  ;;  %v6179_v23 = vld [vmem:[%s10323_s1 + $0x138] sm:$0xff] }
 0x883   :  { %v2808_v48 = vadd.f32 %v2807_v63, %v2806_v45  ;;  %v6726_v24 = vunpack.i.h.bf16 %v6724_v58 }
 0x884   :  { %v2742_v33 = vrot.slane %v2741_v3, 1  ;;  %2886 = vmatpush.msrb.mxu3 %v2862_v41  ;;  %v6219_v41 = vld [vmem:[%s10323_s1 + $0x1e0] sm:$0xff] }
 0x885   :  { %v2809_v35 = vrot.slane %v2808_v48, 4 }
 0x886   :  { %v2743_v17 = vadd.f32 %v2742_v33, %v2741_v3  ;;  %2887 = vmatpush.msrb.mxu3 %v2861_v5  ;;  %v6135_v3 = vld [vmem:[%s10323_s1 + $0x108] sm:$0xff] }
 0x887   :  { %v2810_v30 = vadd.f32 %v2809_v35, %v2808_v48  ;;  %v2944_v32 = vpop.permute.xlu1 %2943  ;;  %v2911_v48 = vld [vmem:[%s10323_s1 + $0x68] sm:$0xff] }
 0x888   :  { %v2744_v1 = vadd.f32 %v2743_v17, %v2673_v8  ;;  %3025 = vmatpush.msra.mxu0 %v2944_v32  ;;  %2888 = vmatpush.msrb.mxu3 %v2860_v49  ;;  %v6725_v8 = vunpack.i.l.bf16 %v6724_v58  ;;  %v3407_v45 = vpop.permute.xlu2 %3406  ;;  %v6136_v32 = vld [vmem:[%s10323_s1 + $0x110] sm:$0xff]  ;;  %v6255_v5 = vld [vmem:[%s10323_s1 + $0x268] sm:$0xff]  ;;  %v6180_v49 = vld [vmem:[%s10323_s1 + $0x140] sm:$0xff] }
 0x889   :  { %v2811_v43 = vrot.slane %v2810_v30, 2  ;;  %6139 = vmatmul.msk.f32.vlgmr.msra.gmra.mxu0 %vm107_vm1, %v6120_v60  ;;  %6231 = vmatpush.msk.msra.mxu1 %vm162_vm0, %v3407_v45  ;;  %v6257_v58 = vld [vmem:[%s10323_s1 + $0x278] sm:$0xff]  ;;  %v6223_v45 = vld [vmem:[%s10323_s1 + $0x200] sm:$0xff] }
 0x88a   :  { %2889 = vmatpush.msrb.mxu3 %v2859_v37  ;;  %v6729_v63 = vpop.permute.xlu0 %6728 }
 0x88b   :  { %v2812_v53 = vadd.f32 %v2811_v43, %v2810_v30  ;;  %v6731_v33 = vunpack.i.h.bf16 %v6729_v63  ;;  %v6730_v35 = vunpack.i.l.bf16 %v6729_v63  ;;  %v6259_v63 = vld [vmem:[%s10323_s1 + $0x288] sm:$0xff] }
 0x88c   :  { %2890 = vmatpush.msrb.mxu3 %v2858_v42  ;;  %v6256_v42 = vld [vmem:[%s10323_s1 + $0x270] sm:$0xff] }
 0x88d   :  { %v2813_v56 = vrot.slane %v2812_v53, 1  ;;  %3480 = vmatpush.msra.mxu1 %v6730_v35 }
 0x88e   :  { %2891 = vmatpush.msrb.mxu3 %v2857_v52 }
 0x88f   :  { %v2814_v16 = vadd.f32 %v2813_v56, %v2812_v53  ;;  %v3227_v61 = vpop.permute.xlu1 %3226  ;;  %3481 = vmatpush.msra.mxu1 %v6731_v33  ;;  %v2912_v56 = vld [vmem:[%s10323_s1 + $0x70] sm:$0xff]  ;;  %v6224_v33 = vld [vmem:[%s10323_s1 + $0x208] sm:$0xff] }
 0x890   :  { %6194 = vmatpush.msk.msra.mxu3 %vm162_vm0, %v3233_v29  ;;  %v6734_v60 = vpop.permute.xlu2 %6733  ;;  %v6221_v29 = vld [vmem:[%s10323_s1 + $0x1f0] sm:$0xff] }
 0x891   :  { %v2815_v50 = vadd.f32 %v2814_v16, %v2744_v1  ;;  %6140 = vmatmul.msk.f32.gmra.mxu0 %vm107_vm1, %v6121_v47  ;;  %v6736_v1 = vunpack.i.h.bf16 %v6734_v60  ;;  %v6735_v43 = vunpack.i.l.bf16 %v6734_v60  ;;  %v6213_v16 = vld [vmem:[%s10323_s1 + $0x1b0] sm:$0xff]  ;;  %v6185_v60 = vld [vmem:[%s10323_s1 + $0x168] sm:$0xff] }
 0x892   :  { %3306 = vmatpush.msra.mxu3 %v6725_v8  ;;  %v3401_v53 = vpop.permute.xlu0 %3400  ;;  %v6222_v8 = vld [vmem:[%s10323_s1 + $0x1f8] sm:$0xff] }
 0x893   :  { %v2816_v26 = vmax.f32 %v2815_v50, 0.0  ;;  %3482 = vmatpush.msra.mxu1 %v3401_v53  ;;  %v6186_v53 = vld [vmem:[%s10323_s1 + $0x170] sm:$0xff] }
 0x894   :  { %3307 = vmatpush.msra.mxu3 %v6726_v24  ;;  %6232 = vmatmul.msk.f32.vlgmr.msra.gmra.mxu1 %vm107_vm1, %v6213_v16  ;;  %v6262_v16 = vld [vmem:[%s10323_s1 + $0x2a0] sm:$0xff] }
 0x895   :  { %6113 = vmatmul.msk.f32.vlgmr.msra.gmra.mxu2 %vm2580_vm8, %v2816_v26  ;;  %v6137_v26 = vld [vmem:[%s10323_s1 + $0x118] sm:$0xff] }
 0x896   :  { %3308 = vmatpush.msra.mxu3 %v3227_v61  ;;  %v6183_v61 = vld [vmem:[%s10323_s1 + $0x158] sm:$0xff] }
 0x897   :  { %v3581_v17 = vpop.permute.xlu1 %3580 }
 0x898   :  { %6268 = vmatpush.msk.msrb.mxu0 %vm162_vm0, %v3581_v17  ;;  %v6260_v17 = vld [vmem:[%s10323_s1 + $0x290] sm:$0xff] }
 0x899   :  { %6141 = vmatmul.msk.f32.gmra.mxu0 %vm107_vm1, %v6122_v7  ;;  %v2913_v7 = vld [vmem:[%s10323_s1 + $0x78] sm:$0xff] }
 0x89a   :  { %3654 = vmatpush.msrb.mxu0 %v6735_v43  ;;  %v6261_v43 = vld [vmem:[%s10323_s1 + $0x298] sm:$0xff] }
 0x89c   :  { %3655 = vmatpush.msrb.mxu0 %v6736_v1 }
 0x89d   :  { %6158 = vmatmul.msk.f32.vlgmr.msrb.gmra.mxu2 %vm107_vm1, %v2898_v38  ;;  %v6214_v38 = vld [vmem:[%s10323_s1 + $0x1b8] sm:$0xff] }
 0x89e   :  { %6233 = vmatmul.msk.f32.gmra.mxu1 %vm107_vm1, %v6214_v38 }
 0x89f   :  { %v3575_v47 = vpop.permute.xlu1 %3574 }
 0x8a0   :  { %3656 = vmatpush.msrb.mxu0 %v3575_v47 }
 0x8a1   :  { %6142 = vmatmul.msk.f32.gmra.mxu0 %vm107_vm1, %v6123_v0  ;;  %v2832_v0 = vld [vmem:[%s10334_s12] sm:$0x1] }
 0x8a5   :  { %6159 = vmatmul.msk.f32.gmra.mxu2 %vm107_vm1, %v2899_v6 }
 0x8a9   :  { %6143 = vmatmul.msk.f32.gmra.mxu0 %vm107_vm1, %v6124_v34  ;;  %v6250_v34 = vld [vmem:[%s10323_s1 + $0x240] sm:$0xff] }
 0x8ad   :  { %6160 = vmatmul.msk.f32.gmra.mxu2 %vm107_vm1, %v2900_v28 }
 0x8b1   :  { %6144 = vmatmul.msk.f32.gmra.mxu0 %vm107_vm1, %v6125_v14 }
 0x8b5   :  { %6161 = vmatmul.msk.f32.gmra.mxu2 %vm107_vm1, %v2901_v46  ;;  %v2914_v46 = vld [vmem:[%s10323_s1 + $0x80] sm:$0xff] }
 0x8b9   :  { %6145 = vmatmul.msk.f32.gmra.mxu0 %vm107_vm1, %v6126_v4 }
 0x8bd   :  { %6162 = vmatmul.msk.f32.gmra.mxu2 %vm107_vm1, %v2902_v21  ;;  %v6215_v21 = vld [vmem:[%s10323_s1 + $0x1c0] sm:$0xff] }
 0x8be   :  { %6234 = vmatmul.msk.f32.gmra.mxu1 %vm107_vm1, %v6215_v21  ;;  %v6189_v21 = vld [vmem:[%s10323_s1 + $0x188] sm:$0xff] }
 0x8c1   :  { %6146 = vmatmul.msk.f32.gmra.mxu0 %vm107_vm1, %v6127_v25 }
 0x8c5   :  { %6163 = vmatmul.msk.f32.gmra.mxu2 %vm107_vm1, %v2903_v55  ;;  %v6251_v55 = vld [vmem:[%s10323_s1 + $0x248] sm:$0xff] }
 0x8c9   :  { %6147 = vmatmul.msk.f32.gmra.mxu0 %vm107_vm1, %v6128_v19  ;;  %v2915_v19 = vld [vmem:[%s10323_s1 + $0x88] sm:$0xff] }
 0x8cd   :  { %6164 = vmatmul.msk.f32.gmra.mxu2 %vm107_vm1, %v2904_v2  ;;  %v6176_v2 = vld [vmem:[%s10323_s1 + $0x120] sm:$0xff] }
 0x8d1   :  { %6148 = vmatmul.msk.f32.gmra.mxu0 %vm107_vm1, %v6129_v54  ;;  %v6216_v54 = vld [vmem:[%s10323_s1 + $0x1c8] sm:$0xff] }
 0x8d2   :  { %6235 = vmatmul.msk.f32.gmra.mxu1 %vm107_vm1, %v6216_v54 }
 0x8d5   :  { %6165 = vmatmul.msk.f32.gmra.mxu2 %vm107_vm1, %v2905_v51 }
 0x8d9   :  { %6149 = vmatmul.msk.f32.gmra.mxu0 %vm107_vm1, %v6130_v22  ;;  %v6252_v22 = vld [vmem:[%s10323_s1 + $0x250] sm:$0xff] }
 0x8da   :  { %6236 = vmatmul.msk.f32.gmra.mxu1 %vm107_vm1, %v6217_v10 }
 0x8dd   :  { %6166 = vmatmul.msk.f32.gmra.mxu2 %vm107_vm1, %v2906_v31  ;;  %v6177_v31 = vld [vmem:[%s10323_s1 + $0x128] sm:$0xff] }
 0x8e1   :  { %6150 = vmatmul.msk.f32.gmra.mxu0 %vm107_vm1, %v6131_v18  ;;  %v6253_v18 = vld [vmem:[%s10323_s1 + $0x258] sm:$0xff] }
 0x8e2   :  { %6237 = vmatmul.msk.f32.gmra.mxu1 %vm107_vm1, %v6218_v36 }
 0x8e5   :  { %6167 = vmatmul.msk.f32.gmra.mxu2 %vm107_vm1, %v2907_v9  ;;  %v6178_v9 = vld [vmem:[%s10323_s1 + $0x130] sm:$0xff] }
 0x8e9   :  { %6151 = vmatmul.msk.f32.gmra.mxu0 %vm107_vm1, %v6132_v39  ;;  %v6254_v39 = vld [vmem:[%s10323_s1 + $0x260] sm:$0xff] }
 0x8ea   :  { %6238 = vmatmul.msk.f32.gmra.mxu1 %vm107_vm1, %v6219_v41 }
 0x8ed   :  { %6168 = vmatmul.msk.f32.gmra.mxu2 %vm107_vm1, %v2908_v11 }
 0x8f1   :  { %6152 = vmatmul.msk.f32.gmra.mxu0 %vm107_vm1, %v6133_v13  ;;  %v6220_v13 = vld [vmem:[%s10323_s1 + $0x1e8] sm:$0xff] }
 0x8f2   :  { %6239 = vmatmul.msk.f32.gmra.mxu1 %vm107_vm1, %v6220_v13  ;;  %v6267_v13 = vld [vmem:[%s10323_s1 + $0x2c8] sm:$0xff] }
 0x8f5   :  { %6169 = vmatmul.msk.f32.gmra.mxu2 %vm107_vm1, %v2909_v44  ;;  %v6181_v44 = vld [vmem:[%s10323_s1 + $0x148] sm:$0xff] }
 0x8f9   :  { %6153 = vmatmul.msk.f32.gmra.mxu0 %vm107_vm1, %v6134_v57  ;;  %v6182_v57 = vld [vmem:[%s10323_s1 + $0x150] sm:$0xff] }
 0x8fa   :  { %6240 = vmatmul.msk.f32.gmra.mxu1 %vm107_vm1, %v6221_v29 }
 0x8fd   :  { %6170 = vmatmul.msk.f32.gmra.mxu2 %vm107_vm1, %v2910_v27  ;;  %v6258_v27 = vld [vmem:[%s10323_s1 + $0x280] sm:$0xff] }
 0x901   :  { %6154 = vmatmul.msk.f32.gmra.mxu0 %vm107_vm1, %v6135_v3 }
 0x902   :  { %6241 = vmatmul.msk.f32.gmra.mxu1 %vm107_vm1, %v6222_v8 }
 0x905   :  { %6171 = vmatmul.msk.f32.gmra.mxu2 %vm107_vm1, %v2911_v48  ;;  %v6184_v48 = vld [vmem:[%s10323_s1 + $0x160] sm:$0xff] }
 0x906   :  { %v8910_v30 = vpop.f32.mrf.mxu0 }
 0x907   :  { %10432 = vst [vmem:[#allocation5_spill] sm:$0xff] %v8910_v30 }
 0x909   :  { %6155 = vmatmul.msk.f32.gmra.mxu0 %vm107_vm1, %v6136_v32  ;;  %v6225_v32 = vld [vmem:[%s10323_s1 + $0x210] sm:$0xff] }
 0x90a   :  { %6242 = vmatmul.msk.f32.gmra.mxu1 %vm107_vm1, %v6223_v45  ;;  %v6193_v45 = vld [vmem:[%s10323_s1 + $0x1a8] sm:$0xff] }
 0x90d   :  { %6172 = vmatmul.msk.f32.gmra.mxu2 %vm107_vm1, %v2912_v56  ;;  %v6226_v56 = vld [vmem:[%s10323_s1 + $0x218] sm:$0xff] }
 0x90e   :  { %v8924_v50 = vpop.f32.mrf.mxu0 }
 0x911   :  { %6156 = vmatmul.msk.f32.gmra.mxu0 %vm107_vm1, %v6137_v26  ;;  %v6187_v26 = vld [vmem:[%s10323_s1 + $0x178] sm:$0xff] }
 0x912   :  { %6243 = vmatmul.msk.f32.gmra.mxu1 %vm107_vm1, %v6224_v33 }
 0x915   :  { %6173 = vmatmul.msk.f32.gmra.mxu2 %vm107_vm1, %v2913_v7  ;;  %v6227_v7 = vld [vmem:[%s10323_s1 + $0x220] sm:$0xff] }
 0x916   :  { %v8941_v6 = vpop.f32.mrf.mxu0 }
 0x918   :  { %v2853_v28 = vpop.f32.mrf.mxu2 }
 0x919   :  { %v2854_v14 = vadd.f32 %v2853_v28, %v2832_v0  ;;  %6269 = vmatmul.msk.f32.vlgmr.msrb.gmra.mxu0 %vm107_vm1, %v6250_v34  ;;  %v6263_v0 = vld [vmem:[%s10323_s1 + $0x2a8] sm:$0xff]  ;;  %v6188_v28 = vld [vmem:[%s10323_s1 + $0x180] sm:$0xff] }
 0x91a   :  { %6244 = vmatmul.msk.f32.gmra.mxu1 %vm107_vm1, %v6225_v32 }
 0x91b   :  { %v2856_v4 = vmax.f32 %v2854_v14, 0.0  ;;  %v6228_v14 = vld [vmem:[%s10323_s1 + $0x228] sm:$0xff] }
 0x91d   :  { %6115 = vmatmul.msk.f32.vlgmr.msrb.gmra.mxu3 %vm2869_vm9, %v2856_v4  ;;  %6174 = vmatmul.msk.f32.gmra.mxu2 %vm107_vm1, %v2914_v46  ;;  %v6264_v4 = vld [vmem:[%s10323_s1 + $0x2b0] sm:$0xff] }
 0x91e   :  { %v8955_v25 = vpop.f32.mrf.mxu0 }
 0x91f   :  { %10433 = vst [vmem:[#allocation12_spill] sm:$0xff] %v8955_v25 }
 0x920   :  { %v9134_v34 = vpop.f32.mrf.mxu2 }
 0x921   :  { %6270 = vmatmul.msk.f32.gmra.mxu0 %vm107_vm1, %v6251_v55  ;;  %10435 = vst [vmem:[#allocation11_spill] sm:$0xff] %v9134_v34  ;;  %v9153_v55 = vpop.f32.mrf.mxu1 }
 0x922   :  { %6245 = vmatmul.msk.f32.gmra.mxu1 %vm107_vm1, %v6226_v56  ;;  %10436 = vst [vmem:[#allocation10_spill] sm:$0xff] %v9153_v55 }
 0x925   :  { %6175 = vmatmul.msk.f32.gmra.mxu2 %vm107_vm1, %v2915_v19  ;;  %6195 = vmatmul.msk.f32.vlgmr.msra.gmra.mxu3 %vm107_vm1, %v6176_v2  ;;  %v6229_v2 = vld [vmem:[%s10323_s1 + $0x230] sm:$0xff] }
 0x926   :  { %v8973_v51 = vpop.f32.mrf.mxu0 }
 0x927   :  { %10434 = vst [vmem:[#allocation20_spill] sm:$0xff] %v8973_v51 }
 0x928   :  { %v9155_v19 = vpop.f32.mrf.mxu2 }
 0x929   :  { %6271 = vmatmul.msk.f32.gmra.mxu0 %vm107_vm1, %v6252_v22  ;;  %v6265_v22 = vld [vmem:[%s10323_s1 + $0x2b8] sm:$0xff]  ;;  %v9171_v10 = vpop.f32.mrf.mxu1 }
 0x92a   :  { %6246 = vmatmul.msk.f32.gmra.mxu1 %vm107_vm1, %v6227_v7 }
 0x92d   :  { %6196 = vmatmul.msk.f32.gmra.mxu3 %vm107_vm1, %v6177_v31  ;;  %v6190_v31 = vld [vmem:[%s10323_s1 + $0x190] sm:$0xff] }
 0x92e   :  { %v8987_v12 = vpop.f32.mrf.mxu0 }
 0x931   :  { %6272 = vmatmul.msk.f32.gmra.mxu0 %vm107_vm1, %v6253_v18  ;;  %v6230_v18 = vld [vmem:[%s10323_s1 + $0x238] sm:$0xff] }
 0x932   :  { %6247 = vmatmul.msk.f32.gmra.mxu1 %vm107_vm1, %v6228_v14 }
 0x935   :  { %6197 = vmatmul.msk.f32.gmra.mxu3 %vm107_vm1, %v6178_v9  ;;  %v9177_v9 = vpop.f32.mrf.mxu2 }
 0x936   :  { %v9001_v59 = vpop.f32.mrf.mxu0 }
 0x939   :  { %6273 = vmatmul.msk.f32.gmra.mxu0 %vm107_vm1, %v6254_v39  ;;  %v6266_v39 = vld [vmem:[%s10323_s1 + $0x2c0] sm:$0xff] }
 0x93a   :  { %6248 = vmatmul.msk.f32.gmra.mxu1 %vm107_vm1, %v6229_v2 }
 0x93b   :  { %v9189_v41 = vpop.f32.mrf.mxu1 }
 0x93d   :  { %6198 = vmatmul.msk.f32.gmra.mxu3 %vm107_vm1, %v6179_v23  ;;  %v6191_v23 = vld [vmem:[%s10323_s1 + $0x198] sm:$0xff] }
 0x93e   :  { %v9015_v11 = vpop.f32.mrf.mxu0 }
 0x941   :  { %6274 = vmatmul.msk.f32.gmra.mxu0 %vm107_vm1, %v6255_v5  ;;  %v2868_v5 = vld [vmem:[%s10336_s14] sm:$0x1] }
 0x942   :  { %6249 = vmatmul.msk.f32.gmra.mxu1 %vm107_vm1, %v6230_v18 }
 0x945   :  { %6199 = vmatmul.msk.f32.gmra.mxu3 %vm107_vm1, %v6180_v49 }
 0x946   :  { %v9029_v37 = vpop.f32.mrf.mxu0 }
 0x949   :  { %6275 = vmatmul.msk.f32.gmra.mxu0 %vm107_vm1, %v6256_v42  ;;  %v9200_v42 = vpop.f32.mrf.mxu2 }
 0x94a   :  { %10439 = vst [vmem:[#allocation25_spill] sm:$0xff] %v9200_v42 }
 0x94d   :  { %6200 = vmatmul.msk.f32.gmra.mxu3 %vm107_vm1, %v6181_v44 }
 0x94e   :  { %v9043_v52 = vpop.f32.mrf.mxu0 }
 0x951   :  { %6276 = vmatmul.msk.f32.gmra.mxu0 %vm107_vm1, %v6257_v58  ;;  %v6192_v58 = vld [vmem:[%s10323_s1 + $0x1a0] sm:$0xff] }
 0x955   :  { %6201 = vmatmul.msk.f32.gmra.mxu3 %vm107_vm1, %v6182_v57  ;;  %v9207_v57 = vpop.f32.mrf.mxu1 }
 0x956   :  { %v9057_v24 = vpop.f32.mrf.mxu0  ;;  %10440 = vst [vmem:[#allocation18_spill] sm:$0xff] %v9207_v57 }
 0x959   :  { %6277 = vmatmul.msk.f32.gmra.mxu0 %vm107_vm1, %v6258_v27 }
 0x95d   :  { %6202 = vmatmul.msk.f32.gmra.mxu3 %vm107_vm1, %v6183_v61  ;;  %v9214_v61 = vpop.f32.mrf.mxu2 }
 0x95e   :  { %v9071_v3 = vpop.f32.mrf.mxu0  ;;  %10442 = vst [vmem:[#allocation22_spill] sm:$0xff] %v9214_v61 }
 0x961   :  { %6278 = vmatmul.msk.f32.gmra.mxu0 %vm107_vm1, %v6259_v63 }
 0x965   :  { %6203 = vmatmul.msk.f32.gmra.mxu3 %vm107_vm1, %v6184_v48  ;;  %v9222_v48 = vpop.f32.mrf.mxu1 }
 0x966   :  { %v9085_v35 = vpop.f32.mrf.mxu0  ;;  %10444 = vst [vmem:[#allocation24_spill] sm:$0xff] %v9222_v48 }
 0x969   :  { %6279 = vmatmul.msk.f32.gmra.mxu0 %vm107_vm1, %v6260_v17  ;;  %v3169_v17 = vpop.f32.mrf.mxu2 }
 0x96d   :  { %6204 = vmatmul.msk.f32.gmra.mxu3 %vm107_vm1, %v6185_v60 }
 0x96e   :  { %v9099_v1 = vpop.f32.mrf.mxu0 }
 0x971   :  { %6280 = vmatmul.msk.f32.gmra.mxu0 %vm107_vm1, %v6261_v43  ;;  %v3499_v43 = vpop.f32.mrf.mxu1 }
 0x975   :  { %6205 = vmatmul.msk.f32.gmra.mxu3 %vm107_vm1, %v6186_v53  ;;  %v3172_v53 = vpop.f32.mrf.mxu2 }
 0x976   :  { %v9113_v47 = vpop.f32.mrf.mxu0 }
 0x979   :  { %6281 = vmatmul.msk.f32.gmra.mxu0 %vm107_vm1, %v6262_v16 }
 0x97d   :  { %6206 = vmatmul.msk.f32.gmra.mxu3 %vm107_vm1, %v6187_v26  ;;  %v3502_v26 = vpop.f32.mrf.mxu1 }
 0x97e   :  { %v9127_v38 = vpop.f32.mrf.mxu0 }
 0x981   :  { %6282 = vmatmul.msk.f32.gmra.mxu0 %vm107_vm1, %v6263_v0  ;;  %v3175_v0 = vpop.f32.mrf.mxu2 }
 0x985   :  { %6207 = vmatmul.msk.f32.gmra.mxu3 %vm107_vm1, %v6188_v28  ;;  %v9234_v14 = vpop.f32.mrf.mxu1 }
 0x986   :  { %v9143_v46 = vpop.f32.mrf.mxu0 }
 0x989   :  { %6283 = vmatmul.msk.f32.gmra.mxu0 %vm107_vm1, %v6264_v4  ;;  %v3178_v2 = vpop.f32.mrf.mxu2 }
 0x98d   :  { %6208 = vmatmul.msk.f32.gmra.mxu3 %vm107_vm1, %v6189_v21 }
 0x98e   :  { %v9161_v54 = vpop.f32.mrf.mxu0 }
 0x98f   :  { %10437 = vst [vmem:[#allocation17_spill] sm:$0xff] %v9161_v54 }
 0x991   :  { %6284 = vmatmul.msk.f32.gmra.mxu0 %vm107_vm1, %v6265_v22  ;;  %v9238_v22 = vpop.f32.mrf.mxu1 }
 0x995   :  { %6209 = vmatmul.msk.f32.gmra.mxu3 %vm107_vm1, %v6190_v31 }
 0x996   :  { %v9179_v36 = vpop.f32.mrf.mxu0 }
 0x997   :  { %10438 = vst [vmem:[#allocation26_spill] sm:$0xff] %v9179_v36 }
 0x999   :  { %6285 = vmatmul.msk.f32.gmra.mxu0 %vm107_vm1, %v6266_v39  ;;  %v9242_v39 = vpop.f32.mrf.mxu2 }
 0x99d   :  { %6210 = vmatmul.msk.f32.gmra.mxu3 %vm107_vm1, %v6191_v23 }
 0x99e   :  { %v9195_v49 = vpop.f32.mrf.mxu0 }
 0x9a0   :  { %v2893_v44 = vpop.f32.mrf.mxu3 }
 0x9a1   :  { %v2894_v29 = vadd.f32 %v2893_v44, %v2868_v5  ;;  %6286 = vmatmul.msk.f32.gmra.mxu0 %vm107_vm1, %v6267_v13  ;;  %v9244_v5 = vpop.f32.mrf.mxu1  ;;  %v9248_v44 = vpop.f32.mrf.mxu2 }
 0x9a2   :  { %10448 = vst [vmem:[#allocation9_spill] sm:$0xff] %v9244_v5  ;;  %v3170_v5 = vadd.f32 %v3169_v17, %v8987_v12 }
 0x9a3   :  { %2897 = vst.msk [vmem:[#allocation2] sm:$0x1] %vm2896_vm10, %v2894_v29 }
 0x9a5   :  { %6211 = vmatmul.msk.f32.gmra.mxu3 %vm107_vm1, %v6192_v58 }
 0x9a6   :  { %v9210_v8 = vpop.f32.mrf.mxu0 }
 0x9a8   :  { %v9212_v27 = vpop.f32.mrf.mxu3 }
 0x9a9   :  { %10441 = vst [vmem:[#allocation21_spill] sm:$0xff] %v9212_v27  ;;  %v9250_v58 = vpop.f32.mrf.mxu1  ;;  %v3187_v62 = vpop.f32.mrf.mxu2 }
 0x9aa   :  { %10450 = vst [vmem:[#allocation6_spill] sm:$0xff] %v9250_v58  ;;  %v3188_v30 = vadd.f32 %v3187_v62, %v9071_v3 }
 0x9ad   :  { %6212 = vmatmul.msk.f32.gmra.mxu3 %vm107_vm1, %v6193_v45 }
 0x9ae   :  { %v9220_v63 = vpop.f32.mrf.mxu0 }
 0x9af   :  { %10443 = vst [vmem:[#allocation7_spill] sm:$0xff] %v9220_v63 }
 0x9b0   :  { %v9224_v33 = vpop.f32.mrf.mxu3 }
 0x9b1   :  { %v3517_v40 = vpop.f32.mrf.mxu1  ;;  %v3190_v55 = vpop.f32.mrf.mxu2 }
 0x9b2   :  { %v3191_v48 = vadd.f32 %v3190_v55, %v9085_v35 }
 0x9b6   :  { %v9226_v60 = vpop.f32.mrf.mxu0 }
 0x9b7   :  { %10445 = vst [vmem:[#allocation13_spill] sm:$0xff] %v9226_v60 }
 0x9b8   :  { %v9228_v32 = vpop.f32.mrf.mxu3 }
 0x9b9   :  { %v3520_v27 = vpop.f32.mrf.mxu1  ;;  %v3193_v60 = vpop.f32.mrf.mxu2 }
 0x9be   :  { %v3673_v56 = vpop.f32.mrf.mxu0 }
 0x9c0   :  { %v9230_v16 = vpop.f32.mrf.mxu3 }
 0x9c1   :  { %10446 = vst [vmem:[#allocation14_spill] sm:$0xff] %v9230_v16  ;;  %v3523_v16 = vpop.f32.mrf.mxu1  ;;  %v3196_v62 = vpop.f32.mrf.mxu2 }
 0x9c6   :  { %v3676_v7 = vpop.f32.mrf.mxu0 }
 0x9c8   :  { %v9232_v28 = vpop.f32.mrf.mxu3 }
 0x9c9   :  { %10447 = vst [vmem:[#allocation8_spill] sm:$0xff] %v9232_v28 }
 0x9ce   :  { %v9236_v4 = vpop.f32.mrf.mxu0 }
 0x9d0   :  { %v3325_v21 = vpop.f32.mrf.mxu3 }
 0x9d1   :  { %v3369_v58 = vadd.f32 %v3325_v21, %v3170_v5  ;;  %v3161_v21 = vadd.f32 %v9177_v9, %v8941_v6 }
 0x9d3   :  { %v3543_v55 = vadd.f32 %v3499_v43, %v3369_v58 }
 0x9d6   :  { %v9240_v18 = vpop.f32.mrf.mxu0 }
 0x9d8   :  { %v3328_v31 = vpop.f32.mrf.mxu3 }
 0x9de   :  { %v9246_v13 = vpop.f32.mrf.mxu0 }
 0x9df   :  { %10449 = vst [vmem:[#allocation15_spill] sm:$0xff] %v9246_v13 }
 0x9e0   :  { %v3331_v23 = vpop.f32.mrf.mxu3 }
 0x9e6   :  { %v9252_v45 = vpop.f32.mrf.mxu0 }
 0x9e7   :  { %10451 = vst [vmem:[#allocation23_spill] sm:$0xff] %v9252_v45  ;;  %v3173_v45 = vadd.f32 %v3172_v53, %v9001_v59  ;;  %v3194_v59 = vadd.f32 %v3193_v60, %v9099_v1  ;;  %v3176_v1 = vadd.f32 %v3175_v0, %v9015_v11 }
 0x9e8   :  { %v3334_v29 = vpop.f32.mrf.mxu3 }
 0x9e9   :  { %v3370_v61 = vadd.f32 %v3328_v31, %v3173_v45  ;;  %v3366_v31 = vadd.f32 %v9228_v32, %v3161_v21  ;;  %v3185_v32 = vadd.f32 %v9248_v44, %v9057_v24  ;;  %v10465_v21 = vld [vmem:[#allocation24_spill] sm:$0xff] }
 0x9ee   :  { %v3691_v20 = vpop.f32.mrf.mxu0 }
 0x9f0   :  { %v9254_v15 = vpop.f32.mrf.mxu3 }
 0x9f1   :  { %10452 = vst [vmem:[#allocation27_spill] sm:$0xff] %v9254_v15 }
 0x9f6   :  { %v3694_v34 = vpop.f32.mrf.mxu0 }
 0x9f8   :  { %v9256_v36 = vpop.f32.mrf.mxu3  ;;  %v10453_v24 = vld [vmem:[#allocation27_spill] sm:$0xff] }
 0x9fe   :  { %v3697_v25 = vpop.f32.mrf.mxu0 }
 0xa00   :  { %v3343_v63 = vpop.f32.mrf.mxu3 }
 0xa01   :  { %v3375_v57 = vadd.f32 %v3343_v63, %v3188_v30  ;;  %v3544_v30 = vadd.f32 %v3502_v26, %v3370_v61  ;;  %v3179_v63 = vadd.f32 %v3178_v2, %v9029_v37 }
 0xa03   :  { %v3549_v28 = vadd.f32 %v3517_v40, %v3375_v57  ;;  %v3526_v40 = vpop.f32.mrf.mxu1  ;;  %v9270_v12 = vadd.f32 %v3676_v7, %v3544_v30  ;;  %v9272_v57 = vadd.f32 %v3673_v56, %v3543_v55  ;;  %v3372_v60 = vadd.f32 %v3334_v29, %v3179_v63  ;;  %v10460_v63 = vld [vmem:[#allocation25_spill] sm:$0xff] }
 0xa04   :  { %v3371_v56 = vadd.f32 %v3331_v23, %v3176_v1 }
 0xa05   :  { %v9262_v54 = vadd.f32 %v3691_v20, %v3549_v28  ;;  %v3546_v28 = vadd.f32 %v9238_v22, %v3372_v60  ;;  %v10462_v60 = vld [vmem:[#allocation23_spill] sm:$0xff] }
 0xa06   :  { %v3545_v11 = vadd.f32 %v9234_v14, %v3371_v56  ;;  %v10463_v56 = vld [vmem:[#allocation14_spill] sm:$0xff] }
 0xa07   :  { %v9296_v22 = vadd.f32 %v9240_v18, %v3546_v28  ;;  %v10464_v28 = vld [vmem:[#allocation15_spill] sm:$0xff] }
 0xa08   :  { %v3346_v13 = vpop.f32.mrf.mxu3  ;;  %v9300_v5 = vadd.f32 %v9236_v4, %v3545_v11  ;;  %v3182_v4 = vadd.f32 %v9242_v39, %v9043_v52  ;;  %v10455_v52 = vld [vmem:[#allocation6_spill] sm:$0xff] }
 0xa09   :  { %v3376_v42 = vadd.f32 %v3346_v13, %v3191_v48  ;;  %v3540_v13 = vadd.f32 %v9189_v41, %v3366_v31  ;;  %v3374_v41 = vadd.f32 %v9256_v36, %v3185_v32  ;;  %v10456_v36 = vld [vmem:[#allocation20_spill] sm:$0xff]  ;;  %v10467_v31 = vld [vmem:[#allocation13_spill] sm:$0xff] }
 0xa0a   :  { %v3373_v44 = vadd.f32 %v10453_v24, %v3182_v4 }
 0xa0b   :  { %v3550_v51 = vadd.f32 %v3520_v27, %v3376_v42  ;;  %v3700_v42 = vpop.f32.mrf.mxu0  ;;  %v3199_v27 = vpop.f32.mrf.mxu2  ;;  %v3548_v39 = vadd.f32 %v10455_v52, %v3374_v41 }
 0xa0c   :  { %v3529_v53 = vpop.f32.mrf.mxu1  ;;  %v3200_v2 = vadd.f32 %v3199_v27, %v9127_v38 }
 0xa0d   :  { %v9264_v15 = vadd.f32 %v3694_v34, %v3550_v51  ;;  %v3197_v51 = vadd.f32 %v3196_v62, %v9113_v47  ;;  %v6762_v34 = vpack.i.bf16 %v9272_v57, %v9270_v12 }
 0xa0f   :  { %v6747_v3 = vpack.i.bf16 %v9262_v54, %v9264_v15 }
 0xa10   :  { %v3349_v35 = vpop.f32.mrf.mxu3 }
 0xa11   :  { %6748 = vrot.lane.b32.xlu1 %v6747_v3, %s6946_s24  ;;  %v3377_v20 = vadd.f32 %v3349_v35, %v3194_v59  ;;  %v10454_v3 = vld [vmem:[#allocation17_spill] sm:$0xff] }
 0xa13   :  { %v3551_v48 = vadd.f32 %v3523_v16, %v3377_v20  ;;  %v3703_v7 = vpop.f32.mrf.mxu0  ;;  %v3202_v0 = vpop.f32.mrf.mxu2 }
 0xa14   :  { %v3532_v9 = vpop.f32.mrf.mxu1  ;;  %v3203_v14 = vadd.f32 %v3202_v0, %v9143_v46  ;;  %v9313_v46 = vadd.f32 %v9210_v8, %v3540_v13  ;;  %v10470_v13 = vld [vmem:[#allocation7_spill] sm:$0xff] }
 0xa15   :  { %v9280_v26 = vadd.f32 %v3697_v25, %v3551_v48  ;;  %v3158_v25 = vadd.f32 %v9155_v19, %v8924_v50  ;;  %v6757_v50 = vpack.i.bf16 %v9300_v5, %v9296_v22 }
 0xa17   :  { %v3365_v23 = vadd.f32 %v9224_v33, %v3158_v25  ;;  %v10466_v25 = vld [vmem:[#allocation18_spill] sm:$0xff] }
 0xa18   :  { %v3352_v61 = vpop.f32.mrf.mxu3 }
 0xa19   :  { %v3378_v17 = vadd.f32 %v3352_v61, %v3197_v51  ;;  %6763 = vrot.lane.b32.xlu1 %v6762_v34, %s6946_s24  ;;  %v3539_v18 = vadd.f32 %v9171_v10, %v3365_v23  ;;  %v10458_v51 = vld [vmem:[#allocation9_spill] sm:$0xff]  ;;  %v10459_v61 = vld [vmem:[#allocation12_spill] sm:$0xff] }
 0xa1a   :  { %v3164_v48 = vadd.f32 %v10460_v63, %v10459_v61 }
 0xa1b   :  { %v3552_v43 = vadd.f32 %v3526_v40, %v3378_v17  ;;  %v3706_v19 = vpop.f32.mrf.mxu0  ;;  %v3205_v45 = vpop.f32.mrf.mxu2  ;;  %v9317_v62 = vadd.f32 %v9195_v49, %v3539_v18  ;;  %v3547_v49 = vadd.f32 %v10458_v51, %v3373_v44  ;;  %v10461_v17 = vld [vmem:[#allocation8_spill] sm:$0xff]  ;;  %v10472_v18 = vld [vmem:[#allocation10_spill] sm:$0xff] }
 0xa1c   :  { %v3206_v35 = vadd.f32 %v3205_v45, %v10454_v3  ;;  %v3535_v59 = vpop.f32.mrf.mxu1 }
 0xa1d   :  { %v9282_v47 = vadd.f32 %v3700_v42, %v3552_v43  ;;  %v6772_v55 = vpack.i.bf16 %v9317_v62, %v9313_v46  ;;  %v10457_v42 = vld [vmem:[#allocation22_spill] sm:$0xff]  ;;  %v3722_v43 = vadd.f32 %v10462_v60, %v3548_v39 }
 0xa1e   :  { %v3167_v20 = vadd.f32 %v10457_v42, %v10456_v36 }
 0xa1f   :  { %v6742_v37 = vpack.i.bf16 %v9280_v26, %v9282_v47 }
 0xa20   :  { %v3355_v16 = vpop.f32.mrf.mxu3  ;;  %v3368_v1 = vadd.f32 %v10461_v17, %v3167_v20 }
 0xa21   :  { %6743 = vrot.lane.b32.xlu0 %v6742_v37, %s6946_s24  ;;  %v3379_v6 = vadd.f32 %v3355_v16, %v3200_v2  ;;  %v3721_v37 = vadd.f32 %v10464_v28, %v3547_v49 }
 0xa22   :  { %v3542_v11 = vadd.f32 %v10465_v21, %v3368_v1 }
 0xa23   :  { %v3553_v33 = vadd.f32 %v3529_v53, %v3379_v6  ;;  %v3709_v27 = vpop.f32.mrf.mxu0  ;;  %v6752_v0 = vpack.i.bf16 %v3721_v37, %v3722_v43  ;;  %v10468_v6 = vld [vmem:[#allocation5_spill] sm:$0xff] }
 0xa24   :  { %v9343_v23 = vadd.f32 %v10467_v31, %v3542_v11 }
 0xa25   :  { %v3727_v10 = vadd.f32 %v3703_v7, %v3553_v33  ;;  %v3367_v7 = vadd.f32 %v10463_v56, %v3164_v48 }
 0xa27   :  { %v3541_v2 = vadd.f32 %v10466_v25, %v3367_v7 }
 0xa28   :  { %v3358_v38 = vpop.f32.mrf.mxu3 }
 0xa29   :  { %v3380_v29 = vadd.f32 %v3358_v38, %v3203_v14  ;;  %6758 = vrot.lane.b32.xlu0 %v6757_v50, %s6946_s24  ;;  %v9348_v50 = vadd.f32 %v10470_v13, %v3541_v2  ;;  %v10471_v38 = vld [vmem:[#allocation21_spill] sm:$0xff] }
 0xa2b   :  { %v3554_v58 = vadd.f32 %v3532_v9, %v3380_v29  ;;  %v10469_v9 = vld [vmem:[#allocation11_spill] sm:$0xff]  ;;  %v6767_v32 = vpack.i.bf16 %v9348_v50, %v9343_v23  ;;  %v10473_v29 = vld [vmem:[#allocation26_spill] sm:$0xff] }
 0xa2c   :  { %v3155_v14 = vadd.f32 %v10469_v9, %v10468_v6 }
 0xa2d   :  { %v3728_v30 = vadd.f32 %v3706_v19, %v3554_v58 }
 0xa2e   :  { %v3364_v19 = vadd.f32 %v10471_v38, %v3155_v14 }
 0xa2f   :  { %v6737_v8 = vpack.i.bf16 %v3728_v30, %v3727_v10 }
 0xa30   :  { %v3361_v40 = vpop.f32.mrf.mxu3  ;;  %v3538_v33 = vadd.f32 %v10472_v18, %v3364_v19 }
 0xa31   :  { %v3381_v34 = vadd.f32 %v3361_v40, %v3206_v35  ;;  %6773 = vrot.lane.b32.xlu0 %v6772_v55, %s6946_s24  ;;  %6738 = vrot.lane.b32.xlu2 %v6737_v8, %s6946_s24 }
 0xa32   :  { %v9356_v4 = vadd.f32 %v10473_v29, %v3538_v33 }
 0xa33   :  { %v3555_v53 = vadd.f32 %v3535_v59, %v3381_v34 }
 0xa35   :  { %v9335_v16 = vadd.f32 %v3709_v27, %v3555_v53 }
 0xa37   :  { %3812 = vrot.lane.b32.xlu1 %v9335_v16, %s6946_s24 }
 0xa39   :  { %6753 = vrot.lane.b32.xlu2 %v6752_v0, %s6946_s24 }
 0xa41   :  { %6768 = vrot.lane.b32.xlu2 %v6767_v32, %s6946_s24 }
 0xa49   :  { %3778 = vrot.lane.b32.xlu2 %v9356_v4, %s6946_s24 }
 0xa83   :  { %v6749_v24 = vpop.permute.xlu1 %6748 }
 0xa84   :  { %v6751_v52 = vunpack.i.h.bf16 %v6749_v24  ;;  %v6750_v39 = vunpack.i.l.bf16 %v6749_v24 }
 0xa86   :  { %v3843_v49 = vmax.f32 %v9262_v54, %v6751_v52 }
 0xa88   :  { %v3889_v17 = vrot.slane %v3843_v49, 1 }
 0xa8b   :  { %v6739_v41 = vpop.permute.xlu2 %6738  ;;  %v6764_v60 = vpop.permute.xlu1 %6763 }
 0xa8c   :  { %v6741_v58 = vunpack.i.h.bf16 %v6739_v41  ;;  %v6740_v45 = vunpack.i.l.bf16 %v6739_v41  ;;  %v6765_v2 = vunpack.i.l.bf16 %v6764_v60 }
 0xa8e   :  { %v9360_v44 = vmax.f32 %v3728_v30, %v6741_v58  ;;  %v3847_v3 = vmax.f32 %v3727_v10, %v6740_v45  ;;  %v3844_v30 = vmax.f32 %v9264_v15, %v6750_v39  ;;  %v3838_v18 = vmax.f32 %v9270_v12, %v6765_v2  ;;  %v3739_v2 = vld [vmem:[%s10325_s3 + $0x48] sm:$0xff] }
 0xa90   :  { %v3899_v35 = vrot.slane %v9360_v44, 1  ;;  %v3897_v55 = vrot.slane %v3847_v3, 1  ;;  %v3891_v1 = vrot.slane %v3844_v30, 1 }
 0xa92   :  { %v3900_v8 = vsel %vm1026_vm2, %v3897_v55, %v3899_v35 }
 0xa93   :  { %v3936_v40 = vmax.f32 %v3847_v3, %v3900_v8  ;;  %v6744_v59 = vpop.permute.xlu0 %6743  ;;  %v6754_v36 = vpop.permute.xlu2 %6753 }
 0xa94   :  { %v6746_v42 = vunpack.i.h.bf16 %v6744_v59  ;;  %v6745_v20 = vunpack.i.l.bf16 %v6744_v59  ;;  %v6755_v51 = vunpack.i.l.bf16 %v6754_v36  ;;  %v6756_v27 = vunpack.i.h.bf16 %v6754_v36 }
 0xa95   :  { %3969 = vmatpush.msra.mxu2 %v3936_v40 }
 0xa96   :  { %v3845_v10 = vmax.f32 %v9280_v26, %v6746_v42  ;;  %v3846_v34 = vmax.f32 %v9282_v47, %v6745_v20  ;;  %v3842_v48 = vmax.f32 %v3722_v43, %v6755_v51  ;;  %v3841_v53 = vmax.f32 %v3721_v37, %v6756_v27 }
 0xa97   :  { %v6766_v47 = vunpack.i.h.bf16 %v6764_v60  ;;  %v3892_v43 = vsel %vm1026_vm2, %v3889_v17, %v3891_v1 }
 0xa98   :  { %v3893_v61 = vrot.slane %v3845_v10, 1  ;;  %v3895_v63 = vrot.slane %v3846_v34, 1  ;;  %v3887_v15 = vrot.slane %v3842_v48, 1  ;;  %v3885_v31 = vrot.slane %v3841_v53, 1 }
 0xa99   :  { %v3837_v19 = vmax.f32 %v9272_v57, %v6766_v47  ;;  %v3932_v32 = vmax.f32 %v3843_v49, %v3892_v43  ;;  %v3879_v57 = vrot.slane %v3838_v18, 1  ;;  %v3735_v47 = vld [vmem:[%s10325_s3 + $0x28] sm:$0xff]  ;;  %v3736_v43 = vld [vmem:[%s10325_s3 + $0x30] sm:$0xff] }
 0xa9a   :  { %v3898_v56 = vsel %vm1026_vm2, %v3895_v63, %v3897_v55  ;;  %v3896_v7 = vsel %vm1026_vm2, %v3893_v61, %v3895_v63  ;;  %v3894_v26 = vsel %vm1026_vm2, %v3891_v1, %v3893_v61  ;;  %v3890_v38 = vsel %vm1026_vm2, %v3887_v15, %v3889_v17 }
 0xa9b   :  { %v6759_v54 = vpop.permute.xlu0 %6758  ;;  %v3935_v28 = vmax.f32 %v3846_v34, %v3898_v56  ;;  %v6769_v0 = vpop.permute.xlu2 %6768  ;;  %v3934_v25 = vmax.f32 %v3845_v10, %v3896_v7  ;;  %v3933_v9 = vmax.f32 %v3844_v30, %v3894_v26  ;;  %v3888_v41 = vsel %vm1026_vm2, %v3885_v31, %v3887_v15  ;;  %v3732_v26 = vld [vmem:[%s10325_s3 + $0x10] sm:$0xff] }
 0xa9c   :  { %v6761_v21 = vunpack.i.h.bf16 %v6759_v54  ;;  %v6760_v11 = vunpack.i.l.bf16 %v6759_v54  ;;  %v6770_v13 = vunpack.i.l.bf16 %v6769_v0  ;;  %v6771_v29 = vunpack.i.h.bf16 %v6769_v0  ;;  %v3734_v0 = vld [vmem:[%s10325_s3 + $0x20] sm:$0xff] }
 0xa9d   :  { %3970 = vmatpush.msra.mxu2 %v3935_v28  ;;  %v3877_v3 = vrot.slane %v3837_v19, 1  ;;  %v3930_v55 = vmax.f32 %v3841_v53, %v3888_v41  ;;  %v3759_v41 = vld [vmem:[%s10329_s7 + $0x40] sm:$0xff] }
 0xa9e   :  { %v3839_v37 = vmax.f32 %v9300_v5, %v6761_v21  ;;  %v3840_v6 = vmax.f32 %v9296_v22, %v6760_v11  ;;  %v3931_v5 = vmax.f32 %v3842_v48, %v3890_v38  ;;  %v3836_v22 = vmax.f32 %v9343_v23, %v6770_v13  ;;  %v3730_v21 = vld [vmem:[%s10325_s3] sm:$0xff]  ;;  %v3733_v11 = vld [vmem:[%s10325_s3 + $0x18] sm:$0xff]  ;;  %4099 = vperm.xlu0 %6777, %v3759_v41  }
 0xa9f   :  { %3971 = vmatpush.msra.mxu2 %v3934_v25  ;;  %v3835_v52 = vmax.f32 %v9348_v50, %v6771_v29  ;;  %v3880_v50 = vsel %vm1026_vm2, %v3877_v3, %v3879_v57  ;;  %v3737_v25 = vld [vmem:[%s10325_s3 + $0x38] sm:$0xff]  ;;  %v3742_v13 = vld [vmem:[%s10325_s3 + $0x60] sm:$0xff] }
 0xaa0   :  { %v3883_v14 = vrot.slane %v3840_v6, 1  ;;  %v3881_v33 = vrot.slane %v3839_v37, 1  ;;  %v3875_v40 = vrot.slane %v3836_v22, 1  ;;  %v3926_v63 = vmax.f32 %v3837_v19, %v3880_v50  ;;  %v3745_v38 = vld [vmem:[%s10325_s3 + $0x78] sm:$0xff]  ;;  %v3744_v19 = vld [vmem:[%s10325_s3 + $0x70] sm:$0xff]  ;;  %v3748_v29 = vld [vmem:[%s10326_s4] sm:$0xff] }
 0xaa1   :  { %3972 = vmatpush.msra.mxu2 %v3933_v9  ;;  %v3873_v20 = vrot.slane %v3835_v52, 1  ;;  %v3740_v9 = vld [vmem:[%s10325_s3 + $0x50] sm:$0xff] }
 0xaa2   :  { %v3886_v24 = vsel %vm1026_vm2, %v3883_v14, %v3885_v31  ;;  %v3884_v12 = vsel %vm1026_vm2, %v3881_v33, %v3883_v14  ;;  %v3882_v36 = vsel %vm1026_vm2, %v3879_v57, %v3881_v33  ;;  %v3878_v61 = vsel %vm1026_vm2, %v3875_v40, %v3877_v3  ;;  %v3738_v31 = vld [vmem:[%s10325_s3 + $0x40] sm:$0xff]  ;;  %v3743_v14 = vld [vmem:[%s10325_s3 + $0x68] sm:$0xff] }
 0xaa3   :  { %v6774_v58 = vpop.permute.xlu0 %6773  ;;  %3973 = vmatpush.msra.mxu2 %v3932_v32  ;;  %v3929_v8 = vmax.f32 %v3840_v6, %v3886_v24  ;;  %v3928_v42 = vmax.f32 %v3839_v37, %v3884_v12  ;;  %v3779_v49 = vpop.permute.xlu2 %3778  ;;  %v3927_v10 = vmax.f32 %v3838_v18, %v3882_v36  ;;  %v3925_v1 = vmax.f32 %v3836_v22, %v3878_v61  ;;  %v3741_v37 = vld [vmem:[%s10325_s3 + $0x58] sm:$0xff]  ;;  %v3750_v6 = vld [vmem:[%s10326_s4 + $0x10] sm:$0x7f]  ;;  %v3747_v32 = vld [vmem:[%s10325_s3 + $0x88] sm:$0xff] }
 0xaa4   :  { %v6775_v45 = vunpack.i.l.bf16 %v6774_v58  ;;  %v6776_v39 = vunpack.i.h.bf16 %v6774_v58  ;;  %6297 = vmatpush.msk.msrb.mxu1 %vm1026_vm2, %v3750_v6  ;;  %v3746_v18 = vld [vmem:[%s10325_s3 + $0x80] sm:$0xff]  ;;  %v3749_v33 = vld [vmem:[%s10326_s4 + $0x8] sm:$0xff]  ;;  %v3754_v58 = vld [vmem:[%s10329_s7 + $0x18] sm:$0xff] }
 0xaa5   :  { %3974 = vmatpush.msra.mxu2 %v3931_v5  ;;  %v3758_v5 = vld [vmem:[%s10329_s7 + $0x38] sm:$0xff]  ;;  %v3751_v22 = vld [vmem:[%s10329_s7] sm:$0xff]  ;;  %v3756_v24 = vld [vmem:[%s10329_s7 + $0x28] sm:$0xff] }
 0xaa6   :  { %v3834_v59 = vmax.f32 %v9313_v46, %v6775_v45  ;;  %v3833_v51 = vmax.f32 %v9317_v62, %v6776_v39  ;;  %v3832_v46 = vmax.f32 %v9356_v4, %v3779_v49  ;;  %v3731_v4 = vld [vmem:[%s10325_s3 + $0x8] sm:$0xff]  ;;  %4146 = vmatpush.msrb.mxu1 %v3749_v33  ;;  %4074 = vperm.xlu0 %6777, %v3754_v58   ;;  %v3757_v39 = vld [vmem:[%s10329_s7 + $0x30] sm:$0xff] }
 0xaa7   :  { %3975 = vmatpush.msra.mxu2 %v3930_v55  ;;  %4094 = vperm.xlu1 %6778, %v3758_v5  }
 0xaa8   :  { %v3871_v34 = vrot.slane %v3834_v59, 1  ;;  %v3869_v48 = vrot.slane %v3833_v51, 1  ;;  %v3868_v7 = vrot.slane %v3832_v46, 1  ;;  %4147 = vmatpush.msrb.mxu1 %v3748_v29  ;;  %4089 = vperm.xlu2 %6779, %v3757_v39  }
 0xaa9   :  { %3976 = vmatpush.msra.mxu2 %v3929_v8  ;;  %v3813_v23 = vpop.permute.xlu1 %3812 }
 0xaaa   :  { %v3849_v30 = vmax.f32 %v9335_v16, %v3813_v23  ;;  %v3876_v16 = vsel %vm1026_vm2, %v3873_v20, %v3875_v40  ;;  %v3874_v53 = vsel %vm1026_vm2, %v3871_v34, %v3873_v20  ;;  %v3752_v20 = vld [vmem:[%s10329_s7 + $0x8] sm:$0xff] }
 0xaab   :  { %3977 = vmatpush.msra.mxu2 %v3928_v42  ;;  %v3924_v56 = vmax.f32 %v3835_v52, %v3876_v16  ;;  %v3923_v54 = vmax.f32 %v3834_v59, %v3874_v53  ;;  %v3753_v52 = vld [vmem:[%s10329_s7 + $0x10] sm:$0xff]  ;;  %v3755_v59 = vld [vmem:[%s10329_s7 + $0x20] sm:$0xff] }
 0xaac   :  { %v3901_v27 = vrot.slane %v3849_v30, 1 }
 0xaad   :  { %3978 = vmatpush.msra.mxu2 %v3927_v10 }
 0xaae   :  { %v3938_v17 = vmax.f32 %v3849_v30, %v3901_v27  ;;  %v3902_v62 = vsel %vm1026_vm2, %v3899_v35, %v3901_v27  ;;  %v3872_v35 = vsel %vm1026_vm2, %v3869_v48, %v3871_v34  ;;  %4059 = vperm.xlu0 %6777, %v3751_v22  }
 0xaaf   :  { %3979 = vmatpush.msra.mxu2 %v3926_v63  ;;  %v3937_v60 = vmax.f32 %v9360_v44, %v3902_v62  ;;  %v3870_v44 = vsel %vm1026_vm2, %v3868_v7, %v3869_v48  ;;  %v3922_v28 = vmax.f32 %v3833_v51, %v3872_v35  ;;  %4084 = vperm.xlu1 %6778, %v3756_v24  }
 0xab0   :  { %6287 = vmatpush.msk.msrb.mxu3 %vm1026_vm2, %v3938_v17  ;;  %v3921_v15 = vmax.f32 %v3832_v46, %v3870_v44  ;;  %4079 = vperm.xlu2 %6779, %v3755_v59  }
 0xab1   :  { %3980 = vmatpush.msra.mxu2 %v3925_v1 }
 0xab2   :  { %4028 = vmatpush.msrb.mxu3 %v3937_v60 }
 0xab3   :  { %3981 = vmatpush.msra.mxu2 %v3924_v56  ;;  %6288 = vmatmul.msk.f32.vlgmr.msrb.gmra.mxu3 %vm1098_vm3, %v3731_v4 }
 0xab5   :  { %3982 = vmatpush.msra.mxu2 %v3923_v54 }
 0xab7   :  { %3983 = vmatpush.msra.mxu2 %v3922_v28  ;;  %4069 = vperm.xlu1 %6778, %v3753_v52  }
 0xab8   :  { %4064 = vperm.xlu2 %6779, %v3752_v20  }
 0xab9   :  { %3984 = vmatpush.msra.mxu2 %v3921_v15 }
 0xaba   :  { %3985 = vmatmul.f32.vlgmr.msra.gmra.mxu2 %v3730_v21 }
 0xabb   :  { %6289 = vmatmul.msk.f32.gmra.mxu3 %vm1098_vm3, %v3733_v11 }
 0xac2   :  { %3988 = vmatmul.f32.gmra.mxu2 %v3732_v26 }
 0xac3   :  { %6290 = vmatmul.msk.f32.gmra.mxu3 %vm1098_vm3, %v3735_v47 }
 0xaca   :  { %3991 = vmatmul.f32.gmra.mxu2 %v3734_v0 }
 0xacb   :  { %6291 = vmatmul.msk.f32.gmra.mxu3 %vm1098_vm3, %v3737_v25 }
 0xad2   :  { %3994 = vmatmul.f32.gmra.mxu2 %v3736_v43 }
 0xad3   :  { %6292 = vmatmul.msk.f32.gmra.mxu3 %vm1098_vm3, %v3739_v2 }
 0xada   :  { %3997 = vmatmul.f32.gmra.mxu2 %v3738_v31 }
 0xadb   :  { %6293 = vmatmul.msk.f32.gmra.mxu3 %vm1098_vm3, %v3741_v37 }
 0xae2   :  { %4000 = vmatmul.f32.gmra.mxu2 %v3740_v9 }
 0xae3   :  { %6294 = vmatmul.msk.f32.gmra.mxu3 %vm1098_vm3, %v3743_v14 }
 0xaea   :  { %4003 = vmatmul.f32.gmra.mxu2 %v3742_v13 }
 0xaeb   :  { %6295 = vmatmul.msk.f32.gmra.mxu3 %vm1098_vm3, %v3745_v38 }
 0xaf2   :  { %4006 = vmatmul.f32.gmra.mxu2 %v3744_v19 }
 0xaf3   :  { %6296 = vmatmul.msk.f32.gmra.mxu3 %vm1098_vm3, %v3747_v32 }
 0xafa   :  { %4009 = vmatmul.f32.gmra.mxu2 %v3746_v18 }
 0xb02   :  { %v4090_v54 = vpop.permute.xlu2 %4089 }
 0xb0a   :  { %v4080_v11 = vpop.permute.xlu2 %4079 }
 0xb10   :  { %v4100_v35 = vpop.permute.xlu0 %4099 }
 0xb12   :  { %v4065_v24 = vpop.permute.xlu2 %4064 }
 0xb18   :  { %v4075_v28 = vpop.permute.xlu0 %4074 }
 0xb19   :  { %v4095_v25 = vpop.permute.xlu1 %4094 }
 0xb20   :  { %v4060_v19 = vpop.permute.xlu0 %4059 }
 0xb21   :  { %v4085_v31 = vpop.permute.xlu1 %4084 }
 0xb29   :  { %v4070_v5 = vpop.permute.xlu1 %4069 }
 0xb36   :  { %v4030_v45 = vpop.f32.mrf.mxu3 }
 0xb3d   :  { %v3986_v3 = vpop.f32.mrf.mxu2 }
 0xb3e   :  { %v4031_v55 = vadd.f32 %v4030_v45, %v3986_v3  ;;  %v4033_v57 = vpop.f32.mrf.mxu3 }
 0xb40   :  { %6298 = vmatmul.msk.f32.vlgmr.msrb.gmra.mxu1 %vm1262_vm4, %v4031_v55 }
 0xb45   :  { %v3989_v12 = vpop.f32.mrf.mxu2 }
 0xb46   :  { %v4034_v8 = vadd.f32 %v4033_v57, %v3989_v12  ;;  %v4036_v40 = vpop.f32.mrf.mxu3 }
 0xb48   :  { %6299 = vmatmul.msk.f32.gmra.mxu1 %vm1262_vm4, %v4034_v8 }
 0xb4d   :  { %v3992_v36 = vpop.f32.mrf.mxu2 }
 0xb4e   :  { %v4037_v23 = vadd.f32 %v4036_v40, %v3992_v36  ;;  %v4039_v42 = vpop.f32.mrf.mxu3 }
 0xb50   :  { %6300 = vmatmul.msk.f32.gmra.mxu1 %vm1262_vm4, %v4037_v23 }
 0xb55   :  { %v3995_v51 = vpop.f32.mrf.mxu2 }
 0xb56   :  { %v4040_v49 = vadd.f32 %v4039_v42, %v3995_v51  ;;  %v4042_v30 = vpop.f32.mrf.mxu3  ;;  %v4185_v42 = vld [vmem:[%s10324_s2] sm:$0xff] }
 0xb58   :  { %6301 = vmatmul.msk.f32.gmra.mxu1 %vm1262_vm4, %v4040_v49 }
 0xb5d   :  { %v3998_v50 = vpop.f32.mrf.mxu2 }
 0xb5e   :  { %v4043_v10 = vadd.f32 %v4042_v30, %v3998_v50  ;;  %v4045_v34 = vpop.f32.mrf.mxu3 }
 0xb60   :  { %6302 = vmatmul.msk.f32.gmra.mxu1 %vm1262_vm4, %v4043_v10  ;;  %v4186_v10 = vld [vmem:[%s10324_s2 + $0x8] sm:$0xff] }
 0xb65   :  { %v4001_v27 = vpop.f32.mrf.mxu2 }
 0xb66   :  { %v4046_v61 = vadd.f32 %v4045_v34, %v4001_v27  ;;  %v4048_v46 = vpop.f32.mrf.mxu3 }
 0xb68   :  { %6303 = vmatmul.msk.f32.gmra.mxu1 %vm1262_vm4, %v4046_v61 }
 0xb6d   :  { %v4004_v63 = vpop.f32.mrf.mxu2 }
 0xb6e   :  { %v4049_v48 = vadd.f32 %v4048_v46, %v4004_v63  ;;  %v4051_v17 = vpop.f32.mrf.mxu3 }
 0xb70   :  { %6304 = vmatmul.msk.f32.gmra.mxu1 %vm1262_vm4, %v4049_v48 }
 0xb75   :  { %v4007_v62 = vpop.f32.mrf.mxu2 }
 0xb76   :  { %v4052_v16 = vadd.f32 %v4051_v17, %v4007_v62  ;;  %v4054_v1 = vpop.f32.mrf.mxu3 }
 0xb78   :  { %6305 = vmatmul.msk.f32.gmra.mxu1 %vm1262_vm4, %v4052_v16 }
 0xb7d   :  { %v4010_v60 = vpop.f32.mrf.mxu2 }
 0xb7e   :  { %v4055_v53 = vadd.f32 %v4054_v1, %v4010_v60 }
 0xb80   :  { %6306 = vmatmul.msk.f32.gmra.mxu1 %vm1262_vm4, %v4055_v53  ;;  %v4187_v53 = vld [vmem:[%s10324_s2 + $0x10] sm:$0xff] }
 0xbbd   :  { %v4149_v4 = vpop.f32.mrf.mxu1 }
 0xbbe   :  { %v4150_v18 = vadd.f32 %v4149_v4, %v4060_v19  ;;  %v4190_v19 = vld [vmem:[%s10324_s2 + $0x28] sm:$0xff] }
 0xbc0   :  { %v4176_v33 = vmax.f32 %v4150_v18, 0.0 }
 0xbc5   :  { %v4152_v56 = vpop.f32.mrf.mxu1 }
 0xbc6   :  { %v4153_v57 = vadd.f32 %v4152_v56, %v4065_v24  ;;  %v4191_v24 = vld [vmem:[%s10324_s2 + $0x30] sm:$0xff] }
 0xbc8   :  { %v4177_v39 = vmax.f32 %v4153_v57, 0.0  ;;  %v6310_v57 = vld [vmem:[%s10324_s2 + $0x98] sm:$0xff] }
 0xbcd   :  { %v4155_v7 = vpop.f32.mrf.mxu1 }
 0xbce   :  { %v4156_v3 = vadd.f32 %v4155_v7, %v4070_v5 }
 0xbd0   :  { %v4178_v52 = vmax.f32 %v4156_v3, 0.0 }
 0xbd2   :  { %v6795_v12 = vpack.i.bf16 %v4177_v39, %v4178_v52 }
 0xbd5   :  { %v4158_v44 = vpop.f32.mrf.mxu1 }
 0xbd6   :  { %v4159_v15 = vadd.f32 %v4158_v44, %v4075_v28 }
 0xbd8   :  { %v4179_v47 = vmax.f32 %v4159_v15, 0.0  ;;  %v4188_v15 = vld [vmem:[%s10324_s2 + $0x18] sm:$0xff] }
 0xbdd   :  { %v4161_v21 = vpop.f32.mrf.mxu1 }
 0xbde   :  { %v4162_v26 = vadd.f32 %v4161_v21, %v4080_v11 }
 0xbe0   :  { %v4180_v0 = vmax.f32 %v4162_v26, 0.0  ;;  %v6307_v26 = vld [vmem:[%s10324_s2 + $0x80] sm:$0xff] }
 0xbe2   :  { %v6790_v43 = vpack.i.bf16 %v4179_v47, %v4180_v0 }
 0xbe4   :  { %6791 = vrot.lane.b32.xlu0 %v6790_v43, %s6946_s24 }
 0xbe5   :  { %v4164_v2 = vpop.f32.mrf.mxu1 }
 0xbe6   :  { %v4165_v37 = vadd.f32 %v4164_v2, %v4085_v31 }
 0xbe8   :  { %v4181_v14 = vmax.f32 %v4165_v37, 0.0  ;;  %v6308_v37 = vld [vmem:[%s10324_s2 + $0x88] sm:$0xff] }
 0xbed   :  { %v4167_v6 = vpop.f32.mrf.mxu1 }
 0xbee   :  { %v4168_v9 = vadd.f32 %v4167_v6, %v4090_v54  ;;  %v6387_v6 = vld [vmem:[%s10324_s2 + $0x180] sm:$0xff] }
 0xbf0   :  { %v4182_v13 = vmax.f32 %v4168_v9, 0.0 }
 0xbf2   :  { %v6800_v38 = vpack.i.bf16 %v4181_v14, %v4182_v13 }
 0xbf4   :  { %6801 = vrot.lane.b32.xlu0 %v6800_v38, %s6949_s29  ;;  %6786 = vrot.lane.b32.xlu2 %v6800_v38, %s6946_s24 }
 0xbf5   :  { %v4170_v32 = vpop.f32.mrf.mxu1 }
 0xbf6   :  { %v4171_v29 = vadd.f32 %v4170_v32, %v4095_v25 }
 0xbf8   :  { %v4183_v22 = vmax.f32 %v4171_v29, 0.0  ;;  %v6309_v29 = vld [vmem:[%s10324_s2 + $0x90] sm:$0xff] }
 0xbfc   :  { %6816 = vrot.lane.b32.xlu0 %v6790_v43, %s6949_s29  ;;  %4226 = vrot.lane.b32.xlu2 %v4176_v33, %s6946_s24 }
 0xbfd   :  { %v4173_v41 = vpop.f32.mrf.mxu1 }
 0xbfe   :  { %v4174_v58 = vadd.f32 %v4173_v41, %v4100_v35  ;;  %v6388_v41 = vld [vmem:[%s10324_s2 + $0x188] sm:$0xff] }
 0xc00   :  { %v4184_v45 = vmax.f32 %v4174_v58, 0.0 }
 0xc02   :  { %4421 = vmatpush.msra.mxu3 %v4184_v45  ;;  %v6780_v55 = vpack.i.bf16 %v4183_v22, %v4184_v45 }
 0xc04   :  { %6781 = vrot.lane.b32.xlu1 %v6780_v55, %s6946_s24  ;;  %4422 = vmatpush.msra.mxu3 %v4183_v22 }
 0xc05   :  { %6831 = vrot.lane.b32.xlu0 %v6780_v55, %s6949_s29  ;;  %6811 = vrot.lane.b32.xlu2 %v6800_v38, %s6948_s28 }
 0xc06   :  { %4423 = vmatpush.msra.mxu3 %v4182_v13 }
 0xc08   :  { %4424 = vmatpush.msra.mxu3 %v4181_v14 }
 0xc0a   :  { %4425 = vmatpush.msra.mxu3 %v4180_v0 }
 0xc0c   :  { %4426 = vmatpush.msra.mxu3 %v4179_v47  ;;  %6796 = vrot.lane.b32.xlu1 %v6795_v12, %s6946_s24 }
 0xc0d   :  { %6826 = vrot.lane.b32.xlu2 %v6790_v43, %s6948_s28  ;;  %6836 = vrot.lane.b32.xlu0 %v6795_v12, %s6949_s29 }
 0xc0e   :  { %4427 = vmatpush.msra.mxu3 %v4178_v52  ;;  %v6389_v52 = vld [vmem:[%s10324_s2 + $0x190] sm:$0xff] }
 0xc10   :  { %4428 = vmatpush.msra.mxu3 %v4177_v39 }
 0xc12   :  { %4429 = vmatpush.msra.mxu3 %v4176_v33 }
 0xc13   :  { %6339 = vmatmul.msk.f32.vlgmr.msra.gmra.mxu3 %vm1415_vm5, %v4185_v42 }
 0xc14   :  { %6806 = vrot.lane.b32.xlu1 %v6800_v38, %s6947_s27 }
 0xc15   :  { %6851 = vrot.lane.b32.xlu2 %v6780_v55, %s6948_s28  ;;  %4839 = vrot.lane.b32.xlu0 %v4176_v33, %s6949_s29 }
 0xc1b   :  { %6340 = vmatmul.msk.f32.gmra.mxu3 %vm1415_vm5, %v4186_v10  ;;  %v6313_v10 = vld [vmem:[%s10324_s2 + $0xb0] sm:$0xff] }
 0xc1c   :  { %6821 = vrot.lane.b32.xlu1 %v6790_v43, %s6947_s27  ;;  %v4189_v43 = vld [vmem:[%s10324_s2 + $0x20] sm:$0xff] }
 0xc1d   :  { %6856 = vrot.lane.b32.xlu2 %v6795_v12, %s6948_s28 }
 0xc23   :  { %6341 = vmatmul.msk.f32.gmra.mxu3 %vm1415_vm5, %v4187_v53  ;;  %v6316_v53 = vld [vmem:[%s10324_s2 + $0xc8] sm:$0xff] }
 0xc24   :  { %6841 = vrot.lane.b32.xlu1 %v6780_v55, %s6947_s27 }
 0xc25   :  { %4667 = vrot.lane.b32.xlu2 %v4176_v33, %s6948_s28 }
 0xc2b   :  { %6342 = vmatmul.msk.f32.gmra.mxu3 %vm1415_vm5, %v4188_v15  ;;  %v6318_v15 = vld [vmem:[%s10324_s2 + $0xd8] sm:$0xff] }
 0xc2c   :  { %6846 = vrot.lane.b32.xlu1 %v6795_v12, %s6947_s27 }
 0xc33   :  { %6343 = vmatmul.msk.f32.gmra.mxu3 %vm1415_vm5, %v4189_v43  ;;  %v6320_v43 = vld [vmem:[%s10324_s2 + $0xe8] sm:$0xff] }
 0xc34   :  { %4495 = vrot.lane.b32.xlu1 %v4176_v33, %s6947_s27 }
 0xc3b   :  { %6344 = vmatmul.msk.f32.gmra.mxu3 %vm1415_vm5, %v4190_v19  ;;  %v6401_v19 = vld [vmem:[%s10324_s2 + $0x1f0] sm:$0xff] }
 0xc43   :  { %6345 = vmatmul.msk.f32.gmra.mxu3 %vm1415_vm5, %v4191_v24 }
 0xc4e   :  { %v6787_v8 = vpop.permute.xlu2 %6786 }
 0xc4f   :  { %v6788_v62 = vunpack.i.l.bf16 %v6787_v8  ;;  %v6789_v60 = vunpack.i.h.bf16 %v6787_v8 }
 0xc56   :  { %v4227_v40 = vpop.permute.xlu2 %4226  ;;  %v6792_v23 = vpop.permute.xlu0 %6791 }
 0xc57   :  { %v6793_v7 = vunpack.i.l.bf16 %v6792_v23  ;;  %v6794_v35 = vunpack.i.h.bf16 %v6792_v23  ;;  %v6390_v23 = vld [vmem:[%s10324_s2 + $0x198] sm:$0xff] }
 0xc5f   :  { %v6812_v59 = vpop.permute.xlu2 %6811 }
 0xc60   :  { %v6813_v50 = vunpack.i.l.bf16 %v6812_v59  ;;  %v6814_v34 = vunpack.i.h.bf16 %v6812_v59  ;;  %v6311_v59 = vld [vmem:[%s10324_s2 + $0xa0] sm:$0xff] }
 0xc66   :  { %v9533_v49 = vpop.permute.xlu0 %6801 }
 0xc67   :  { %v6827_v36 = vpop.permute.xlu2 %6826  ;;  %v6803_v25 = vunpack.i.l.bf16 %v9533_v49  ;;  %v6804_v31 = vunpack.i.h.bf16 %v9533_v49  ;;  %v6356_v49 = vld [vmem:[%s10324_s2 + $0x108] sm:$0xff] }
 0xc68   :  { %v6828_v63 = vunpack.i.l.bf16 %v6827_v36  ;;  %v6829_v17 = vunpack.i.h.bf16 %v6827_v36  ;;  %v6355_v36 = vld [vmem:[%s10324_s2 + $0x100] sm:$0xff] }
 0xc6e   :  { %v6817_v16 = vpop.permute.xlu0 %6816 }
 0xc6f   :  { %v6852_v20 = vpop.permute.xlu2 %6851  ;;  %v6818_v14 = vunpack.i.l.bf16 %v6817_v16  ;;  %v6819_v13 = vunpack.i.h.bf16 %v6817_v16  ;;  %v6359_v16 = vld [vmem:[%s10324_s2 + $0x120] sm:$0xff] }
 0xc70   :  { %v6853_v51 = vunpack.i.l.bf16 %v6852_v20  ;;  %v6854_v30 = vunpack.i.h.bf16 %v6852_v20  ;;  %v4193_v20 = vld [vmem:[%s10324_s2 + $0x40] sm:$0xff] }
 0xc72   :  { %4749 = vmatpush.msra.mxu0 %v6853_v51  ;;  %v6312_v51 = vld [vmem:[%s10324_s2 + $0xa8] sm:$0xff] }
 0xc74   :  { %4750 = vmatpush.msra.mxu0 %v6854_v30  ;;  %v6391_v30 = vld [vmem:[%s10324_s2 + $0x1a0] sm:$0xff] }
 0xc76   :  { %4751 = vmatpush.msra.mxu0 %v6813_v50  ;;  %v6782_v27 = vpop.permute.xlu1 %6781  ;;  %v4194_v50 = vld [vmem:[%s10324_s2 + $0x48] sm:$0xff] }
 0xc77   :  { %v6857_v61 = vpop.permute.xlu2 %6856  ;;  %v6783_v46 = vunpack.i.l.bf16 %v6782_v27  ;;  %v6784_v48 = vunpack.i.h.bf16 %v6782_v27  ;;  %v6832_v21 = vpop.permute.xlu0 %6831  ;;  %v6392_v27 = vld [vmem:[%s10324_s2 + $0x1a8] sm:$0xff] }
 0xc78   :  { %4752 = vmatpush.msra.mxu0 %v6814_v34  ;;  %v6858_v1 = vunpack.i.l.bf16 %v6857_v61  ;;  %v6859_v4 = vunpack.i.h.bf16 %v6857_v61  ;;  %v6833_v47 = vunpack.i.l.bf16 %v6832_v21  ;;  %v6834_v0 = vunpack.i.h.bf16 %v6832_v21  ;;  %v6357_v34 = vld [vmem:[%s10324_s2 + $0x110] sm:$0xff]  ;;  %v6362_v21 = vld [vmem:[%s10324_s2 + $0x138] sm:$0xff] }
 0xc79   :  { %4308 = vmatpush.msrb.mxu2 %v6783_v46  ;;  %v4195_v61 = vld [vmem:[%s10324_s2 + $0x50] sm:$0xff]  ;;  %v6314_v46 = vld [vmem:[%s10324_s2 + $0xb8] sm:$0xff] }
 0xc7a   :  { %4753 = vmatpush.msra.mxu0 %v6828_v63  ;;  %v6358_v63 = vld [vmem:[%s10324_s2 + $0x118] sm:$0xff] }
 0xc7b   :  { %4309 = vmatpush.msrb.mxu2 %v6784_v48  ;;  %v6393_v48 = vld [vmem:[%s10324_s2 + $0x1b0] sm:$0xff] }
 0xc7c   :  { %4754 = vmatpush.msra.mxu0 %v6829_v17  ;;  %v4196_v17 = vld [vmem:[%s10324_s2 + $0x58] sm:$0xff] }
 0xc7d   :  { %4310 = vmatpush.msrb.mxu2 %v6788_v62  ;;  %v6315_v62 = vld [vmem:[%s10324_s2 + $0xc0] sm:$0xff] }
 0xc7e   :  { %4755 = vmatpush.msra.mxu0 %v6858_v1  ;;  %v6797_v56 = vpop.permute.xlu1 %6796  ;;  %v6394_v1 = vld [vmem:[%s10324_s2 + $0x1b8] sm:$0xff] }
 0xc7f   :  { %4311 = vmatpush.msrb.mxu2 %v6789_v60  ;;  %v4668_v54 = vpop.permute.xlu2 %4667  ;;  %v6798_v44 = vunpack.i.l.bf16 %v6797_v56  ;;  %v6799_v28 = vunpack.i.h.bf16 %v6797_v56  ;;  %v6837_v9 = vpop.permute.xlu0 %6836  ;;  %v4197_v60 = vld [vmem:[%s10324_s2 + $0x60] sm:$0xff] }
 0xc80   :  { %4756 = vmatpush.msra.mxu0 %v6859_v4  ;;  %v6838_v38 = vunpack.i.l.bf16 %v6837_v9  ;;  %v6839_v18 = vunpack.i.h.bf16 %v6837_v9  ;;  %v6360_v4 = vld [vmem:[%s10324_s2 + $0x128] sm:$0xff]  ;;  %v6395_v56 = vld [vmem:[%s10324_s2 + $0x1c0] sm:$0xff] }
 0xc81   :  { %4312 = vmatpush.msrb.mxu2 %v6793_v7  ;;  %v4198_v7 = vld [vmem:[%s10324_s2 + $0x68] sm:$0xff] }
 0xc82   :  { %4757 = vmatpush.msra.mxu0 %v4668_v54  ;;  %v6361_v54 = vld [vmem:[%s10324_s2 + $0x130] sm:$0xff]  ;;  %v6400_v9 = vld [vmem:[%s10324_s2 + $0x1e8] sm:$0xff] }
 0xc83   :  { %4313 = vmatpush.msrb.mxu2 %v6794_v35  ;;  %6403 = vmatmul.msk.f32.vlgmr.msra.gmra.mxu0 %vm1415_vm5, %v6387_v6  ;;  %v6317_v35 = vld [vmem:[%s10324_s2 + $0xd0] sm:$0xff] }
 0xc84   :  { %v6365_v6 = vld [vmem:[%s10324_s2 + $0x150] sm:$0xff] }
 0xc85   :  { %4314 = vmatpush.msrb.mxu2 %v6798_v44  ;;  %v6396_v44 = vld [vmem:[%s10324_s2 + $0x1c8] sm:$0xff] }
 0xc86   :  { %v6807_v11 = vpop.permute.xlu1 %6806 }
 0xc87   :  { %4315 = vmatpush.msrb.mxu2 %v6799_v28  ;;  %v4840_v5 = vpop.permute.xlu0 %4839  ;;  %v6808_v22 = vunpack.i.l.bf16 %v6807_v11  ;;  %v6809_v45 = vunpack.i.h.bf16 %v6807_v11  ;;  %v4199_v28 = vld [vmem:[%s10324_s2 + $0x70] sm:$0xff] }
 0xc88   :  { %v6397_v11 = vld [vmem:[%s10324_s2 + $0x1d0] sm:$0xff] }
 0xc89   :  { %4316 = vmatpush.msrb.mxu2 %v4227_v40  ;;  %v4192_v40 = vld [vmem:[%s10324_s2 + $0x38] sm:$0xff] }
 0xc8a   :  { %6323 = vmatmul.msk.f32.vlgmr.msrb.gmra.mxu2 %vm1415_vm5, %v6307_v26  ;;  %6346 = vmatmul.msk.f32.gmra.mxu3 %vm1415_vm5, %v4192_v40  ;;  %v4200_v26 = vld [vmem:[%s10324_s2 + $0x78] sm:$0xff] }
 0xc8b   :  { %4921 = vmatpush.msra.mxu2 %v6833_v47  ;;  %6404 = vmatmul.msk.f32.gmra.mxu0 %vm1415_vm5, %v6388_v41  ;;  %v6319_v47 = vld [vmem:[%s10324_s2 + $0xe0] sm:$0xff]  ;;  %v6370_v40 = vld [vmem:[%s10324_s2 + $0x178] sm:$0xff] }
 0xc8d   :  { %4922 = vmatpush.msra.mxu2 %v6834_v0  ;;  %v6363_v0 = vld [vmem:[%s10324_s2 + $0x140] sm:$0xff] }
 0xc8e   :  { %v6822_v2 = vpop.permute.xlu1 %6821 }
 0xc8f   :  { %4923 = vmatpush.msra.mxu2 %v6803_v25  ;;  %v6823_v55 = vunpack.i.l.bf16 %v6822_v2  ;;  %v6824_v39 = vunpack.i.h.bf16 %v6822_v2  ;;  %v6398_v25 = vld [vmem:[%s10324_s2 + $0x1d8] sm:$0xff]  ;;  %v6364_v2 = vld [vmem:[%s10324_s2 + $0x148] sm:$0xff] }
 0xc91   :  { %4924 = vmatpush.msra.mxu2 %v6804_v31  ;;  %v6399_v31 = vld [vmem:[%s10324_s2 + $0x1e0] sm:$0xff] }
 0xc92   :  { %6324 = vmatmul.msk.f32.gmra.mxu2 %vm1415_vm5, %v6308_v37  ;;  %6347 = vmatmul.msk.f32.gmra.mxu3 %vm1415_vm5, %v4193_v20  ;;  %v6321_v37 = vld [vmem:[%s10324_s2 + $0xf0] sm:$0xff] }
 0xc93   :  { %4925 = vmatpush.msra.mxu2 %v6818_v14  ;;  %6405 = vmatmul.msk.f32.gmra.mxu0 %vm1415_vm5, %v6389_v52 }
 0xc95   :  { %4926 = vmatpush.msra.mxu2 %v6819_v13  ;;  %v6322_v13 = vld [vmem:[%s10324_s2 + $0xf8] sm:$0xff] }
 0xc96   :  { %v6842_v32 = vpop.permute.xlu1 %6841  ;;  %v4431_v14 = vpop.f32.mrf.mxu3 }
 0xc97   :  { %v6843_v33 = vunpack.i.l.bf16 %v6842_v32  ;;  %4927 = vmatpush.msra.mxu2 %v6838_v38  ;;  %v6844_v58 = vunpack.i.h.bf16 %v6842_v32  ;;  %v6366_v38 = vld [vmem:[%s10324_s2 + $0x158] sm:$0xff]  ;;  %v6419_v32 = vld [vmem:[%s10324_s2 + $0x200] sm:$0xff] }
 0xc99   :  { %4928 = vmatpush.msra.mxu2 %v6839_v18  ;;  %4577 = vmatpush.msra.mxu1 %v6843_v33  ;;  %v6367_v18 = vld [vmem:[%s10324_s2 + $0x160] sm:$0xff]  ;;  %v6402_v33 = vld [vmem:[%s10324_s2 + $0x1f8] sm:$0xff] }
 0xc9a   :  { %6325 = vmatmul.msk.f32.gmra.mxu2 %vm1415_vm5, %v6309_v29  ;;  %6348 = vmatmul.msk.f32.gmra.mxu3 %vm1415_vm5, %v4194_v50 }
 0xc9b   :  { %4929 = vmatpush.msra.mxu2 %v4840_v5  ;;  %4578 = vmatpush.msra.mxu1 %v6844_v58  ;;  %v6420_v58 = vld [vmem:[%s10324_s2 + $0x208] sm:$0xff] }
 0xc9c   :  { %6406 = vmatmul.msk.f32.gmra.mxu0 %vm1415_vm5, %v6390_v23  ;;  %v6368_v5 = vld [vmem:[%s10324_s2 + $0x168] sm:$0xff] }
 0xc9d   :  { %4579 = vmatpush.msra.mxu1 %v6808_v22 }
 0xc9e   :  { %v6847_v3 = vpop.permute.xlu1 %6846  ;;  %v4434_v29 = vpop.f32.mrf.mxu3 }
 0xc9f   :  { %4580 = vmatpush.msra.mxu1 %v6809_v45  ;;  %v6848_v12 = vunpack.i.l.bf16 %v6847_v3  ;;  %v6849_v8 = vunpack.i.h.bf16 %v6847_v3  ;;  %v6421_v3 = vld [vmem:[%s10324_s2 + $0x210] sm:$0xff] }
 0xca1   :  { %4581 = vmatpush.msra.mxu1 %v6823_v55  ;;  %v6369_v55 = vld [vmem:[%s10324_s2 + $0x170] sm:$0xff] }
 0xca2   :  { %6326 = vmatmul.msk.f32.gmra.mxu2 %vm1415_vm5, %v6310_v57  ;;  %6349 = vmatmul.msk.f32.gmra.mxu3 %vm1415_vm5, %v4195_v61  ;;  %v6424_v61 = vld [vmem:[%s10324_s2 + $0x228] sm:$0xff] }
 0xca3   :  { %4582 = vmatpush.msra.mxu1 %v6824_v39 }
 0xca4   :  { %6407 = vmatmul.msk.f32.gmra.mxu0 %vm1415_vm5, %v6391_v30 }
 0xca5   :  { %4583 = vmatpush.msra.mxu1 %v6848_v12 }
 0xca6   :  { %v4496_v42 = vpop.permute.xlu1 %4495  ;;  %v4437_v22 = vpop.f32.mrf.mxu3 }
 0xca7   :  { %4584 = vmatpush.msra.mxu1 %v6849_v8  ;;  %v6422_v8 = vld [vmem:[%s10324_s2 + $0x218] sm:$0xff] }
 0xca9   :  { %4585 = vmatpush.msra.mxu1 %v4496_v42 }
 0xcaa   :  { %6327 = vmatmul.msk.f32.gmra.mxu2 %vm1415_vm5, %v6311_v59  ;;  %6371 = vmatmul.msk.f32.vlgmr.msra.gmra.mxu1 %vm1415_vm5, %v6355_v36 }
 0xcab   :  { %6350 = vmatmul.msk.f32.gmra.mxu3 %vm1415_vm5, %v4196_v17 }
 0xcac   :  { %6408 = vmatmul.msk.f32.gmra.mxu0 %vm1415_vm5, %v6392_v27 }
 0xcae   :  { %v4440_v52 = vpop.f32.mrf.mxu3 }
 0xcb2   :  { %6328 = vmatmul.msk.f32.gmra.mxu2 %vm1415_vm5, %v6312_v51  ;;  %6372 = vmatmul.msk.f32.gmra.mxu1 %vm1415_vm5, %v6356_v49  ;;  %v6423_v51 = vld [vmem:[%s10324_s2 + $0x220] sm:$0xff] }
 0xcb3   :  { %6351 = vmatmul.msk.f32.gmra.mxu3 %vm1415_vm5, %v4197_v60 }
 0xcb4   :  { %6409 = vmatmul.msk.f32.gmra.mxu0 %vm1415_vm5, %v6393_v48 }
 0xcb6   :  { %v4443_v23 = vpop.f32.mrf.mxu3 }
 0xcba   :  { %6329 = vmatmul.msk.f32.gmra.mxu2 %vm1415_vm5, %v6313_v10  ;;  %6373 = vmatmul.msk.f32.gmra.mxu1 %vm1415_vm5, %v6357_v34 }
 0xcbb   :  { %6352 = vmatmul.msk.f32.gmra.mxu3 %vm1415_vm5, %v4198_v7 }
 0xcbc   :  { %6410 = vmatmul.msk.f32.gmra.mxu0 %vm1415_vm5, %v6394_v1  ;;  %v6425_v1 = vld [vmem:[%s10324_s2 + $0x230] sm:$0xff] }
 0xcc2   :  { %6330 = vmatmul.msk.f32.gmra.mxu2 %vm1415_vm5, %v6314_v46  ;;  %6374 = vmatmul.msk.f32.gmra.mxu1 %vm1415_vm5, %v6358_v63  ;;  %v4446_v63 = vpop.f32.mrf.mxu3 }
 0xcc3   :  { %6353 = vmatmul.msk.f32.gmra.mxu3 %vm1415_vm5, %v4199_v28 }
 0xcc4   :  { %6411 = vmatmul.msk.f32.gmra.mxu0 %vm1415_vm5, %v6395_v56 }
 0xcca   :  { %6331 = vmatmul.msk.f32.gmra.mxu2 %vm1415_vm5, %v6315_v62  ;;  %6375 = vmatmul.msk.f32.gmra.mxu1 %vm1415_vm5, %v6359_v16  ;;  %v9818_v56 = vpop.f32.mrf.mxu3 }
 0xccb   :  { %6354 = vmatmul.msk.f32.gmra.mxu3 %vm1415_vm5, %v4200_v26 }
 0xccc   :  { %6412 = vmatmul.msk.f32.gmra.mxu0 %vm1415_vm5, %v6396_v44 }
 0xcd2   :  { %6332 = vmatmul.msk.f32.gmra.mxu2 %vm1415_vm5, %v6316_v53  ;;  %6376 = vmatmul.msk.f32.gmra.mxu1 %vm1415_vm5, %v6360_v4 }
 0xcd4   :  { %6413 = vmatmul.msk.f32.gmra.mxu0 %vm1415_vm5, %v6397_v11 }
 0xcda   :  { %6333 = vmatmul.msk.f32.gmra.mxu2 %vm1415_vm5, %v6317_v35  ;;  %6377 = vmatmul.msk.f32.gmra.mxu1 %vm1415_vm5, %v6361_v54  ;;  %v6426_v54 = vld [vmem:[%s10324_s2 + $0x238] sm:$0xff] }
 0xcdc   :  { %6414 = vmatmul.msk.f32.gmra.mxu0 %vm1415_vm5, %v6398_v25 }
 0xce2   :  { %6334 = vmatmul.msk.f32.gmra.mxu2 %vm1415_vm5, %v6318_v15  ;;  %6378 = vmatmul.msk.f32.gmra.mxu1 %vm1415_vm5, %v6362_v21 }
 0xce4   :  { %6415 = vmatmul.msk.f32.gmra.mxu0 %vm1415_vm5, %v6399_v31 }
 0xcea   :  { %6335 = vmatmul.msk.f32.gmra.mxu2 %vm1415_vm5, %v6319_v47  ;;  %6379 = vmatmul.msk.f32.gmra.mxu1 %vm1415_vm5, %v6363_v0  ;;  %v6427_v0 = vld [vmem:[%s10324_s2 + $0x240] sm:$0xff] }
 0xcec   :  { %6416 = vmatmul.msk.f32.gmra.mxu0 %vm1415_vm5, %v6400_v9 }
 0xcf2   :  { %6336 = vmatmul.msk.f32.gmra.mxu2 %vm1415_vm5, %v6320_v43  ;;  %6380 = vmatmul.msk.f32.gmra.mxu1 %vm1415_vm5, %v6364_v2 }
 0xcf4   :  { %6417 = vmatmul.msk.f32.gmra.mxu0 %vm1415_vm5, %v6401_v19 }
 0xcfa   :  { %6337 = vmatmul.msk.f32.gmra.mxu2 %vm1415_vm5, %v6321_v37  ;;  %6381 = vmatmul.msk.f32.gmra.mxu1 %vm1415_vm5, %v6365_v6  ;;  %v6428_v6 = vld [vmem:[%s10324_s2 + $0x248] sm:$0xff] }
 0xcfc   :  { %6418 = vmatmul.msk.f32.gmra.mxu0 %vm1415_vm5, %v6402_v33 }
 0xd00   :  { %v4759_v57 = vpop.f32.mrf.mxu0 }
 0xd02   :  { %6338 = vmatmul.msk.f32.gmra.mxu2 %vm1415_vm5, %v6322_v13  ;;  %6382 = vmatmul.msk.f32.gmra.mxu1 %vm1415_vm5, %v6366_v38 }
 0xd08   :  { %v4762_v59 = vpop.f32.mrf.mxu0 }
 0xd0a   :  { %6435 = vmatmul.msk.f32.vlgmr.msra.gmra.mxu2 %vm1415_vm5, %v6419_v32  ;;  %6383 = vmatmul.msk.f32.gmra.mxu1 %vm1415_vm5, %v6367_v18  ;;  %v6429_v32 = vld [vmem:[%s10324_s2 + $0x250] sm:$0xff] }
 0xd0d   :  { %v4318_v41 = vpop.f32.mrf.mxu2  ;;  %v4452_v11 = vpop.f32.mrf.mxu3 }
 0xd0e   :  { %v4432_v42 = vadd.f32 %v4431_v14, %v4318_v41 }
 0xd10   :  { %v4765_v34 = vpop.f32.mrf.mxu0 }
 0xd12   :  { %6436 = vmatmul.msk.f32.gmra.mxu2 %vm1415_vm5, %v6420_v58  ;;  %6384 = vmatmul.msk.f32.gmra.mxu1 %vm1415_vm5, %v6368_v5 }
 0xd15   :  { %v4321_v45 = vpop.f32.mrf.mxu2 }
 0xd16   :  { %v4435_v24 = vadd.f32 %v4434_v29, %v4321_v45  ;;  %v6430_v29 = vld [vmem:[%s10324_s2 + $0x258] sm:$0xff] }
 0xd19   :  { %v4768_v53 = vpop.f32.mrf.mxu0 }
 0xd1a   :  { %6437 = vmatmul.msk.f32.gmra.mxu2 %vm1415_vm5, %v6421_v3  ;;  %6385 = vmatmul.msk.f32.gmra.mxu1 %vm1415_vm5, %v6369_v55  ;;  %v6432_v55 = vld [vmem:[%s10324_s2 + $0x268] sm:$0xff] }
 0xd1d   :  { %v4324_v39 = vpop.f32.mrf.mxu2 }
 0xd1e   :  { %v4438_v12 = vadd.f32 %v4437_v22, %v4324_v39 }
 0xd21   :  { %v4771_v15 = vpop.f32.mrf.mxu0 }
 0xd22   :  { %6438 = vmatmul.msk.f32.gmra.mxu2 %vm1415_vm5, %v6422_v8  ;;  %6386 = vmatmul.msk.f32.gmra.mxu1 %vm1415_vm5, %v6370_v40 }
 0xd25   :  { %v4327_v36 = vpop.f32.mrf.mxu2 }
 0xd26   :  { %v4441_v20 = vadd.f32 %v4440_v52, %v4327_v36  ;;  %v6433_v52 = vld [vmem:[%s10324_s2 + $0x270] sm:$0xff] }
 0xd27   :  { %v4587_v49 = vpop.f32.mrf.mxu1 }
 0xd28   :  { %v4635_v30 = vadd.f32 %v4587_v49, %v4432_v42 }
 0xd29   :  { %v4774_v31 = vpop.f32.mrf.mxu0 }
 0xd2a   :  { %6439 = vmatmul.msk.f32.gmra.mxu2 %vm1415_vm5, %v6423_v51  ;;  %v9809_v50 = vadd.f32 %v4759_v57, %v4635_v30 }
 0xd2d   :  { %v4330_v10 = vpop.f32.mrf.mxu2 }
 0xd2e   :  { %v4444_v27 = vadd.f32 %v4443_v23, %v4330_v10 }
 0xd2f   :  { %v4590_v46 = vpop.f32.mrf.mxu1 }
 0xd30   :  { %v4636_v48 = vadd.f32 %v4590_v46, %v4435_v24  ;;  %v6431_v24 = vld [vmem:[%s10324_s2 + $0x260] sm:$0xff] }
 0xd31   :  { %v9839_v19 = vpop.f32.mrf.mxu0 }
 0xd32   :  { %6440 = vmatmul.msk.f32.gmra.mxu2 %vm1415_vm5, %v6424_v61  ;;  %v4808_v17 = vadd.f32 %v4762_v59, %v4636_v48 }
 0xd35   :  { %v4333_v62 = vpop.f32.mrf.mxu2 }
 0xd36   :  { %v4447_v16 = vadd.f32 %v4446_v63, %v4333_v62 }
 0xd37   :  { %v4593_v60 = vpop.f32.mrf.mxu1 }
 0xd38   :  { %v4637_v4 = vadd.f32 %v4593_v60, %v4438_v12  ;;  %v6434_v12 = vld [vmem:[%s10324_s2 + $0x278] sm:$0xff] }
 0xd39   :  { %v4780_v58 = vpop.f32.mrf.mxu0 }
 0xd3a   :  { %6441 = vmatmul.msk.f32.gmra.mxu2 %vm1415_vm5, %v6425_v1  ;;  %v4809_v7 = vadd.f32 %v4765_v34, %v4637_v4  ;;  %v4455_v34 = vpop.f32.mrf.mxu3 }
 0xd3d   :  { %v9821_v35 = vpop.f32.mrf.mxu2 }
 0xd3f   :  { %v4596_v44 = vpop.f32.mrf.mxu1 }
 0xd40   :  { %v4638_v28 = vadd.f32 %v4596_v44, %v4441_v20 }
 0xd41   :  { %v4783_v63 = vpop.f32.mrf.mxu0 }
 0xd42   :  { %6442 = vmatmul.msk.f32.gmra.mxu2 %vm1415_vm5, %v6426_v54  ;;  %v4810_v21 = vadd.f32 %v4768_v53, %v4638_v28  ;;  %v9884_v48 = vpop.f32.mrf.mxu3 }
 0xd45   :  { %v4339_v26 = vpop.f32.mrf.mxu2 }
 0xd46   :  { %v4453_v47 = vadd.f32 %v4452_v11, %v4339_v26 }
 0xd47   :  { %v4599_v25 = vpop.f32.mrf.mxu1 }
 0xd48   :  { %v4639_v43 = vadd.f32 %v4599_v25, %v4444_v27 }
 0xd49   :  { %v9888_v62 = vpop.f32.mrf.mxu0 }
 0xd4a   :  { %6443 = vmatmul.msk.f32.gmra.mxu2 %vm1415_vm5, %v6427_v0  ;;  %v4811_v2 = vadd.f32 %v4771_v15, %v4639_v43  ;;  %v4461_v60 = vpop.f32.mrf.mxu3 }
 0xd4d   :  { %v9831_v37 = vpop.f32.mrf.mxu2 }
 0xd4f   :  { %v4602_v9 = vpop.f32.mrf.mxu1 }
 0xd50   :  { %v4640_v14 = vadd.f32 %v4602_v9, %v4447_v16 }
 0xd52   :  { %6444 = vmatmul.msk.f32.gmra.mxu2 %vm1415_vm5, %v6428_v6  ;;  %v4812_v13 = vadd.f32 %v4774_v31, %v4640_v14  ;;  %v4464_v54 = vpop.f32.mrf.mxu3  ;;  %v4450_v14 = vadd.f32 %v9818_v56, %v9821_v35 }
 0xd55   :  { %v9837_v38 = vpop.f32.mrf.mxu2 }
 0xd57   :  { %v9844_v18 = vpop.f32.mrf.mxu1 }
 0xd5a   :  { %6445 = vmatmul.msk.f32.gmra.mxu2 %vm1415_vm5, %v6429_v32 }
 0xd5d   :  { %v9847_v33 = vpop.f32.mrf.mxu2 }
 0xd5f   :  { %v4608_v41 = vpop.f32.mrf.mxu1 }
 0xd60   :  { %v4642_v5 = vadd.f32 %v4608_v41, %v4453_v47 }
 0xd62   :  { %6446 = vmatmul.msk.f32.gmra.mxu2 %vm1415_vm5, %v6430_v29  ;;  %v4814_v22 = vadd.f32 %v4780_v58, %v4642_v5  ;;  %v4641_v58 = vadd.f32 %v9844_v18, %v4450_v14  ;;  %v5010_v14 = vld [vmem:[%s10330_s8 + $0x30] sm:$0xff] }
 0xd65   :  { %v4351_v45 = vpop.f32.mrf.mxu2 }
 0xd66   :  { %v4465_v25 = vadd.f32 %v4464_v54, %v4351_v45 }
 0xd67   :  { %v4611_v46 = vpop.f32.mrf.mxu1 }
 0xd6a   :  { %6447 = vmatmul.msk.f32.gmra.mxu2 %vm1415_vm5, %v6431_v24 }
 0xd6d   :  { %v4354_v3 = vpop.f32.mrf.mxu2 }
 0xd72   :  { %6448 = vmatmul.msk.f32.gmra.mxu2 %vm1415_vm5, %v6432_v55 }
 0xd75   :  { %v4357_v57 = vpop.f32.mrf.mxu2 }
 0xd7a   :  { %6449 = vmatmul.msk.f32.gmra.mxu2 %vm1415_vm5, %v6433_v52 }
 0xd7d   :  { %v4360_v39 = vpop.f32.mrf.mxu2 }
 0xd82   :  { %6450 = vmatmul.msk.f32.gmra.mxu2 %vm1415_vm5, %v6434_v12 }
 0xd85   :  { %v9869_v8 = vpop.f32.mrf.mxu2 }
 0xd8d   :  { %v4931_v40 = vpop.f32.mrf.mxu2 }
 0xd8e   :  { %v9872_v59 = vadd.f32 %v4931_v40, %v9809_v50 }
 0xd95   :  { %v4934_v36 = vpop.f32.mrf.mxu2 }
 0xd96   :  { %v9874_v23 = vadd.f32 %v4934_v36, %v4808_v17  ;;  %v9886_v17 = vpop.f32.mrf.mxu1 }
 0xd9d   :  { %v4937_v42 = vpop.f32.mrf.mxu2 }
 0xd9e   :  { %v9876_v20 = vadd.f32 %v4937_v42, %v4809_v7  ;;  %v4617_v53 = vpop.f32.mrf.mxu1  ;;  %v9892_v7 = vpop.f32.mrf.mxu0 }
 0xda5   :  { %v4940_v51 = vpop.f32.mrf.mxu2 }
 0xda6   :  { %v9878_v49 = vadd.f32 %v4940_v51, %v4810_v21  ;;  %v4620_v44 = vpop.f32.mrf.mxu1  ;;  %v4792_v15 = vpop.f32.mrf.mxu0 }
 0xda7   :  { %v4467_v21 = vpop.f32.mrf.mxu3  ;;  %v4646_v31 = vadd.f32 %v4620_v44, %v4465_v25 }
 0xda8   :  { %v4468_v43 = vadd.f32 %v4467_v21, %v4354_v3  ;;  %v4813_v3 = vadd.f32 %v9839_v19, %v4641_v58 }
 0xdad   :  { %v4943_v30 = vpop.f32.mrf.mxu2 }
 0xdae   :  { %v9880_v10 = vadd.f32 %v4943_v30, %v4811_v2  ;;  %v4623_v26 = vpop.f32.mrf.mxu1  ;;  %v4795_v47 = vpop.f32.mrf.mxu0  ;;  %v4456_v30 = vadd.f32 %v4455_v34, %v9831_v37  ;;  %v4459_v37 = vadd.f32 %v9884_v48, %v9837_v38 }
 0xdaf   :  { %v4470_v2 = vpop.f32.mrf.mxu3  ;;  %v4647_v6 = vadd.f32 %v4623_v26, %v4468_v43 }
 0xdb0   :  { %v4471_v52 = vadd.f32 %v4470_v2, %v4357_v57  ;;  %v4644_v43 = vadd.f32 %v9886_v17, %v4459_v37 }
 0xdb1   :  { %v4819_v32 = vadd.f32 %v4795_v47, %v4647_v6  ;;  %v5007_v6 = vld [vmem:[%s10330_s8 + $0x18] sm:$0xff] }
 0xdb2   :  { %v4816_v38 = vadd.f32 %v9888_v62, %v4644_v43  ;;  %v6885_v62 = vpack.i.bf16 %v9878_v49, %v9880_v10 }
 0xdb5   :  { %v4946_v27 = vpop.f32.mrf.mxu2 }
 0xdb6   :  { %v9882_v61 = vadd.f32 %v4946_v27, %v4812_v13  ;;  %v4626_v9 = vpop.f32.mrf.mxu1  ;;  %v4818_v13 = vadd.f32 %v4792_v15, %v4646_v31  ;;  %v4798_v29 = vpop.f32.mrf.mxu0  ;;  %v5008_v31 = vld [vmem:[%s10330_s8 + $0x20] sm:$0xff] }
 0xdb7   :  { %v4473_v24 = vpop.f32.mrf.mxu3  ;;  %v4648_v18 = vadd.f32 %v4626_v9, %v4471_v52  ;;  %v5011_v9 = vld [vmem:[%s10330_s8 + $0x38] sm:$0xff] }
 0xdb8   :  { %v4474_v12 = vadd.f32 %v4473_v24, %v4360_v39 }
 0xdb9   :  { %v4820_v19 = vadd.f32 %v4798_v29, %v4648_v18 }
 0xdbd   :  { %v4949_v50 = vpop.f32.mrf.mxu2 }
 0xdbe   :  { %v4629_v55 = vpop.f32.mrf.mxu1  ;;  %v9907_v56 = vadd.f32 %v4949_v50, %v4813_v3  ;;  %v4801_v40 = vpop.f32.mrf.mxu0  ;;  %v4643_v50 = vadd.f32 %v4611_v46, %v4456_v30 }
 0xdbf   :  { %v4649_v36 = vadd.f32 %v4629_v55, %v4474_v12  ;;  %v4476_v51 = vpop.f32.mrf.mxu3 }
 0xdc0   :  { %v6880_v42 = vpack.i.bf16 %v9882_v61, %v9907_v56  ;;  %v4477_v44 = vadd.f32 %v4476_v51, %v9869_v8  ;;  %v4815_v47 = vadd.f32 %v4783_v63, %v4643_v50 }
 0xdc1   :  { %v4821_v27 = vadd.f32 %v4801_v40, %v4649_v36 }
 0xdc5   :  { %v4952_v16 = vpop.f32.mrf.mxu2 }
 0xdc6   :  { %v9890_v1 = vadd.f32 %v4952_v16, %v4814_v22  ;;  %v4632_v16 = vpop.f32.mrf.mxu1  ;;  %v4804_v26 = vpop.f32.mrf.mxu0 }
 0xdc7   :  { %v4650_v15 = vadd.f32 %v4632_v16, %v4477_v44 }
 0xdc9   :  { %v4822_v46 = vadd.f32 %v4804_v26, %v4650_v15 }
 0xdcd   :  { %v4955_v4 = vpop.f32.mrf.mxu2 }
 0xdce   :  { %v9920_v25 = vadd.f32 %v4955_v4, %v4815_v47  ;;  %v5009_v4 = vld [vmem:[%s10330_s8 + $0x28] sm:$0xff] }
 0xdd5   :  { %v9894_v28 = vpop.f32.mrf.mxu2 }
 0xdd6   :  { %v4988_v17 = vadd.f32 %v9894_v28, %v4816_v38  ;;  %v5005_v28 = vld [vmem:[%s10330_s8 + $0x8] sm:$0xff] }
 0xddd   :  { %v4961_v11 = vpop.f32.mrf.mxu2 }
 0xde5   :  { %v4964_v0 = vpop.f32.mrf.mxu2 }
 0xde6   :  { %v9899_v5 = vadd.f32 %v4964_v0, %v4818_v13  ;;  %v4462_v0 = vadd.f32 %v4461_v60, %v9847_v33  ;;  %v5006_v33 = vld [vmem:[%s10330_s8 + $0x10] sm:$0xff]  ;;  %v6875_v60 = vpack.i.bf16 %v9890_v1, %v9920_v25  ;;  %v10474_v13 = vmov 2  }
 0xde8   :  { %v4645_v34 = vadd.f32 %v4617_v53, %v4462_v0 }
 0xdea   :  { %v4817_v63 = vadd.f32 %v9892_v7, %v4645_v34  ;;  %v6890_v7 = vpack.i.bf16 %v9874_v23, %v9876_v20 }
 0xdec   :  { %v9931_v48 = vadd.f32 %v4961_v11, %v4817_v63  ;;  %v5004_v11 = vld [vmem:[%s10330_s8] sm:$0xff] }
 0xded   :  { %v4967_v41 = vpop.f32.mrf.mxu2 }
 0xdee   :  { %v9901_v22 = vadd.f32 %v4967_v41, %v4819_v32  ;;  %v6870_v53 = vpack.i.bf16 %v4988_v17, %v9931_v48 }
 0xdf0   :  { %v6865_v45 = vpack.i.bf16 %v9899_v5, %v9901_v22 }
 0xdf2   :  { %6866 = vrot.lane.b32.xlu2 %v6865_v45, %s6946_s24 }
 0xdf5   :  { %v4970_v35 = vpop.f32.mrf.mxu2 }
 0xdf6   :  { %v4992_v57 = vadd.f32 %v4970_v35, %v4820_v19 }
 0xdfa   :  { %6881 = vrot.lane.b32.xlu2 %v6880_v42, %s6946_s24 }
 0xdfd   :  { %v4973_v54 = vpop.f32.mrf.mxu2 }
 0xdfe   :  { %v4993_v39 = vadd.f32 %v4973_v54, %v4821_v27 }
 0xe00   :  { %v6860_v21 = vpack.i.bf16 %v4992_v57, %v4993_v39 }
 0xe02   :  { %5028 = vrot.lane.b32.xlu2 %v9872_v59, %s6946_s24  ;;  %6861 = vrot.lane.b32.xlu1 %v6860_v21, %s6946_s24 }
 0xe05   :  { %v4976_v8 = vpop.f32.mrf.mxu2 }
 0xe06   :  { %v4994_v2 = vadd.f32 %v4976_v8, %v4822_v46 }
 0xe08   :  { %5058 = vrot.lane.b32.xlu0 %v4994_v2, %s6946_s24 }
 0xe0a   :  { %5251 = vperm.xlu2 %6779, %v5006_v33   ;;  %6876 = vrot.lane.b32.xlu1 %v6875_v60, %s6946_s24 }
 0xe10   :  { %6871 = vrot.lane.b32.xlu0 %v6870_v53, %s6946_s24 }
 0xe12   :  { %5266 = vperm.xlu2 %6779, %v5009_v4   ;;  %6891 = vrot.lane.b32.xlu1 %v6890_v7, %s6946_s24 }
 0xe18   :  { %6886 = vrot.lane.b32.xlu0 %v6885_v62, %s6946_s24 }
 0xe1a   :  { %5246 = vperm.xlu1 %6778, %v5005_v28  }
 0xe20   :  { %5241 = vperm.xlu0 %6777, %v5004_v11  }
 0xe22   :  { %5261 = vperm.xlu1 %6778, %v5008_v31  }
 0xe28   :  { %5256 = vperm.xlu0 %6777, %v5007_v6  }
 0xe2a   :  { %5276 = vperm.xlu1 %6778, %v5011_v9  }
 0xe30   :  { %5271 = vperm.xlu0 %6777, %v5010_v14  }
 0xe32   :  { %6896 = vset.pattern.permute.xlu1 %v10474_v13 }
 0xe4c   :  { %v6867_v32 = vpop.permute.xlu2 %6866 }
 0xe4d   :  { %v6869_v45 = vunpack.i.h.bf16 %v6867_v32  ;;  %v6868_v24 = vunpack.i.l.bf16 %v6867_v32 }
 0xe4f   :  { %v5087_v52 = vmax.f32 %v9899_v5, %v6869_v45  ;;  %v5088_v12 = vmax.f32 %v9901_v22, %v6868_v24 }
 0xe51   :  { %v5129_v30 = vrot.slane %v5087_v52, 1  ;;  %v5131_v19 = vrot.slane %v5088_v12, 1 }
 0xe53   :  { %v5132_v47 = vsel %vm1026_vm2, %v5129_v30, %v5131_v19 }
 0xe54   :  { %v5166_v60 = vmax.f32 %v5087_v52, %v5132_v47  ;;  %v5002_v47 = vld [vmem:[%s10327_s5 + $0x38] sm:$0xff] }
 0xe74   :  { %v6862_v29 = vpop.permute.xlu1 %6861 }
 0xe75   :  { %v6864_v41 = vunpack.i.h.bf16 %v6862_v29  ;;  %v6863_v58 = vunpack.i.l.bf16 %v6862_v29 }
 0xe77   :  { %v5089_v3 = vmax.f32 %v4992_v57, %v6864_v41  ;;  %v5090_v55 = vmax.f32 %v4993_v39, %v6863_v58  ;;  %v6882_v39 = vpop.permute.xlu2 %6881 }
 0xe78   :  { %v6884_v0 = vunpack.i.h.bf16 %v6882_v39  ;;  %v6883_v37 = vunpack.i.l.bf16 %v6882_v39  ;;  %v4996_v39 = vld [vmem:[%s10327_s5 + $0x8] sm:$0xff] }
 0xe79   :  { %v5133_v18 = vrot.slane %v5089_v3, 1  ;;  %v5135_v36 = vrot.slane %v5090_v55, 1 }
 0xe7a   :  { %v5059_v35 = vpop.permute.xlu0 %5058  ;;  %v5081_v38 = vmax.f32 %v9882_v61, %v6884_v0  ;;  %v5082_v53 = vmax.f32 %v9907_v56, %v6883_v37  ;;  %v5003_v0 = vld [vmem:[%s10328_s6] sm:$0x7f] }
 0xe7b   :  { %v5091_v40 = vmax.f32 %v4994_v2, %v5059_v35  ;;  %v5136_v57 = vsel %vm1026_vm2, %v5133_v18, %v5135_v36  ;;  %v5134_v22 = vsel %vm1026_vm2, %v5131_v19, %v5133_v18  ;;  %6460 = vmatpush.msk.msrb.mxu1 %vm1026_vm2, %v5003_v0 }
 0xe7c   :  { %v6877_v51 = vpop.permute.xlu1 %6876  ;;  %v5168_v26 = vmax.f32 %v5089_v3, %v5136_v57  ;;  %v5167_v2 = vmax.f32 %v5088_v12, %v5134_v22  ;;  %v5117_v6 = vrot.slane %v5081_v38, 1  ;;  %v5119_v9 = vrot.slane %v5082_v53, 1  ;;  %v4995_v57 = vld [vmem:[%s10327_s5] sm:$0xff]  ;;  %v4998_v22 = vld [vmem:[%s10327_s5 + $0x18] sm:$0xff] }
 0xe7d   :  { %v5137_v42 = vrot.slane %v5091_v40, 1  ;;  %v6879_v54 = vunpack.i.h.bf16 %v6877_v51  ;;  %v6878_v50 = vunpack.i.l.bf16 %v6877_v51 }
 0xe7e   :  { %v5120_v12 = vsel %vm1026_vm2, %v5117_v6, %v5119_v9 }
 0xe7f   :  { %v5170_v27 = vmax.f32 %v5091_v40, %v5137_v42  ;;  %v5138_v16 = vsel %vm1026_vm2, %v5135_v36, %v5137_v42  ;;  %v5083_v34 = vmax.f32 %v9890_v1, %v6879_v54  ;;  %v5084_v46 = vmax.f32 %v9920_v25, %v6878_v50  ;;  %v5029_v40 = vpop.permute.xlu2 %5028 }
 0xe80   :  { %v5169_v44 = vmax.f32 %v5090_v55, %v5138_v16  ;;  %v5076_v36 = vmax.f32 %v9872_v59, %v5029_v40 }
 0xe81   :  { %6451 = vmatpush.msk.msrb.mxu3 %vm1026_vm2, %v5170_v27  ;;  %v5121_v4 = vrot.slane %v5083_v34, 1  ;;  %v5123_v7 = vrot.slane %v5084_v46, 1 }
 0xe82   :  { %v6872_v5 = vpop.permute.xlu0 %6871  ;;  %v5108_v27 = vrot.slane %v5076_v36, 1 }
 0xe83   :  { %v6874_v15 = vunpack.i.h.bf16 %v6872_v5  ;;  %v6873_v21 = vunpack.i.l.bf16 %v6872_v5  ;;  %5199 = vmatpush.msrb.mxu3 %v5169_v44  ;;  %v5124_v56 = vsel %vm1026_vm2, %v5121_v4, %v5123_v7  ;;  %v5122_v24 = vsel %vm1026_vm2, %v5119_v9, %v5121_v4  ;;  %v4997_v5 = vld [vmem:[%s10327_s5 + $0x10] sm:$0xff] }
 0xe84   :  { %v5162_v3 = vmax.f32 %v5083_v34, %v5124_v56  ;;  %v5161_v18 = vmax.f32 %v5082_v53, %v5122_v24  ;;  %v10477_v9 = vmov 0  }
 0xe85   :  { %v5085_v8 = vmax.f32 %v4988_v17, %v6874_v15  ;;  %v5086_v43 = vmax.f32 %v9931_v48, %v6873_v21  ;;  %5200 = vmatpush.msrb.mxu3 %v5168_v26  ;;  %v6892_v17 = vpop.permute.xlu1 %6891  ;;  %v4999_v15 = vld [vmem:[%s10327_s5 + $0x20] sm:$0xff]  ;;  %v5000_v21 = vld [vmem:[%s10327_s5 + $0x28] sm:$0xff]  ;;  %v5001_v26 = vld [vmem:[%s10327_s5 + $0x30] sm:$0xff] }
 0xe86   :  { %v6894_v14 = vunpack.i.h.bf16 %v6892_v17  ;;  %v6893_v32 = vunpack.i.l.bf16 %v6892_v17 }
 0xe87   :  { %v5125_v33 = vrot.slane %v5085_v8, 1  ;;  %v5127_v63 = vrot.slane %v5086_v43, 1  ;;  %5201 = vmatpush.msrb.mxu3 %v5167_v2 }
 0xe88   :  { %v5077_v55 = vmax.f32 %v9874_v23, %v6894_v14  ;;  %v5078_v35 = vmax.f32 %v9876_v20, %v6893_v32 }
 0xe89   :  { %5202 = vmatpush.msrb.mxu3 %v5166_v60  ;;  %v5130_v1 = vsel %vm1026_vm2, %v5127_v63, %v5129_v30  ;;  %v5128_v25 = vsel %vm1026_vm2, %v5125_v33, %v5127_v63  ;;  %v5126_v31 = vsel %vm1026_vm2, %v5123_v7, %v5125_v33 }
 0xe8a   :  { %v6887_v62 = vpop.permute.xlu0 %6886  ;;  %v5165_v48 = vmax.f32 %v5086_v43, %v5130_v1  ;;  %v5164_v61 = vmax.f32 %v5085_v8, %v5128_v25  ;;  %v5163_v58 = vmax.f32 %v5084_v46, %v5126_v31  ;;  %v5109_v42 = vrot.slane %v5077_v55, 1 }
 0xe8b   :  { %v6889_v28 = vunpack.i.h.bf16 %v6887_v62  ;;  %v6888_v11 = vunpack.i.l.bf16 %v6887_v62  ;;  %v5111_v51 = vrot.slane %v5078_v35, 1  ;;  %v10475_v62 = vmov 3  }
 0xe8c   :  { %5203 = vmatpush.msrb.mxu3 %v5165_v48  ;;  %v5110_v50 = vsel %vm1026_vm2, %v5108_v27, %v5109_v42  ;;  %v10476_v48 = vmov 1  }
 0xe8d   :  { %v5079_v29 = vmax.f32 %v9878_v49, %v6889_v28  ;;  %v5080_v41 = vmax.f32 %v9880_v10, %v6888_v11  ;;  %v5160_v10 = vmax.f32 %v5081_v38, %v5120_v12  ;;  %v5112_v16 = vsel %vm1026_vm2, %v5109_v42, %v5111_v51  ;;  %v5247_v7 = vpop.permute.xlu1 %5246  ;;  %v5252_v11 = vpop.permute.xlu2 %5251 }
 0xe8e   :  { %5204 = vmatpush.msrb.mxu3 %v5164_v61  ;;  %v5156_v44 = vmax.f32 %v5077_v55, %v5112_v16  ;;  %v5155_v59 = vmax.f32 %v5076_v36, %v5110_v50 }
 0xe8f   :  { %v5115_v45 = vrot.slane %v5080_v41, 1  ;;  %v5113_v52 = vrot.slane %v5079_v29, 1 }
 0xe90   :  { %5205 = vmatpush.msrb.mxu3 %v5163_v58 }
 0xe91   :  { %v5118_v49 = vsel %vm1026_vm2, %v5115_v45, %v5117_v6  ;;  %v5116_v30 = vsel %vm1026_vm2, %v5113_v52, %v5115_v45  ;;  %v5114_v20 = vsel %vm1026_vm2, %v5111_v51, %v5113_v52 }
 0xe92   :  { %5206 = vmatpush.msrb.mxu3 %v5162_v3  ;;  %v5159_v23 = vmax.f32 %v5080_v41, %v5118_v49  ;;  %v5158_v19 = vmax.f32 %v5079_v29, %v5116_v30  ;;  %v5157_v54 = vmax.f32 %v5078_v35, %v5114_v20  ;;  %v5242_v60 = vpop.permute.xlu0 %5241  ;;  %v6478_v20 = vld [vmem:[%s10331_s9 + $0x88] sm:$0xff] }
 0xe94   :  { %5207 = vmatpush.msrb.mxu3 %v5161_v18 }
 0xe95   :  { %v5262_v41 = vpop.permute.xlu1 %5261  ;;  %v5267_v3 = vpop.permute.xlu2 %5266 }
 0xe96   :  { %5208 = vmatpush.msrb.mxu3 %v5160_v10 }
 0xe98   :  { %5209 = vmatpush.msrb.mxu3 %v5159_v23 }
 0xe9a   :  { %5210 = vmatpush.msrb.mxu3 %v5158_v19  ;;  %v5257_v56 = vpop.permute.xlu0 %5256  ;;  %v6477_v19 = vld [vmem:[%s10331_s9 + $0x80] sm:$0xff] }
 0xe9c   :  { %5211 = vmatpush.msrb.mxu3 %v5157_v54 }
 0xe9d   :  { %v5277_v12 = vpop.permute.xlu1 %5276 }
 0xe9e   :  { %5212 = vmatpush.msrb.mxu3 %v5156_v44 }
 0xea0   :  { %5213 = vmatpush.msrb.mxu3 %v5155_v59 }
 0xea1   :  { %6452 = vmatmul.msk.f32.vlgmr.msrb.gmra.mxu3 %vm2337_vm6, %v4995_v57 }
 0xea2   :  { %v5272_v10 = vpop.permute.xlu0 %5271 }
 0xea9   :  { %6453 = vmatmul.msk.f32.gmra.mxu3 %vm2337_vm6, %v4996_v39 }
 0xeb1   :  { %6454 = vmatmul.msk.f32.gmra.mxu3 %vm2337_vm6, %v4997_v5 }
 0xeb9   :  { %6455 = vmatmul.msk.f32.gmra.mxu3 %vm2337_vm6, %v4998_v22 }
 0xec1   :  { %6456 = vmatmul.msk.f32.gmra.mxu3 %vm2337_vm6, %v4999_v15 }
 0xec9   :  { %6457 = vmatmul.msk.f32.gmra.mxu3 %vm2337_vm6, %v5000_v21 }
 0xed1   :  { %6458 = vmatmul.msk.f32.gmra.mxu3 %vm2337_vm6, %v5001_v26 }
 0xed9   :  { %6459 = vmatmul.msk.f32.gmra.mxu3 %vm2337_vm6, %v5002_v47 }
 0xf24   :  { %v5215_v37 = vpop.f32.mrf.mxu3 }
 0xf25   :  { %6461 = vmatmul.msk.f32.vlgmr.msrb.gmra.mxu1 %vm2446_vm7, %v5215_v37 }
 0xf2c   :  { %v5218_v34 = vpop.f32.mrf.mxu3 }
 0xf2d   :  { %6462 = vmatmul.msk.f32.gmra.mxu1 %vm2446_vm7, %v5218_v34 }
 0xf34   :  { %v5221_v46 = vpop.f32.mrf.mxu3 }
 0xf35   :  { %6463 = vmatmul.msk.f32.gmra.mxu1 %vm2446_vm7, %v5221_v46 }
 0xf3c   :  { %v5224_v8 = vpop.f32.mrf.mxu3 }
 0xf3d   :  { %6464 = vmatmul.msk.f32.gmra.mxu1 %vm2446_vm7, %v5224_v8 }
 0xf44   :  { %v5227_v43 = vpop.f32.mrf.mxu3 }
 0xf45   :  { %6465 = vmatmul.msk.f32.gmra.mxu1 %vm2446_vm7, %v5227_v43 }
 0xf4c   :  { %v5230_v2 = vpop.f32.mrf.mxu3 }
 0xf4d   :  { %6466 = vmatmul.msk.f32.gmra.mxu1 %vm2446_vm7, %v5230_v2 }
 0xf54   :  { %v5233_v33 = vpop.f32.mrf.mxu3 }
 0xf55   :  { %6467 = vmatmul.msk.f32.gmra.mxu1 %vm2446_vm7, %v5233_v33 }
 0xf5c   :  { %v5236_v63 = vpop.f32.mrf.mxu3 }
 0xf5d   :  { %6468 = vmatmul.msk.f32.gmra.mxu1 %vm2446_vm7, %v5236_v63  ;;  %v5357_v63 = vld [vmem:[%s10331_s9 + $0x8] sm:$0xff] }
 0xfa2   :  { %v5323_v38 = vpop.f32.mrf.mxu1 }
 0xfa3   :  { %v5324_v53 = vadd.f32 %v5323_v38, %v5242_v60  ;;  %v5356_v60 = vld [vmem:[%s10331_s9] sm:$0xff]  ;;  %v5358_v38 = vld [vmem:[%s10331_s9 + $0x10] sm:$0xff] }
 0xfa5   :  { %v5347_v4 = vmax.f32 %v5324_v53, 0.0 }
 0xfa7   :  { %5513 = vperm.xlu1 %6896, %v5347_v4   ;;  %5366 = vperm.xlu2 %6779, %v5347_v4  }
 0xfaa   :  { %v5326_v1 = vpop.f32.mrf.mxu1 }
 0xfab   :  { %v5327_v25 = vadd.f32 %v5326_v1, %v5247_v7  ;;  %v6479_v1 = vld [vmem:[%s10331_s9 + $0x90] sm:$0xff] }
 0xfad   :  { %v5348_v17 = vmax.f32 %v5327_v25, 0.0  ;;  %v5359_v25 = vld [vmem:[%s10331_s9 + $0x18] sm:$0xff] }
 0xfaf   :  { %6897 = vset.pattern.permute.xlu1 %v10475_v62  ;;  %6895 = vset.pattern.permute.xlu2 %v10476_v48 }
 0xfb0   :  { %5371 = vperm.xlu0 %6777, %v5348_v17   ;;  %5583 = vperm.xlu1 %6897, %v5347_v4  }
 0xfb1   :  { %5443 = vperm.xlu2 %6895, %v5347_v4  }
 0xfb2   :  { %v5329_v28 = vpop.f32.mrf.mxu1 }
 0xfb3   :  { %v5330_v31 = vadd.f32 %v5329_v28, %v5252_v11  ;;  %v5360_v28 = vld [vmem:[%s10331_s9 + $0x20] sm:$0xff]  ;;  %v5659_v11 = vld [vmem:[%s10333_s11 + $0x70] sm:$0xff] }
 0xfb4   :  { %5665 = vmatpush.msra.mxu3 %v5659_v11 }
 0xfb5   :  { %v5349_v6 = vmax.f32 %v5330_v31, 0.0 }
 0xfb8   :  { %6898 = vset.pattern.permute.xlu0 %v10476_v48  ;;  %6901 = vset.pattern.permute.xlu1 %v10477_v9 }
 0xfb9   :  { %6899 = vset.pattern.permute.xlu2 %v10474_v13  ;;  %5447 = vperm.xlu0 %6898, %v5348_v17  }
 0xfba   :  { %5517 = vperm.xlu2 %6899, %v5348_v17   ;;  %5376 = vperm.xlu1 %6901, %v5349_v6   ;;  %v5332_v61 = vpop.f32.mrf.mxu1 }
 0xfbb   :  { %v5333_v14 = vadd.f32 %v5332_v61, %v5257_v56 }
 0xfbd   :  { %v5350_v32 = vmax.f32 %v5333_v14, 0.0  ;;  %v5361_v14 = vld [vmem:[%s10331_s9 + $0x28] sm:$0xff] }
 0xfc1   :  { %6904 = vset.pattern.permute.xlu0 %v10475_v62 }
 0xfc2   :  { %6900 = vset.pattern.permute.xlu2 %v10475_v62  ;;  %5591 = vperm.xlu0 %6904, %v5349_v6   ;;  %v5335_v29 = vpop.f32.mrf.mxu1 }
 0xfc3   :  { %5381 = vperm.xlu1 %6901, %v5350_v32   ;;  %5587 = vperm.xlu2 %6900, %v5348_v17   ;;  %v5336_v58 = vadd.f32 %v5335_v29, %v5262_v41  ;;  %v5658_v29 = vld [vmem:[%s10333_s11 + $0x68] sm:$0xff] }
 0xfc4   :  { %5666 = vmatpush.msra.mxu3 %v5658_v29 }
 0xfc5   :  { %v5351_v45 = vmax.f32 %v5336_v58, 0.0  ;;  %v6469_v58 = vld [vmem:[%s10331_s9 + $0x40] sm:$0xff] }
 0xfca   :  { %6907 = vset.pattern.permute.xlu0 %v10477_v9  ;;  %v5338_v24 = vpop.f32.mrf.mxu1 }
 0xfcb   :  { %6905 = vset.pattern.permute.xlu1 %v10476_v48  ;;  %6902 = vset.pattern.permute.xlu2 %v10476_v48  ;;  %v5339_v55 = vadd.f32 %v5338_v24, %v5267_v3 }
 0xfcc   :  { %5455 = vperm.xlu1 %6905, %v5350_v32   ;;  %5386 = vperm.xlu0 %6907, %v5351_v45  }
 0xfcd   :  { %5451 = vperm.xlu2 %6902, %v5349_v6   ;;  %v5352_v35 = vmax.f32 %v5339_v55, 0.0 }
 0xfd2   :  { %v5341_v52 = vpop.f32.mrf.mxu1 }
 0xfd3   :  { %v5342_v36 = vadd.f32 %v5341_v52, %v5272_v10  ;;  %v6482_v52 = vld [vmem:[%s10331_s9 + $0xa8] sm:$0xff] }
 0xfd4   :  { %5459 = vperm.xlu1 %6905, %v5351_v45   ;;  %5391 = vperm.xlu0 %6907, %v5352_v35  }
 0xfd5   :  { %6903 = vset.pattern.permute.xlu2 %v10474_v13  ;;  %v5353_v42 = vmax.f32 %v5342_v36, 0.0 }
 0xfd6   :  { %5521 = vperm.xlu2 %6903, %v5349_v6   ;;  %v6470_v6 = vld [vmem:[%s10331_s9 + $0x48] sm:$0xff] }
 0xfda   :  { %v5344_v40 = vpop.f32.mrf.mxu1 }
 0xfdb   :  { %v5345_v18 = vadd.f32 %v5344_v40, %v5277_v12  ;;  %v5657_v12 = vld [vmem:[%s10333_s11 + $0x60] sm:$0xff] }
 0xfdc   :  { %6908 = vset.pattern.permute.xlu1 %v10474_v13  ;;  %5667 = vmatpush.msra.mxu3 %v5657_v12 }
 0xfdd   :  { %v5354_v49 = vmax.f32 %v5345_v18, 0.0  ;;  %5529 = vperm.xlu1 %6908, %v5351_v45  }
 0xfde   :  { %5525 = vperm.xlu2 %6903, %v5350_v32  }
 0xfdf   :  { %5401 = vperm.xlu0 %6907, %v5354_v49  }
 0xfe5   :  { %6909 = vset.pattern.permute.xlu1 %v10475_v62 }
 0xfe6   :  { %6906 = vset.pattern.permute.xlu2 %v10475_v62  ;;  %5599 = vperm.xlu1 %6909, %v5351_v45  }
 0xfe7   :  { %5595 = vperm.xlu2 %6906, %v5350_v32   ;;  %6914 = vset.pattern.permute.xlu0 %v10474_v13  ;;  %v6481_v32 = vld [vmem:[%s10331_s9 + $0xa0] sm:$0xff] }
 0xfe8   :  { %5537 = vperm.xlu0 %6914, %v5353_v42  }
 0xfee   :  { %6912 = vset.pattern.permute.xlu1 %v10477_v9 }
 0xfef   :  { %6910 = vset.pattern.permute.xlu2 %v10476_v48  ;;  %5396 = vperm.xlu1 %6912, %v5353_v42  }
 0xff0   :  { %5463 = vperm.xlu2 %6910, %v5352_v35   ;;  %6919 = vset.pattern.permute.xlu0 %v10475_v62 }
 0xff7   :  { %6913 = vset.pattern.permute.xlu1 %v10476_v48 }
 0xff8   :  { %6911 = vset.pattern.permute.xlu2 %v10474_v13  ;;  %5467 = vperm.xlu1 %6913, %v5353_v42  }
 0xff9   :  { %5533 = vperm.xlu2 %6911, %v5352_v35  }
0x1000   :  { %6915 = vset.pattern.permute.xlu1 %v10475_v62 }
0x1001   :  { %6916 = vset.pattern.permute.xlu2 %v10476_v48  ;;  %5603 = vperm.xlu1 %6915, %v5352_v35   ;;  %v5367_v51 = vpop.permute.xlu2 %5366  ;;  %v6480_v48 = vld [vmem:[%s10331_s9 + $0x98] sm:$0xff] }
0x1002   :  { %5471 = vperm.xlu2 %6916, %v5354_v49   ;;  %v5404_v17 = vmul.f32 %v5367_v51, %v5356_v60  ;;  %v6471_v51 = vld [vmem:[%s10331_s9 + $0x50] sm:$0xff] }
0x1004   :  { %v5412_v41 = vsel %vm2580_vm8, %v5404_v17, 0.0 }
0x1009   :  { %5607 = vperm.xlu1 %6915, %v5353_v42  }
0x100a   :  { %6917 = vset.pattern.permute.xlu2 %v10474_v13 }
0x100b   :  { %5541 = vperm.xlu2 %6917, %v5354_v49   ;;  %v10060_v30 = vpop.permute.xlu2 %5443 }
0x100c   :  { %v5474_v42 = vmul.f32 %v6469_v58, %v10060_v30  ;;  %v6472_v30 = vld [vmem:[%s10331_s9 + $0x58] sm:$0xff] }
0x100d   :  { %v5652_v58 = vld [vmem:[%s10333_s11 + $0x38] sm:$0xff] }
0x1013   :  { %6918 = vset.pattern.permute.xlu2 %v10475_v62 }
0x1014   :  { %5611 = vperm.xlu2 %6918, %v5354_v49   ;;  %v5518_v23 = vpop.permute.xlu2 %5517 }
0x1015   :  { %v5545_v27 = vmul.f32 %v6478_v20, %v5518_v23  ;;  %v6483_v20 = vld [vmem:[%s10331_s9 + $0xb0] sm:$0xff] }
0x1017   :  { %v5553_v13 = vsel %vm2580_vm8, %v5545_v27, 0.0  ;;  %v5656_v27 = vld [vmem:[%s10333_s11 + $0x58] sm:$0xff] }
0x1018   :  { %5668 = vmatpush.msra.mxu3 %v5656_v27  ;;  %v6485_v27 = vld [vmem:[%s10331_s9 + $0xc0] sm:$0xff] }
0x1019   :  { %v5514_v16 = vpop.permute.xlu1 %5513 }
0x101a   :  { %v5544_v54 = vmul.f32 %v6477_v19, %v5514_v16 }
0x101c   :  { %v5552_v50 = vsel %vm2580_vm8, %v5544_v54, 0.0 }
0x101d   :  { %v10071_v44 = vadd.f32 %v5553_v13, %v5552_v50  ;;  %v10073_v59 = vpop.permute.xlu2 %5587 }
0x1022   :  { %v10075_v57 = vpop.permute.xlu1 %5583  ;;  %v5372_v39 = vpop.permute.xlu0 %5371 }
0x1023   :  { %v5405_v7 = vmul.f32 %v5372_v39, %v5357_v63  ;;  %v5482_v63 = vsel %vm2580_vm8, %v5474_v42, 0.0 }
0x1025   :  { %v5413_v31 = vsel %vm2580_vm8, %v5405_v7, 0.0 }
0x1026   :  { %v5414_v55 = vadd.f32 %v5413_v31, %v5412_v41  ;;  %v6484_v31 = vld [vmem:[%s10331_s9 + $0xb8] sm:$0xff] }
0x1027   :  { %v10077_v5 = vpop.permute.xlu2 %5451 }
0x102b   :  { %v5448_v15 = vpop.permute.xlu0 %5447 }
0x102c   :  { %v5377_v22 = vpop.permute.xlu1 %5376  ;;  %v5475_v35 = vmul.f32 %v6470_v6, %v5448_v15  ;;  %v5363_v15 = vld [vmem:[%s10331_s9 + $0x38] sm:$0xff]  ;;  %v5653_v6 = vld [vmem:[%s10333_s11 + $0x40] sm:$0xff] }
0x102d   :  { %v5406_v62 = vmul.f32 %v5377_v22, %v5358_v38 }
0x102e   :  { %v5483_v50 = vsel %vm2580_vm8, %v5475_v35, 0.0 }
0x102f   :  { %v5415_v45 = vsel %vm2580_vm8, %v5406_v62, 0.0 }
0x1030   :  { %v5522_v21 = vpop.permute.xlu2 %5521  ;;  %v5416_v23 = vadd.f32 %v5415_v45, %v5414_v55 }
0x1031   :  { %v5546_v9 = vmul.f32 %v6479_v1, %v5522_v21  ;;  %v5362_v21 = vld [vmem:[%s10331_s9 + $0x30] sm:$0xff]  ;;  %v5484_v1 = vadd.f32 %v5483_v50, %v5482_v63  ;;  %v5649_v50 = vld [vmem:[%s10333_s11 + $0x20] sm:$0xff] }
0x1033   :  { %v5555_v40 = vsel %vm2580_vm8, %v5546_v9, 0.0 }
0x1034   :  { %v10079_v47 = vpop.permute.xlu0 %5591  ;;  %v5556_v39 = vadd.f32 %v5555_v40, %v10071_v44  ;;  %v6476_v40 = vld [vmem:[%s10331_s9 + $0x78] sm:$0xff] }
0x1035   :  { %v5382_v26 = vpop.permute.xlu1 %5381 }
0x1036   :  { %v5407_v61 = vmul.f32 %v5382_v26, %v5359_v25  ;;  %v5655_v26 = vld [vmem:[%s10333_s11 + $0x50] sm:$0xff]  ;;  %v6474_v25 = vld [vmem:[%s10331_s9 + $0x68] sm:$0xff] }
0x1037   :  { %5669 = vmatpush.msra.mxu3 %v5655_v26  ;;  %v5648_v26 = vld [vmem:[%s10333_s11 + $0x18] sm:$0xff] }
0x1038   :  { %v5526_v0 = vpop.permute.xlu2 %5525  ;;  %v5417_v18 = vsel %vm2580_vm8, %v5407_v61, 0.0 }
0x1039   :  { %v5547_v24 = vmul.f32 %v6480_v48, %v5526_v0  ;;  %v5418_v22 = vadd.f32 %v5417_v18, %v5416_v23  ;;  %v5476_v0 = vmul.f32 %v6471_v51, %v10077_v5  ;;  %v5654_v5 = vld [vmem:[%s10333_s11 + $0x48] sm:$0xff] }
0x103a   :  { %5670 = vmatpush.msra.mxu3 %v5654_v5  ;;  %v5650_v23 = vld [vmem:[%s10333_s11 + $0x28] sm:$0xff]  ;;  %v5645_v5 = vld [vmem:[%s10333_s11] sm:$0xff] }
0x103b   :  { %v5557_v16 = vsel %vm2580_vm8, %v5547_v24, 0.0  ;;  %v5485_v9 = vsel %vm2580_vm8, %v5476_v0, 0.0  ;;  %v5614_v0 = vmul.f32 %v6485_v27, %v10075_v57  ;;  %v6489_v57 = vld [vmem:[%s10331_s9 + $0xe0] sm:$0xff] }
0x103c   :  { %v5558_v60 = vadd.f32 %v5557_v16, %v5556_v39  ;;  %5671 = vmatpush.msra.mxu3 %v5653_v6  ;;  %v5486_v45 = vadd.f32 %v5485_v9, %v5484_v1  ;;  %v6486_v39 = vld [vmem:[%s10331_s9 + $0xc8] sm:$0xff] }
0x103d   :  { %v5622_v1 = vsel %vm2580_vm8, %v5614_v0, 0.0 }
0x103e   :  { %v10081_v37 = vpop.permute.xlu1 %5455  ;;  %v5387_v34 = vpop.permute.xlu0 %5386  ;;  %5672 = vmatpush.msra.mxu3 %v5652_v58 }
0x103f   :  { %v5408_v3 = vmul.f32 %v5387_v34, %v5360_v28  ;;  %v6473_v34 = vld [vmem:[%s10331_s9 + $0x60] sm:$0xff]  ;;  %v5477_v38 = vmul.f32 %v6472_v30, %v10081_v37 }
0x1041   :  { %v10083_v46 = vpop.permute.xlu2 %5595  ;;  %v5419_v54 = vsel %vm2580_vm8, %v5408_v3, 0.0 }
0x1046   :  { %v10085_v8 = vpop.permute.xlu1 %5459  ;;  %v5392_v2 = vpop.permute.xlu0 %5391 }
0x1047   :  { %v5409_v49 = vmul.f32 %v5392_v2, %v5361_v14  ;;  %v5478_v28 = vmul.f32 %v6473_v34, %v10085_v8  ;;  %v5487_v14 = vsel %vm2580_vm8, %v5477_v38, 0.0 }
0x1048   :  { %v5488_v12 = vadd.f32 %v5487_v14, %v5486_v45  ;;  %v5355_v45 = vld [vmem:[%s10332_s10] sm:$0x1] }
0x1049   :  { %v5421_v44 = vsel %vm2580_vm8, %v5409_v49, 0.0  ;;  %v5489_v55 = vsel %vm2580_vm8, %v5478_v28, 0.0  ;;  %v6475_v49 = vld [vmem:[%s10331_s9 + $0x70] sm:$0xff] }
0x104a   :  { %v10087_v43 = vpop.permute.xlu2 %5463 }
0x104b   :  { %v5479_v8 = vmul.f32 %v6474_v25, %v10087_v43  ;;  %v5651_v43 = vld [vmem:[%s10333_s11 + $0x30] sm:$0xff] }
0x104c   :  { %5673 = vmatpush.msra.mxu3 %v5651_v43  ;;  %v6491_v43 = vld [vmem:[%s10331_s9 + $0xf0] sm:$0xff] }
0x104e   :  { %5674 = vmatpush.msra.mxu3 %v5650_v23 }
0x104f   :  { %v5530_v33 = vpop.permute.xlu1 %5529 }
0x1050   :  { %v5548_v10 = vmul.f32 %v6481_v32, %v5530_v33  ;;  %5675 = vmatpush.msra.mxu3 %v5649_v50 }
0x1051   :  { %v10098_v4 = vpop.permute.xlu0 %5401 }
0x1052   :  { %v5559_v2 = vsel %vm2580_vm8, %v5548_v10, 0.0  ;;  %v5411_v62 = vmul.f32 %v10098_v4, %v5363_v15  ;;  %v5491_v10 = vsel %vm2580_vm8, %v5479_v8, 0.0  ;;  %v6487_v15 = vld [vmem:[%s10331_s9 + $0xd0] sm:$0xff]  ;;  %5676 = vmatpush.msra.mxu3 %v5648_v26 }
0x1053   :  { %v5534_v53 = vpop.permute.xlu2 %5533  ;;  %v5560_v11 = vadd.f32 %v5559_v2, %v5558_v60  ;;  %v5615_v2 = vmul.f32 %v6486_v39, %v10073_v59  ;;  %v5647_v60 = vld [vmem:[%s10333_s11 + $0x10] sm:$0xff]  ;;  %v5616_v38 = vmul.f32 %v6487_v15, %v10079_v47  ;;  %v5646_v59 = vld [vmem:[%s10333_s11 + $0x8] sm:$0xff] }
0x1054   :  { %v5549_v13 = vmul.f32 %v6482_v52, %v5534_v53  ;;  %v5420_v53 = vadd.f32 %v5419_v54, %v5418_v22  ;;  %v5425_v24 = vsel %vm2580_vm8, %v5411_v62, 0.0  ;;  %5677 = vmatpush.msra.mxu3 %v5647_v60 }
0x1055   :  { %v5623_v62 = vsel %vm2580_vm8, %v5615_v2, 0.0 }
0x1056   :  { %v5561_v17 = vsel %vm2580_vm8, %v5549_v13, 0.0  ;;  %v5422_v37 = vadd.f32 %v5421_v44, %v5420_v53  ;;  %5678 = vmatpush.msra.mxu3 %v5646_v59 }
0x1057   :  { %v5562_v32 = vadd.f32 %v5561_v17, %v5560_v11  ;;  %v5694_v11 = vld [vmem:[%s10335_s13 + $0x48] sm:$0xff] }
0x1058   :  { %v10119_v56 = vpop.permute.xlu1 %5599  ;;  %5679 = vmatpush.msra.mxu3 %v5645_v5 }
0x105a   :  { %v5538_v19 = vpop.permute.xlu0 %5537 }
0x105b   :  { %v5550_v33 = vmul.f32 %v6483_v20, %v5538_v19  ;;  %v5490_v20 = vadd.f32 %v5489_v55, %v5488_v12  ;;  %v5691_v12 = vld [vmem:[%s10335_s13 + $0x30] sm:$0xff] }
0x105c   :  { %v10143_v36 = vpop.permute.xlu2 %5471 }
0x105d   :  { %v5563_v61 = vsel %vm2580_vm8, %v5550_v33, 0.0  ;;  %v5481_v16 = vmul.f32 %v6476_v40, %v10143_v36  ;;  %v5492_v22 = vadd.f32 %v5491_v10, %v5490_v20  ;;  %v6488_v33 = vld [vmem:[%s10331_s9 + $0xd8] sm:$0xff] }
0x105e   :  { %v5564_v35 = vadd.f32 %v5563_v61, %v5562_v32  ;;  %v5617_v25 = vmul.f32 %v6488_v33, %v10083_v46  ;;  %v5625_v46 = vsel %vm2580_vm8, %v5616_v38, 0.0  ;;  %v5624_v61 = vadd.f32 %v5623_v62, %v5622_v1  ;;  %v5687_v38 = vld [vmem:[%s10335_s13 + $0x10] sm:$0xff] }
0x105f   :  { %v5495_v63 = vsel %vm2580_vm8, %v5481_v16, 0.0 }
0x1060   :  { %v5627_v14 = vsel %vm2580_vm8, %v5617_v25, 0.0  ;;  %v5696_v25 = vld [vmem:[%s10336_s14] sm:$0x1] }
0x1061   :  { %v5397_v7 = vpop.permute.xlu1 %5396 }
0x1062   :  { %v5410_v48 = vmul.f32 %v5397_v7, %v5362_v21 }
0x1064   :  { %v5423_v4 = vsel %vm2580_vm8, %v5410_v48, 0.0  ;;  %v6490_v48 = vld [vmem:[%s10331_s9 + $0xe8] sm:$0xff] }
0x1065   :  { %v5424_v29 = vadd.f32 %v5423_v4, %v5422_v37  ;;  %v5542_v41 = vpop.permute.xlu2 %5541  ;;  %v5695_v37 = vld [vmem:[%s10335_s13 + $0x50] sm:$0xf]  ;;  %v5693_v4 = vld [vmem:[%s10335_s13 + $0x40] sm:$0xff] }
0x1066   :  { %v5551_v3 = vmul.f32 %v6484_v31, %v5542_v41  ;;  %v5618_v31 = vmul.f32 %v6489_v57, %v10119_v56  ;;  %6494 = vmatpush.msk.msrb.mxu0 %vm162_vm0, %v5695_v37  ;;  %v5626_v41 = vadd.f32 %v5625_v46, %v5624_v61  ;;  %v5692_v56 = vld [vmem:[%s10335_s13 + $0x38] sm:$0xff]  ;;  %v5660_v57 = vld [vmem:[%s10334_s12] sm:$0x1] }
0x1067   :  { %v5426_v52 = vadd.f32 %v5425_v24, %v5424_v29 }
0x1068   :  { %v5565_v18 = vsel %vm2580_vm8, %v5551_v3, 0.0  ;;  %5709 = vmatpush.msrb.mxu0 %v5694_v11  ;;  %v5629_v58 = vsel %vm2580_vm8, %v5618_v31, 0.0  ;;  %v5628_v55 = vadd.f32 %v5627_v14, %v5626_v41 }
0x1069   :  { %v5427_v42 = vrot.slane %v5426_v52, 4  ;;  %v5566_v51 = vadd.f32 %v5565_v18, %v5564_v35  ;;  %v6492_v35 = vld [vmem:[%s10331_s9 + $0xf8] sm:$0xff] }
0x106a   :  { %v5468_v19 = vpop.permute.xlu1 %5467  ;;  %5710 = vmatpush.msrb.mxu0 %v5693_v4  ;;  %v5630_v10 = vadd.f32 %v5629_v58, %v5628_v55 }
0x106b   :  { %v5428_v30 = vadd.f32 %v5427_v42, %v5426_v52  ;;  %v5567_v54 = vrot.slane %v5566_v51, 4  ;;  %v5480_v13 = vmul.f32 %v6475_v49, %v5468_v19 }
0x106c   :  { %5711 = vmatpush.msrb.mxu0 %v5692_v56 }
0x106d   :  { %v5429_v21 = vrot.slane %v5428_v30, 2  ;;  %v5493_v36 = vsel %vm2580_vm8, %v5480_v13, 0.0  ;;  %v5568_v34 = vadd.f32 %v5567_v54, %v5566_v51  ;;  %v5690_v51 = vld [vmem:[%s10335_s13 + $0x28] sm:$0xff] }
0x106e   :  { %v5494_v44 = vadd.f32 %v5493_v36, %v5492_v22  ;;  %v5612_v52 = vpop.permute.xlu2 %5611  ;;  %5712 = vmatpush.msrb.mxu0 %v5691_v12  ;;  %v5688_v22 = vld [vmem:[%s10335_s13 + $0x18] sm:$0xff] }
0x106f   :  { %v5430_v53 = vadd.f32 %v5429_v21, %v5428_v30  ;;  %v5569_v47 = vrot.slane %v5568_v34, 2  ;;  %v5621_v19 = vmul.f32 %v6492_v35, %v5612_v52  ;;  %v5689_v30 = vld [vmem:[%s10335_s13 + $0x20] sm:$0xff] }
0x1070   :  { %v5496_v7 = vadd.f32 %v5495_v63, %v5494_v44  ;;  %5713 = vmatpush.msrb.mxu0 %v5690_v51 }
0x1071   :  { %v5431_v6 = vrot.slane %v5430_v53, 1  ;;  %v5570_v8 = vadd.f32 %v5569_v47, %v5568_v34  ;;  %v5635_v15 = vsel %vm2580_vm8, %v5621_v19, 0.0 }
0x1072   :  { %v5497_v17 = vrot.slane %v5496_v7, 4  ;;  %5714 = vmatpush.msrb.mxu0 %v5689_v30 }
0x1073   :  { %v5604_v28 = vpop.permute.xlu1 %5603  ;;  %v5432_v24 = vadd.f32 %v5431_v6, %v5430_v53  ;;  %v5571_v40 = vrot.slane %v5570_v8, 1  ;;  %v5686_v53 = vld [vmem:[%s10335_s13 + $0x8] sm:$0xff] }
0x1074   :  { %v5498_v9 = vadd.f32 %v5497_v17, %v5496_v7  ;;  %v5619_v29 = vmul.f32 %v6490_v48, %v5604_v28  ;;  %5715 = vmatpush.msrb.mxu0 %v5688_v22  ;;  %v5685_v7 = vld [vmem:[%s10335_s13] sm:$0xff]  ;;  %s5731_s13 = sshll.u32 %s10337_s15, 4  ;;  %s5732_s13 = int_to_ptr.hbm [resolvable:$true] %s5731_s13 }
0x1075   :  { %v5433_v23 = vadd.f32 %v5432_v24, %v5355_v45  ;;  %v5572_v54 = vadd.f32 %v5571_v40, %v5570_v8 }
0x1076   :  { %v5499_v32 = vrot.slane %v5498_v9, 2  ;;  %v5631_v49 = vsel %vm2580_vm8, %v5619_v29, 0.0  ;;  %5716 = vmatpush.msrb.mxu0 %v5687_v38 }
0x1077   :  { %v5632_v16 = vadd.f32 %v5631_v49, %v5630_v10 }
0x1078   :  { %v5500_v3 = vadd.f32 %v5499_v32, %v5498_v9  ;;  %5717 = vmatpush.msrb.mxu0 %v5686_v53 }
0x107a   :  { %v5501_v18 = vrot.slane %v5500_v3, 1  ;;  %5718 = vmatpush.msrb.mxu0 %v5685_v7 }
0x107b   :  { %v5608_v42 = vpop.permute.xlu1 %5607 }
0x107c   :  { %v5502_v20 = vadd.f32 %v5501_v18, %v5500_v3  ;;  %v5620_v27 = vmul.f32 %v6491_v43, %v5608_v42 }
0x107e   :  { %v5503_v13 = vadd.f32 %v5502_v20, %v5433_v23  ;;  %v5633_v50 = vsel %vm2580_vm8, %v5620_v27, 0.0 }
0x107f   :  { %v5634_v39 = vadd.f32 %v5633_v50, %v5632_v16 }
0x1080   :  { %v5573_v21 = vadd.f32 %v5572_v54, %v5503_v13 }
0x1081   :  { %v5636_v36 = vadd.f32 %v5635_v15, %v5634_v39 }
0x1083   :  { %v5637_v26 = vrot.slane %v5636_v36, 4 }
0x1085   :  { %v5638_v0 = vadd.f32 %v5637_v26, %v5636_v36 }
0x1087   :  { %v5639_v34 = vrot.slane %v5638_v0, 2 }
0x1089   :  { %v5640_v44 = vadd.f32 %v5639_v34, %v5638_v0 }
0x108b   :  { %v5641_v2 = vrot.slane %v5640_v44, 1 }
0x108d   :  { %v5642_v33 = vadd.f32 %v5641_v2, %v5640_v44 }
0x108f   :  { %v5643_v63 = vadd.f32 %v5642_v33, %v5573_v21 }
0x1091   :  { %v5644_v60 = vmax.f32 %v5643_v63, 0.0 }
0x1093   :  { %6493 = vmatmul.msk.f32.vlgmr.msra.gmra.mxu3 %vm2580_vm8, %v5644_v60 }
0x1116   :  { %v5681_v59 = vpop.f32.mrf.mxu3 }
0x1117   :  { %v5682_v5 = vadd.f32 %v5681_v59, %v5660_v57 }
0x1119   :  { %v5684_v1 = vmax.f32 %v5682_v5, 0.0 }
0x111b   :  { %6495 = vmatmul.msk.f32.vlgmr.msrb.gmra.mxu0 %vm2869_vm9, %v5684_v1 }
0x1198   :  { %v5720_v47 = vpop.f32.mrf.mxu0 }
0x1199   :  { %v5721_v17 = vadd.f32 %v5720_v47, %v5696_v25 }
0x119b   :  { %5723 = vst.msk [vmem:[#allocation2 + $0x1] sm:$0x1] %vm2896_vm10, %v5721_v17 }
0x119c   :  { %5734 = dma.vmem_to_hbm [thread:$0]  %s5730_s23, 32, %s5732_s13, [#allocation3]  }
0x119d   :  { %6944 = dma.done.wait [#allocation3], 32  }
0x119e   :  { %6945 = vsyncadd [#allocation3], 4294967264 }
0x119f   :  { %5739 = vsyncpa [#allocation3], 1 }

</bundles_post_ra>
